<compile_context>
chip_gen: v6e
topology: v6e:2x2x1
jax: 0.10.0
libtpu: 0.0.40
codegen_flags: <defaults>
</compile_context>

<pallas_src>
import functools
import math

import jax
import jax.numpy as jnp
from jax.experimental import pallas as pl
from jax.experimental.pallas import tpu as pltpu


# ---------------------------------------------------------------------------
# Model configuration
# ---------------------------------------------------------------------------

CFG = dict(
    src_vocab=40,
    d_model=32,          # d_model_encoder
    n_layers=2,          # N_e
    n_head=2,            # n_head_encoder
    d_ff=64,
    conv_k=3,            # ff_conv_kernel_size_encoder
    M=50,                # aligner phone-duration bins
    max_len=64,
)


# ---------------------------------------------------------------------------
# Fused Pallas kernel: whole encoder + aligner for a tile of Bt batch elements
# ---------------------------------------------------------------------------

def _autotts_fused_kernel(
        x_ref, bias_ref,
        ln1g_ref, ln1b_ref, wqkv_ref, bqkv_ref, wo_ref, bo_ref,
        ln2g_ref, ln2b_ref, w1_ref, b1_ref, w2_ref, b2_ref,
        lnfg_ref, lnfb_ref, aw_ref, ab_ref,
        slab_ref, attn_ref,
        *, n_layers, n_head, conv_k, eps):
    """Entire AutoTTS forward for Bt sequences, fully resident in VMEM.

    x_ref:    (Bt, L, d)          embedded tokens + positional encoding
    bias_ref: (Bt, 1, L)          additive key mask (0 keep / -1e9 pad)
    weights:  stacked per-layer, indexed with static (layer, head/tap) ids
    slab_ref: (Bt, L, d + M_pad)  lane-dense packed [encoder out | sigmoid probs]
    attn_ref: (Bt, N_e*H, L, L)   attention probabilities (bf16)
    """
    Bt, L, d = x_ref.shape
    dh = d // n_head
    N = Bt * L
    m_pad = aw_ref.shape[-1]
    scale = 1.0 / math.sqrt(dh)

    # Flattened residual stream (L % 8 == 0 makes this reshape a free
    # re-grouping of whole sublane groups).
    x = x_ref[...].astype(jnp.float32).reshape(N, d)

    # Additive key bias, broadcast ONCE (hoisted; JAX does not CSE
    # broadcast_in_dim, so doing this inside the head loop re-materializes it).
    key_bias = jnp.broadcast_to(bias_ref[...].astype(jnp.float32), (Bt, L, L))

    # Conv-tap edge masks (per-sequence 'same' zero padding), hoisted.
    # Position within the sequence comes straight from a (Bt, L, 1) iota.
    pos = jax.lax.broadcasted_iota(jnp.int32, (Bt, L, 1), 1).reshape(N, 1)
    pad = (conv_k - 1) // 2
    taps = []
    for j in range(conv_k):
        s = pad - j                       # tap j reads y[t + j - pad] = y[t - s]
        if s == 0:
            taps.append((0, None))
        elif s > 0:
            taps.append((s, (pos >= s).astype(jnp.float32)))
        else:
            taps.append((s, (pos < L + s).astype(jnp.float32)))

    def layernorm(y, g, b):
        mu = jnp.mean(y, axis=-1, keepdims=True)
        var = jnp.mean(jnp.square(y - mu), axis=-1, keepdims=True)
        return (y - mu) * jax.lax.rsqrt(var + eps) * g + b

    def conv1d(y, w_ref, li):
        # 'same' depth-to-width conv as conv_k rolled matmuls against per-tap
        # weights; pltpu.roll rides the XLU, masks zero the cross-sequence /
        # out-of-window rows.
        out = None
        for j, (s, m) in enumerate(taps):
            yt = y if s == 0 else pltpu.roll(y, s % N, 0) * m
            t = jnp.dot(yt.astype(jnp.bfloat16), w_ref[li, j],
                        preferred_element_type=jnp.float32)
            out = t if out is None else out + t
        return out

    for li in range(n_layers):
        # --- pre-norm MHSA (per-head projections, no lane slices / concat) ---
        xn = layernorm(x, ln1g_ref[li], ln1b_ref[li])
        xn_bf = xn.astype(jnp.bfloat16)
        attn_out = jnp.zeros((N, d), jnp.float32)
        for h in range(n_head):
            q = jnp.dot(xn_bf, wqkv_ref[li, 0, h],
                        preferred_element_type=jnp.float32) + bqkv_ref[li, 0, h]
            k = jnp.dot(xn_bf, wqkv_ref[li, 1, h],
                        preferred_element_type=jnp.float32) + bqkv_ref[li, 1, h]
            v = jnp.dot(xn_bf, wqkv_ref[li, 2, h],
                        preferred_element_type=jnp.float32) + bqkv_ref[li, 2, h]
            qh = q.reshape(Bt, L, dh).astype(jnp.bfloat16)
            kh = k.reshape(Bt, L, dh).astype(jnp.bfloat16)
            vh = v.reshape(Bt, L, dh).astype(jnp.bfloat16)

            s_ = jax.lax.dot_general(qh, kh, (((2,), (2,)), ((0,), (0,))),
                                     preferred_element_type=jnp.float32)
            s_ = s_ * scale + key_bias                       # (Bt, L, L)
            m_ = jnp.max(s_, axis=-1, keepdims=True)
            p = jnp.exp(s_ - m_)
            p = p / jnp.sum(p, axis=-1, keepdims=True)       # exact: rows sum to 1
            attn_ref[:, li * n_head + h, :, :] = p.astype(attn_ref.dtype)

            ctx = jax.lax.dot_general(p.astype(jnp.bfloat16), vh,
                                      (((2,), (1,)), ((0,), (0,))),
                                      preferred_element_type=jnp.float32)
            attn_out = attn_out + jnp.dot(
                ctx.reshape(N, dh).astype(jnp.bfloat16), wo_ref[li, h],
                preferred_element_type=jnp.float32)
        x = x + attn_out + bo_ref[li]

        # --- pre-norm conv-FFN (roll + per-tap matmuls) + residual -----------
        # TODO(synk): pad-token embeddings still leak into neighbours through
        #             the k=3 receptive field (matches the previous reference).
        xn = layernorm(x, ln2g_ref[li], ln2b_ref[li])
        h1 = jnp.maximum(conv1d(xn, w1_ref, li) + b1_ref[li], 0.0)
        x = x + conv1d(h1, w2_ref, li) + b2_ref[li]

    # --- final encoder LayerNorm + aligner head, packed lane-dense output ----
    e = layernorm(x, lnfg_ref[...], lnfb_ref[...])
    logits = jnp.dot(e.astype(jnp.bfloat16), aw_ref[...],
                     preferred_element_type=jnp.float32) + ab_ref[...]
    pd = jax.nn.sigmoid(logits)                              # (N, M_pad)
    slab = jnp.concatenate([e, pd], axis=-1)                 # (N, d + M_pad) == 128 lanes
    slab_ref[...] = slab.reshape(Bt, L, d + m_pad).astype(slab_ref.dtype)


# ---------------------------------------------------------------------------
# Parameters (deterministic init, weights stored in kernel-friendly layout)
# ---------------------------------------------------------------------------

def sinusoidal_pe(max_len, d_model):
    pos = jnp.arange(max_len, dtype=jnp.float32)[:, None]
    div = jnp.exp(jnp.arange(0, d_model, 2, dtype=jnp.float32)
                  * (-math.log(10000.0) / d_model))
    pe = jnp.zeros((max_len, d_model), jnp.float32)
    pe = pe.at[:, 0::2].set(jnp.sin(pos * div))
    pe = pe.at[:, 1::2].set(jnp.cos(pos * div))
    return pe


def init_params(key, cfg):
    d, dff, k = cfg["d_model"], cfg["d_ff"], cfg["conv_k"]
    Ne, H, M = cfg["n_layers"], cfg["n_head"], cfg["M"]
    dh = d // H
    slab_w = ((d + M + 127) // 128) * 128     # lane-dense packed output width
    m_pad = slab_w - d                        # padded aligner bins (zeros past M)
    ks = jax.random.split(key, 8)

    def nrm(kk, shape, scale=0.02):
        return scale * jax.random.normal(kk, shape, jnp.float32)

    align_w = nrm(ks[1], (d, m_pad))
    align_w = align_w.at[:, M:].set(0.0)

    return dict(
        emb=nrm(ks[0], (cfg["src_vocab"], d)),
        alpha=jnp.float32(1.0),
        pe=sinusoidal_pe(cfg["max_len"], d),
        # per-layer weights stacked along a leading layer axis; matmul weights
        # stored in bf16 (MXU-native), norms/biases in f32
        ln1_g=jnp.ones((Ne, 1, d), jnp.float32),
        ln1_b=jnp.zeros((Ne, 1, d), jnp.float32),
        ln2_g=jnp.ones((Ne, 1, d), jnp.float32),
        ln2_b=jnp.zeros((Ne, 1, d), jnp.float32),
        wqkv=nrm(ks[2], (Ne, 3, H, d, dh)).astype(jnp.bfloat16),   # per-head Q|K|V
        bqkv=jnp.zeros((Ne, 3, H, 1, dh), jnp.float32),
        wo=nrm(ks[3], (Ne, H, dh, d)).astype(jnp.bfloat16),        # per-head out-proj
        bo=jnp.zeros((Ne, 1, d), jnp.float32),
        w1=nrm(ks[4], (Ne, k, d, dff)).astype(jnp.bfloat16),       # per-tap conv weights
        b1=jnp.zeros((Ne, 1, dff), jnp.float32),
        w2=nrm(ks[5], (Ne, k, dff, d)).astype(jnp.bfloat16),
        b2=jnp.zeros((Ne, 1, d), jnp.float32),
        # final LN + aligner head (padded to a lane-dense width)
        lnf_g=jnp.ones((1, d), jnp.float32),
        lnf_b=jnp.zeros((1, d), jnp.float32),
        align_w=align_w.astype(jnp.bfloat16),
        align_b=jnp.zeros((1, m_pad), jnp.float32),
    )


# ---------------------------------------------------------------------------
# Forward pass: one pallas_call for the whole encoder + aligner
# ---------------------------------------------------------------------------

def _pick_batch_tile(B, L, target_rows=256):
    """Largest divisor of B with Bt*L close to an MXU pass, but keep >=2 grid
    steps when possible so both v7x TensorCores get work."""
    bt = max(1, min(B, target_rows // max(L, 1)))
    while B % bt:
        bt -= 1
    if bt == B and B > 1:
        bt = B // 2
        while B % bt:
            bt -= 1
    return max(bt, 1)


def _vmem_budget_bytes(bt, L, cfg, weights, slab_w):
    d, dff, H, Ne = cfg["d_model"], cfg["d_ff"], cfg["n_head"], cfg["n_layers"]
    N = bt * L
    w_bytes = sum(int(w.size) * w.dtype.itemsize for w in weights)
    in_blk = N * d * 4 + bt * L * 4
    out_blk = bt * Ne * H * L * L * 2 + N * slab_w * 4
    act = N * (8 * d + 4 * dff + 6 * L) * 4          # rough activation working set
    total = 2 * w_bytes + 2 * in_blk + 2 * out_blk + act
    return int(min(64 * 2**20, max(16 * 2**20, 2 * total)))


def autotts_forward(params, src, src_mask, cfg=CFG, batch_tile=None):
    """src: (B, L) int32 token ids.  src_mask: (B, L) bool (True = keep)."""
    B, L = src.shape
    d, H, M, Ne = cfg["d_model"], cfg["n_head"], cfg["M"], cfg["n_layers"]
    m_pad = params["align_w"].shape[-1]
    slab_w = d + m_pad

    bt = batch_tile or _pick_batch_tile(B, L)
    assert B % bt == 0, "batch must be divisible by the batch tile"

    # Plain-JAX glue: embedding gather + scaled sinusoidal positional encoding.
    x = params["emb"][src] * jnp.sqrt(jnp.float32(d))
    x = (x + params["alpha"] * params["pe"][:L][None, :, :]).astype(jnp.float32)

    # O(B*L) additive key bias; the (L, L) broadcast happens on-chip, once.
    key_bias = jnp.where(src_mask, 0.0, -1e9).astype(jnp.float32)[:, None, :]

    weight_names = ("ln1_g", "ln1_b", "wqkv", "bqkv", "wo", "bo",
                    "ln2_g", "ln2_b", "w1", "b1", "w2", "b2",
                    "lnf_g", "lnf_b", "align_w", "align_b")
    weights = [params[n] for n in weight_names]

    def resident_spec(arr):
        # Whole-array block with a constant index map: stays resident in VMEM
        # across grid steps (no re-fetch per batch tile).
        nd = arr.ndim
        return pl.BlockSpec(arr.shape, lambda b, _nd=nd: (0,) * _nd)

    kern = functools.partial(_autotts_fused_kernel, n_layers=Ne, n_head=H,
                             conv_k=cfg["conv_k"], eps=1e-5)

    slab, attn = pl.pallas_call(
        kern,
        out_shape=(jax.ShapeDtypeStruct((B, L, slab_w), jnp.float32),
                   jax.ShapeDtypeStruct((B, Ne * H, L, L), jnp.bfloat16)),
        grid=(B // bt,),
        in_specs=([pl.BlockSpec((bt, L, d), lambda b: (b, 0, 0)),
                   pl.BlockSpec((bt, 1, L), lambda b: (b, 0, 0))]
                  + [resident_spec(w) for w in weights]),
        out_specs=(pl.BlockSpec((bt, L, slab_w), lambda b: (b, 0, 0)),
                   pl.BlockSpec((bt, Ne * H, L, L), lambda b: (b, 0, 0, 0))),
        compiler_params=pltpu.CompilerParams(
            dimension_semantics=("parallel",),     # batch-tile grid -> both TCs on v7x
            vmem_limit_bytes=_vmem_budget_bytes(bt, L, cfg, weights, slab_w)),
    )(x, key_bias, *weights)

    e_out = slab[..., :d]
    p_dur = slab[..., d:d + M]
    attn_enc = attn.reshape(B, Ne, H, L, L)        # bf16 attention probabilities
    return e_out, attn_enc, p_dur


# ---------------------------------------------------------------------------
# Demo
# ---------------------------------------------------------------------------

if __name__ == "__main__":
    key = jax.random.PRNGKey(0)
    pkey, dkey = jax.random.split(key)

    params = init_params(pkey, CFG)

    B, L = 4, 16
    # Deterministic token ids (pad id = 0); some trailing padding tokens.
    src = jax.random.randint(dkey, (B, L), 1, CFG["src_vocab"]).astype(jnp.int32)
    src = src.at[1, -3:].set(0)
    src = src.at[3, -5:].set(0)
    src_mask = src != 0

    e_outputs, attn_enc, p_duration_phone = jax.jit(autotts_forward)(
        params, src, src_mask)
    jax.block_until_ready((e_outputs, attn_enc, p_duration_phone))

    assert e_outputs.shape == (B, L, CFG["d_model"])
    assert attn_enc.shape == (B, CFG["n_layers"], CFG["n_head"], L, L)
    assert p_duration_phone.shape == (B, L, CFG["M"])
    assert bool(jnp.all(jnp.isfinite(e_outputs)))
    assert bool(jnp.all((p_duration_phone >= 0) & (p_duration_phone <= 1)))
    row_sums = jnp.sum(attn_enc.astype(jnp.float32), axis=-1)
    assert bool(jnp.all(jnp.abs(row_sums - 1.0) < 2e-2))

    print("KERNEL_OK")
</pallas_src>

<mosaic_0001>
module attributes {stable_mosaic.version = 11 : i64} {
  func.func @_autotts_fused_kernel(%arg0: i32, %arg1: memref<2x16x32xf32, #tpu.memory_space<vmem>>, %arg2: memref<2x1x16xf32, #tpu.memory_space<vmem>>, %arg3: memref<2x1x32xf32, #tpu.memory_space<vmem>>, %arg4: memref<2x1x32xf32, #tpu.memory_space<vmem>>, %arg5: memref<2x3x2x32x16xbf16, #tpu.memory_space<vmem>>, %arg6: memref<2x3x2x1x16xf32, #tpu.memory_space<vmem>>, %arg7: memref<2x2x16x32xbf16, #tpu.memory_space<vmem>>, %arg8: memref<2x1x32xf32, #tpu.memory_space<vmem>>, %arg9: memref<2x1x32xf32, #tpu.memory_space<vmem>>, %arg10: memref<2x1x32xf32, #tpu.memory_space<vmem>>, %arg11: memref<2x3x32x64xbf16, #tpu.memory_space<vmem>>, %arg12: memref<2x1x64xf32, #tpu.memory_space<vmem>>, %arg13: memref<2x3x64x32xbf16, #tpu.memory_space<vmem>>, %arg14: memref<2x1x32xf32, #tpu.memory_space<vmem>>, %arg15: memref<1x32xf32, #tpu.memory_space<vmem>>, %arg16: memref<1x32xf32, #tpu.memory_space<vmem>>, %arg17: memref<32x96xbf16, #tpu.memory_space<vmem>>, %arg18: memref<1x96xf32, #tpu.memory_space<vmem>>, %arg19: memref<2x16x128xf32, #tpu.memory_space<vmem>>, %arg20: memref<2x4x16x16xbf16, #tpu.memory_space<vmem>>) attributes {dimension_semantics = [#tpu.dimension_semantics<parallel>], iteration_bounds = array<i64: 2>, scalar_prefetch = 0 : i64, scratch_operands = 0 : i64, tpu.core_type = #tpu.core_type<tc>, window_params = [{transform_indices = @transform_0, window_bounds = array<i64: 2, 16, 32>}, {transform_indices = @transform_1, window_bounds = array<i64: 2, 1, 16>}, {pipeline_mode = #tpu.pipeline_mode<synchronous>, transform_indices = @transform_2, window_bounds = array<i64: 2, 1, 32>}, {pipeline_mode = #tpu.pipeline_mode<synchronous>, transform_indices = @transform_3, window_bounds = array<i64: 2, 1, 32>}, {pipeline_mode = #tpu.pipeline_mode<synchronous>, transform_indices = @transform_4, window_bounds = array<i64: 2, 3, 2, 32, 16>}, {pipeline_mode = #tpu.pipeline_mode<synchronous>, transform_indices = @transform_5, window_bounds = array<i64: 2, 3, 2, 1, 16>}, {pipeline_mode = #tpu.pipeline_mode<synchronous>, transform_indices = @transform_6, window_bounds = array<i64: 2, 2, 16, 32>}, {pipeline_mode = #tpu.pipeline_mode<synchronous>, transform_indices = @transform_7, window_bounds = array<i64: 2, 1, 32>}, {pipeline_mode = #tpu.pipeline_mode<synchronous>, transform_indices = @transform_8, window_bounds = array<i64: 2, 1, 32>}, {pipeline_mode = #tpu.pipeline_mode<synchronous>, transform_indices = @transform_9, window_bounds = array<i64: 2, 1, 32>}, {pipeline_mode = #tpu.pipeline_mode<synchronous>, transform_indices = @transform_10, window_bounds = array<i64: 2, 3, 32, 64>}, {pipeline_mode = #tpu.pipeline_mode<synchronous>, transform_indices = @transform_11, window_bounds = array<i64: 2, 1, 64>}, {pipeline_mode = #tpu.pipeline_mode<synchronous>, transform_indices = @transform_12, window_bounds = array<i64: 2, 3, 64, 32>}, {pipeline_mode = #tpu.pipeline_mode<synchronous>, transform_indices = @transform_13, window_bounds = array<i64: 2, 1, 32>}, {pipeline_mode = #tpu.pipeline_mode<synchronous>, transform_indices = @transform_14, window_bounds = array<i64: 1, 32>}, {pipeline_mode = #tpu.pipeline_mode<synchronous>, transform_indices = @transform_15, window_bounds = array<i64: 1, 32>}, {pipeline_mode = #tpu.pipeline_mode<synchronous>, transform_indices = @transform_16, window_bounds = array<i64: 32, 96>}, {pipeline_mode = #tpu.pipeline_mode<synchronous>, transform_indices = @transform_17, window_bounds = array<i64: 1, 96>}, {transform_indices = @transform_18, window_bounds = array<i64: 2, 16, 128>}, {transform_indices = @transform_19, window_bounds = array<i64: 2, 4, 16, 16>}]} {
    %c0 = arith.constant 0 : index
    %c0_0 = arith.constant 0 : index
    %c0_1 = arith.constant 0 : index
    %0 = vector.load %arg1[%c0, %c0_0, %c0_1] : memref<2x16x32xf32, #tpu.memory_space<vmem>>, vector<2x16x32xf32>
    %1 = vector.shape_cast %0 : vector<2x16x32xf32> to vector<32x32xf32>
    %c0_2 = arith.constant 0 : index
    %c0_3 = arith.constant 0 : index
    %c0_4 = arith.constant 0 : index
    %2 = vector.load %arg2[%c0_2, %c0_3, %c0_4] : memref<2x1x16xf32, #tpu.memory_space<vmem>>, vector<2x1x16xf32>
    %3 = vector.shape_cast %2 : vector<2x1x16xf32> to vector<2x1x16xf32>
    %4 = vector.broadcast %3 : vector<2x1x16xf32> to vector<2x16x16xf32>
    %5 = tpu.iota {dimensions = array<i32: 1>} : vector<2x16x1xi32>
    %6 = vector.shape_cast %5 : vector<2x16x1xi32> to vector<32x1xi32>
    %c1_i32 = arith.constant 1 : i32
    %7 = vector.broadcast %c1_i32 : i32 to vector<32x1xi32>
    %8 = arith.cmpi sge, %6, %7 : vector<32x1xi32>
    %9 = arith.extui %8 : vector<32x1xi1> to vector<32x1xi32>
    %10 = arith.sitofp %9 : vector<32x1xi32> to vector<32x1xf32>
    %c15_i32 = arith.constant 15 : i32
    %11 = vector.broadcast %c15_i32 : i32 to vector<32x1xi32>
    %12 = arith.cmpi slt, %6, %11 : vector<32x1xi32>
    %13 = arith.extui %12 : vector<32x1xi1> to vector<32x1xi32>
    %14 = arith.sitofp %13 : vector<32x1xi32> to vector<32x1xf32>
    %c0_5 = arith.constant 0 : index
    %c0_6 = arith.constant 0 : index
    %c0_7 = arith.constant 0 : index
    %15 = vector.load %arg3[%c0_5, %c0_6, %c0_7] : memref<2x1x32xf32, #tpu.memory_space<vmem>>, vector<1x1x32xf32>
    %16 = vector.shape_cast %15 : vector<1x1x32xf32> to vector<1x32xf32>
    %c0_8 = arith.constant 0 : index
    %c0_9 = arith.constant 0 : index
    %c0_10 = arith.constant 0 : index
    %17 = vector.load %arg4[%c0_8, %c0_9, %c0_10] : memref<2x1x32xf32, #tpu.memory_space<vmem>>, vector<1x1x32xf32>
    %18 = vector.shape_cast %17 : vector<1x1x32xf32> to vector<1x32xf32>
    %cst = arith.constant dense<0.000000e+00> : vector<32xf32>
    %19 = vector.multi_reduction <add>, %1, %cst [1] : vector<32x32xf32> to vector<32xf32>
    %20 = vector.shape_cast %19 : vector<32xf32> to vector<32x1xf32>
    %cst_11 = arith.constant 3.200000e+01 : f32
    %21 = vector.broadcast %cst_11 : f32 to vector<32x1xf32>
    %22 = arith.divf %20, %21 : vector<32x1xf32>
    %23 = vector.broadcast %22 : vector<32x1xf32> to vector<32x32xf32>
    %24 = arith.subf %1, %23 : vector<32x32xf32>
    %25 = arith.mulf %24, %24 : vector<32x32xf32>
    %cst_12 = arith.constant dense<0.000000e+00> : vector<32xf32>
    %26 = vector.multi_reduction <add>, %25, %cst_12 [1] : vector<32x32xf32> to vector<32xf32>
    %27 = vector.shape_cast %26 : vector<32xf32> to vector<32x1xf32>
    %cst_13 = arith.constant 3.200000e+01 : f32
    %28 = vector.broadcast %cst_13 : f32 to vector<32x1xf32>
    %29 = arith.divf %27, %28 : vector<32x1xf32>
    %30 = vector.broadcast %22 : vector<32x1xf32> to vector<32x32xf32>
    %31 = arith.subf %1, %30 : vector<32x32xf32>
    %cst_14 = arith.constant 9.99999974E-6 : f32
    %32 = vector.broadcast %cst_14 : f32 to vector<32x1xf32>
    %33 = arith.addf %29, %32 : vector<32x1xf32>
    %34 = math.rsqrt %33 : vector<32x1xf32>
    %35 = vector.broadcast %34 : vector<32x1xf32> to vector<32x32xf32>
    %36 = arith.mulf %31, %35 : vector<32x32xf32>
    %37 = vector.broadcast %16 : vector<1x32xf32> to vector<32x32xf32>
    %38 = arith.mulf %36, %37 : vector<32x32xf32>
    %39 = vector.broadcast %18 : vector<1x32xf32> to vector<32x32xf32>
    %40 = arith.addf %38, %39 : vector<32x32xf32>
    %41 = arith.truncf %40 : vector<32x32xf32> to vector<32x32xbf16>
    %cst_15 = arith.constant 0.000000e+00 : f32
    %42 = vector.broadcast %cst_15 : f32 to vector<32x32xf32>
    %c0_16 = arith.constant 0 : index
    %c0_17 = arith.constant 0 : index
    %c0_18 = arith.constant 0 : index
    %c0_19 = arith.constant 0 : index
    %c0_20 = arith.constant 0 : index
    %43 = vector.load %arg5[%c0_16, %c0_17, %c0_18, %c0_19, %c0_20] : memref<2x3x2x32x16xbf16, #tpu.memory_space<vmem>>, vector<1x1x1x32x16xbf16>
    %44 = vector.shape_cast %43 : vector<1x1x1x32x16xbf16> to vector<32x16xbf16>
    %cst_21 = arith.constant dense<0.000000e+00> : vector<32x16xf32>
    %45 = tpu.matmul %41, %44, %cst_21 {dimension_numbers = #tpu.dot_dimension_numbers<[1], [0], [0], [1], [0, 0, 1, 1], [], []>} : vector<32x32xbf16>, vector<32x16xbf16>, vector<32x16xf32> -> vector<32x16xf32>
    %c0_22 = arith.constant 0 : index
    %c0_23 = arith.constant 0 : index
    %c0_24 = arith.constant 0 : index
    %c0_25 = arith.constant 0 : index
    %c0_26 = arith.constant 0 : index
    %46 = vector.load %arg6[%c0_22, %c0_23, %c0_24, %c0_25, %c0_26] : memref<2x3x2x1x16xf32, #tpu.memory_space<vmem>>, vector<1x1x1x1x16xf32>
    %47 = vector.shape_cast %46 : vector<1x1x1x1x16xf32> to vector<1x16xf32>
    %48 = vector.broadcast %47 : vector<1x16xf32> to vector<32x16xf32>
    %49 = arith.addf %45, %48 : vector<32x16xf32>
    %c0_27 = arith.constant 0 : index
    %c1 = arith.constant 1 : index
    %c0_28 = arith.constant 0 : index
    %c0_29 = arith.constant 0 : index
    %c0_30 = arith.constant 0 : index
    %50 = vector.load %arg5[%c0_27, %c1, %c0_28, %c0_29, %c0_30] : memref<2x3x2x32x16xbf16, #tpu.memory_space<vmem>>, vector<1x1x1x32x16xbf16>
    %51 = vector.shape_cast %50 : vector<1x1x1x32x16xbf16> to vector<32x16xbf16>
    %cst_31 = arith.constant dense<0.000000e+00> : vector<32x16xf32>
    %52 = tpu.matmul %41, %51, %cst_31 {dimension_numbers = #tpu.dot_dimension_numbers<[1], [0], [0], [1], [0, 0, 1, 1], [], []>} : vector<32x32xbf16>, vector<32x16xbf16>, vector<32x16xf32> -> vector<32x16xf32>
    %c0_32 = arith.constant 0 : index
    %c1_33 = arith.constant 1 : index
    %c0_34 = arith.constant 0 : index
    %c0_35 = arith.constant 0 : index
    %c0_36 = arith.constant 0 : index
    %53 = vector.load %arg6[%c0_32, %c1_33, %c0_34, %c0_35, %c0_36] : memref<2x3x2x1x16xf32, #tpu.memory_space<vmem>>, vector<1x1x1x1x16xf32>
    %54 = vector.shape_cast %53 : vector<1x1x1x1x16xf32> to vector<1x16xf32>
    %55 = vector.broadcast %54 : vector<1x16xf32> to vector<32x16xf32>
    %56 = arith.addf %52, %55 : vector<32x16xf32>
    %c0_37 = arith.constant 0 : index
    %c2 = arith.constant 2 : index
    %c0_38 = arith.constant 0 : index
    %c0_39 = arith.constant 0 : index
    %c0_40 = arith.constant 0 : index
    %57 = vector.load %arg5[%c0_37, %c2, %c0_38, %c0_39, %c0_40] : memref<2x3x2x32x16xbf16, #tpu.memory_space<vmem>>, vector<1x1x1x32x16xbf16>
    %58 = vector.shape_cast %57 : vector<1x1x1x32x16xbf16> to vector<32x16xbf16>
    %cst_41 = arith.constant dense<0.000000e+00> : vector<32x16xf32>
    %59 = tpu.matmul %41, %58, %cst_41 {dimension_numbers = #tpu.dot_dimension_numbers<[1], [0], [0], [1], [0, 0, 1, 1], [], []>} : vector<32x32xbf16>, vector<32x16xbf16>, vector<32x16xf32> -> vector<32x16xf32>
    %c0_42 = arith.constant 0 : index
    %c2_43 = arith.constant 2 : index
    %c0_44 = arith.constant 0 : index
    %c0_45 = arith.constant 0 : index
    %c0_46 = arith.constant 0 : index
    %60 = vector.load %arg6[%c0_42, %c2_43, %c0_44, %c0_45, %c0_46] : memref<2x3x2x1x16xf32, #tpu.memory_space<vmem>>, vector<1x1x1x1x16xf32>
    %61 = vector.shape_cast %60 : vector<1x1x1x1x16xf32> to vector<1x16xf32>
    %62 = vector.broadcast %61 : vector<1x16xf32> to vector<32x16xf32>
    %63 = arith.addf %59, %62 : vector<32x16xf32>
    %64 = vector.shape_cast %49 : vector<32x16xf32> to vector<2x16x16xf32>
    %65 = arith.truncf %64 : vector<2x16x16xf32> to vector<2x16x16xbf16>
    %66 = vector.shape_cast %56 : vector<32x16xf32> to vector<2x16x16xf32>
    %67 = arith.truncf %66 : vector<2x16x16xf32> to vector<2x16x16xbf16>
    %68 = vector.shape_cast %63 : vector<32x16xf32> to vector<2x16x16xf32>
    %69 = arith.truncf %68 : vector<2x16x16xf32> to vector<2x16x16xbf16>
    %cst_47 = arith.constant dense<0.000000e+00> : vector<2x16x16xf32>
    %70 = tpu.matmul %65, %67, %cst_47 {dimension_numbers = #tpu.dot_dimension_numbers<[2], [2], [1], [1], [0, 0, 0, 1, 1, 1], [0], [0]>} : vector<2x16x16xbf16>, vector<2x16x16xbf16>, vector<2x16x16xf32> -> vector<2x16x16xf32>
    %cst_48 = arith.constant 2.500000e-01 : f32
    %71 = vector.broadcast %cst_48 : f32 to vector<2x16x16xf32>
    %72 = arith.mulf %70, %71 : vector<2x16x16xf32>
    %73 = arith.addf %72, %4 : vector<2x16x16xf32>
    %cst_49 = arith.constant dense<0xFF800000> : vector<2x16xf32>
    %74 = vector.multi_reduction <maximumf>, %73, %cst_49 [2] : vector<2x16x16xf32> to vector<2x16xf32>
    %75 = vector.shape_cast %74 : vector<2x16xf32> to vector<2x16x1xf32>
    %76 = vector.broadcast %75 : vector<2x16x1xf32> to vector<2x16x16xf32>
    %77 = arith.subf %73, %76 : vector<2x16x16xf32>
    %78 = math.exp %77 : vector<2x16x16xf32>
    %cst_50 = arith.constant dense<0.000000e+00> : vector<2x16xf32>
    %79 = vector.multi_reduction <add>, %78, %cst_50 [2] : vector<2x16x16xf32> to vector<2x16xf32>
    %80 = vector.shape_cast %79 : vector<2x16xf32> to vector<2x16x1xf32>
    %81 = vector.broadcast %80 : vector<2x16x1xf32> to vector<2x16x16xf32>
    %82 = arith.divf %78, %81 : vector<2x16x16xf32>
    %83 = arith.truncf %82 : vector<2x16x16xf32> to vector<2x16x16xbf16>
    %c0_51 = arith.constant 0 : index
    %c0_52 = arith.constant 0 : index
    %c0_53 = arith.constant 0 : index
    %c0_54 = arith.constant 0 : index
    %84 = vector.load %arg20[%c0_51, %c0_52, %c0_53, %c0_54] : memref<2x4x16x16xbf16, #tpu.memory_space<vmem>>, vector<2x1x16x16xbf16>
    %85 = vector.shape_cast %84 : vector<2x1x16x16xbf16> to vector<2x16x16xbf16>
    %86 = vector.shape_cast %83 : vector<2x16x16xbf16> to vector<2x1x16x16xbf16>
    tpu.vector_store %arg20[%c0_51, %c0_52, %c0_53, %c0_54], %86 {strides = array<i32>} : memref<2x4x16x16xbf16, #tpu.memory_space<vmem>>, vector<2x1x16x16xbf16>,
    %87 = arith.truncf %82 : vector<2x16x16xf32> to vector<2x16x16xbf16>
    %cst_55 = arith.constant dense<0.000000e+00> : vector<2x16x16xf32>
    %88 = tpu.matmul %87, %69, %cst_55 {dimension_numbers = #tpu.dot_dimension_numbers<[2], [1], [1], [2], [0, 0, 0, 1, 1, 2], [0], [0]>} : vector<2x16x16xbf16>, vector<2x16x16xbf16>, vector<2x16x16xf32> -> vector<2x16x16xf32>
    %89 = vector.shape_cast %88 : vector<2x16x16xf32> to vector<32x16xf32>
    %90 = arith.truncf %89 : vector<32x16xf32> to vector<32x16xbf16>
    %c0_56 = arith.constant 0 : index
    %c0_57 = arith.constant 0 : index
    %c0_58 = arith.constant 0 : index
    %c0_59 = arith.constant 0 : index
    %91 = vector.load %arg7[%c0_56, %c0_57, %c0_58, %c0_59] : memref<2x2x16x32xbf16, #tpu.memory_space<vmem>>, vector<1x1x16x32xbf16>
    %92 = vector.shape_cast %91 : vector<1x1x16x32xbf16> to vector<16x32xbf16>
    %cst_60 = arith.constant dense<0.000000e+00> : vector<32x32xf32>
    %93 = tpu.matmul %90, %92, %cst_60 {dimension_numbers = #tpu.dot_dimension_numbers<[1], [0], [0], [1], [0, 0, 1, 1], [], []>} : vector<32x16xbf16>, vector<16x32xbf16>, vector<32x32xf32> -> vector<32x32xf32>
    %94 = arith.addf %42, %93 : vector<32x32xf32>
    %c0_61 = arith.constant 0 : index
    %c0_62 = arith.constant 0 : index
    %c1_63 = arith.constant 1 : index
    %c0_64 = arith.constant 0 : index
    %c0_65 = arith.constant 0 : index
    %95 = vector.load %arg5[%c0_61, %c0_62, %c1_63, %c0_64, %c0_65] : memref<2x3x2x32x16xbf16, #tpu.memory_space<vmem>>, vector<1x1x1x32x16xbf16>
    %96 = vector.shape_cast %95 : vector<1x1x1x32x16xbf16> to vector<32x16xbf16>
    %cst_66 = arith.constant dense<0.000000e+00> : vector<32x16xf32>
    %97 = tpu.matmul %41, %96, %cst_66 {dimension_numbers = #tpu.dot_dimension_numbers<[1], [0], [0], [1], [0, 0, 1, 1], [], []>} : vector<32x32xbf16>, vector<32x16xbf16>, vector<32x16xf32> -> vector<32x16xf32>
    %c0_67 = arith.constant 0 : index
    %c0_68 = arith.constant 0 : index
    %c1_69 = arith.constant 1 : index
    %c0_70 = arith.constant 0 : index
    %c0_71 = arith.constant 0 : index
    %98 = vector.load %arg6[%c0_67, %c0_68, %c1_69, %c0_70, %c0_71] : memref<2x3x2x1x16xf32, #tpu.memory_space<vmem>>, vector<1x1x1x1x16xf32>
    %99 = vector.shape_cast %98 : vector<1x1x1x1x16xf32> to vector<1x16xf32>
    %100 = vector.broadcast %99 : vector<1x16xf32> to vector<32x16xf32>
    %101 = arith.addf %97, %100 : vector<32x16xf32>
    %c0_72 = arith.constant 0 : index
    %c1_73 = arith.constant 1 : index
    %c1_74 = arith.constant 1 : index
    %c0_75 = arith.constant 0 : index
    %c0_76 = arith.constant 0 : index
    %102 = vector.load %arg5[%c0_72, %c1_73, %c1_74, %c0_75, %c0_76] : memref<2x3x2x32x16xbf16, #tpu.memory_space<vmem>>, vector<1x1x1x32x16xbf16>
    %103 = vector.shape_cast %102 : vector<1x1x1x32x16xbf16> to vector<32x16xbf16>
    %cst_77 = arith.constant dense<0.000000e+00> : vector<32x16xf32>
    %104 = tpu.matmul %41, %103, %cst_77 {dimension_numbers = #tpu.dot_dimension_numbers<[1], [0], [0], [1], [0, 0, 1, 1], [], []>} : vector<32x32xbf16>, vector<32x16xbf16>, vector<32x16xf32> -> vector<32x16xf32>
    %c0_78 = arith.constant 0 : index
    %c1_79 = arith.constant 1 : index
    %c1_80 = arith.constant 1 : index
    %c0_81 = arith.constant 0 : index
    %c0_82 = arith.constant 0 : index
    %105 = vector.load %arg6[%c0_78, %c1_79, %c1_80, %c0_81, %c0_82] : memref<2x3x2x1x16xf32, #tpu.memory_space<vmem>>, vector<1x1x1x1x16xf32>
    %106 = vector.shape_cast %105 : vector<1x1x1x1x16xf32> to vector<1x16xf32>
    %107 = vector.broadcast %106 : vector<1x16xf32> to vector<32x16xf32>
    %108 = arith.addf %104, %107 : vector<32x16xf32>
    %c0_83 = arith.constant 0 : index
    %c2_84 = arith.constant 2 : index
    %c1_85 = arith.constant 1 : index
    %c0_86 = arith.constant 0 : index
    %c0_87 = arith.constant 0 : index
    %109 = vector.load %arg5[%c0_83, %c2_84, %c1_85, %c0_86, %c0_87] : memref<2x3x2x32x16xbf16, #tpu.memory_space<vmem>>, vector<1x1x1x32x16xbf16>
    %110 = vector.shape_cast %109 : vector<1x1x1x32x16xbf16> to vector<32x16xbf16>
    %cst_88 = arith.constant dense<0.000000e+00> : vector<32x16xf32>
    %111 = tpu.matmul %41, %110, %cst_88 {dimension_numbers = #tpu.dot_dimension_numbers<[1], [0], [0], [1], [0, 0, 1, 1], [], []>} : vector<32x32xbf16>, vector<32x16xbf16>, vector<32x16xf32> -> vector<32x16xf32>
    %c0_89 = arith.constant 0 : index
    %c2_90 = arith.constant 2 : index
    %c1_91 = arith.constant 1 : index
    %c0_92 = arith.constant 0 : index
    %c0_93 = arith.constant 0 : index
    %112 = vector.load %arg6[%c0_89, %c2_90, %c1_91, %c0_92, %c0_93] : memref<2x3x2x1x16xf32, #tpu.memory_space<vmem>>, vector<1x1x1x1x16xf32>
    %113 = vector.shape_cast %112 : vector<1x1x1x1x16xf32> to vector<1x16xf32>
    %114 = vector.broadcast %113 : vector<1x16xf32> to vector<32x16xf32>
    %115 = arith.addf %111, %114 : vector<32x16xf32>
    %116 = vector.shape_cast %101 : vector<32x16xf32> to vector<2x16x16xf32>
    %117 = arith.truncf %116 : vector<2x16x16xf32> to vector<2x16x16xbf16>
    %118 = vector.shape_cast %108 : vector<32x16xf32> to vector<2x16x16xf32>
    %119 = arith.truncf %118 : vector<2x16x16xf32> to vector<2x16x16xbf16>
    %120 = vector.shape_cast %115 : vector<32x16xf32> to vector<2x16x16xf32>
    %121 = arith.truncf %120 : vector<2x16x16xf32> to vector<2x16x16xbf16>
    %cst_94 = arith.constant dense<0.000000e+00> : vector<2x16x16xf32>
    %122 = tpu.matmul %117, %119, %cst_94 {dimension_numbers = #tpu.dot_dimension_numbers<[2], [2], [1], [1], [0, 0, 0, 1, 1, 1], [0], [0]>} : vector<2x16x16xbf16>, vector<2x16x16xbf16>, vector<2x16x16xf32> -> vector<2x16x16xf32>
    %cst_95 = arith.constant 2.500000e-01 : f32
    %123 = vector.broadcast %cst_95 : f32 to vector<2x16x16xf32>
    %124 = arith.mulf %122, %123 : vector<2x16x16xf32>
    %125 = arith.addf %124, %4 : vector<2x16x16xf32>
    %cst_96 = arith.constant dense<0xFF800000> : vector<2x16xf32>
    %126 = vector.multi_reduction <maximumf>, %125, %cst_96 [2] : vector<2x16x16xf32> to vector<2x16xf32>
    %127 = vector.shape_cast %126 : vector<2x16xf32> to vector<2x16x1xf32>
    %128 = vector.broadcast %127 : vector<2x16x1xf32> to vector<2x16x16xf32>
    %129 = arith.subf %125, %128 : vector<2x16x16xf32>
    %130 = math.exp %129 : vector<2x16x16xf32>
    %cst_97 = arith.constant dense<0.000000e+00> : vector<2x16xf32>
    %131 = vector.multi_reduction <add>, %130, %cst_97 [2] : vector<2x16x16xf32> to vector<2x16xf32>
    %132 = vector.shape_cast %131 : vector<2x16xf32> to vector<2x16x1xf32>
    %133 = vector.broadcast %132 : vector<2x16x1xf32> to vector<2x16x16xf32>
    %134 = arith.divf %130, %133 : vector<2x16x16xf32>
    %135 = arith.truncf %134 : vector<2x16x16xf32> to vector<2x16x16xbf16>
    %c0_98 = arith.constant 0 : index
    %c1_99 = arith.constant 1 : index
    %c0_100 = arith.constant 0 : index
    %c0_101 = arith.constant 0 : index
    %136 = vector.load %arg20[%c0_98, %c1_99, %c0_100, %c0_101] : memref<2x4x16x16xbf16, #tpu.memory_space<vmem>>, vector<2x1x16x16xbf16>
    %137 = vector.shape_cast %136 : vector<2x1x16x16xbf16> to vector<2x16x16xbf16>
    %138 = vector.shape_cast %135 : vector<2x16x16xbf16> to vector<2x1x16x16xbf16>
    tpu.vector_store %arg20[%c0_98, %c1_99, %c0_100, %c0_101], %138 {strides = array<i32>} : memref<2x4x16x16xbf16, #tpu.memory_space<vmem>>, vector<2x1x16x16xbf16>,
    %139 = arith.truncf %134 : vector<2x16x16xf32> to vector<2x16x16xbf16>
    %cst_102 = arith.constant dense<0.000000e+00> : vector<2x16x16xf32>
    %140 = tpu.matmul %139, %121, %cst_102 {dimension_numbers = #tpu.dot_dimension_numbers<[2], [1], [1], [2], [0, 0, 0, 1, 1, 2], [0], [0]>} : vector<2x16x16xbf16>, vector<2x16x16xbf16>, vector<2x16x16xf32> -> vector<2x16x16xf32>
    %141 = vector.shape_cast %140 : vector<2x16x16xf32> to vector<32x16xf32>
    %142 = arith.truncf %141 : vector<32x16xf32> to vector<32x16xbf16>
    %c0_103 = arith.constant 0 : index
    %c1_104 = arith.constant 1 : index
    %c0_105 = arith.constant 0 : index
    %c0_106 = arith.constant 0 : index
    %143 = vector.load %arg7[%c0_103, %c1_104, %c0_105, %c0_106] : memref<2x2x16x32xbf16, #tpu.memory_space<vmem>>, vector<1x1x16x32xbf16>
    %144 = vector.shape_cast %143 : vector<1x1x16x32xbf16> to vector<16x32xbf16>
    %cst_107 = arith.constant dense<0.000000e+00> : vector<32x32xf32>
    %145 = tpu.matmul %142, %144, %cst_107 {dimension_numbers = #tpu.dot_dimension_numbers<[1], [0], [0], [1], [0, 0, 1, 1], [], []>} : vector<32x16xbf16>, vector<16x32xbf16>, vector<32x32xf32> -> vector<32x32xf32>
    %146 = arith.addf %94, %145 : vector<32x32xf32>
    %147 = arith.addf %1, %146 : vector<32x32xf32>
    %c0_108 = arith.constant 0 : index
    %c0_109 = arith.constant 0 : index
    %c0_110 = arith.constant 0 : index
    %148 = vector.load %arg8[%c0_108, %c0_109, %c0_110] : memref<2x1x32xf32, #tpu.memory_space<vmem>>, vector<1x1x32xf32>
    %149 = vector.shape_cast %148 : vector<1x1x32xf32> to vector<1x32xf32>
    %150 = vector.broadcast %149 : vector<1x32xf32> to vector<32x32xf32>
    %151 = arith.addf %147, %150 : vector<32x32xf32>
    %c0_111 = arith.constant 0 : index
    %c0_112 = arith.constant 0 : index
    %c0_113 = arith.constant 0 : index
    %152 = vector.load %arg9[%c0_111, %c0_112, %c0_113] : memref<2x1x32xf32, #tpu.memory_space<vmem>>, vector<1x1x32xf32>
    %153 = vector.shape_cast %152 : vector<1x1x32xf32> to vector<1x32xf32>
    %c0_114 = arith.constant 0 : index
    %c0_115 = arith.constant 0 : index
    %c0_116 = arith.constant 0 : index
    %154 = vector.load %arg10[%c0_114, %c0_115, %c0_116] : memref<2x1x32xf32, #tpu.memory_space<vmem>>, vector<1x1x32xf32>
    %155 = vector.shape_cast %154 : vector<1x1x32xf32> to vector<1x32xf32>
    %cst_117 = arith.constant dense<0.000000e+00> : vector<32xf32>
    %156 = vector.multi_reduction <add>, %151, %cst_117 [1] : vector<32x32xf32> to vector<32xf32>
    %157 = vector.shape_cast %156 : vector<32xf32> to vector<32x1xf32>
    %cst_118 = arith.constant 3.200000e+01 : f32
    %158 = vector.broadcast %cst_118 : f32 to vector<32x1xf32>
    %159 = arith.divf %157, %158 : vector<32x1xf32>
    %160 = vector.broadcast %159 : vector<32x1xf32> to vector<32x32xf32>
    %161 = arith.subf %151, %160 : vector<32x32xf32>
    %162 = arith.mulf %161, %161 : vector<32x32xf32>
    %cst_119 = arith.constant dense<0.000000e+00> : vector<32xf32>
    %163 = vector.multi_reduction <add>, %162, %cst_119 [1] : vector<32x32xf32> to vector<32xf32>
    %164 = vector.shape_cast %163 : vector<32xf32> to vector<32x1xf32>
    %cst_120 = arith.constant 3.200000e+01 : f32
    %165 = vector.broadcast %cst_120 : f32 to vector<32x1xf32>
    %166 = arith.divf %164, %165 : vector<32x1xf32>
    %167 = vector.broadcast %159 : vector<32x1xf32> to vector<32x32xf32>
    %168 = arith.subf %151, %167 : vector<32x32xf32>
    %cst_121 = arith.constant 9.99999974E-6 : f32
    %169 = vector.broadcast %cst_121 : f32 to vector<32x1xf32>
    %170 = arith.addf %166, %169 : vector<32x1xf32>
    %171 = math.rsqrt %170 : vector<32x1xf32>
    %172 = vector.broadcast %171 : vector<32x1xf32> to vector<32x32xf32>
    %173 = arith.mulf %168, %172 : vector<32x32xf32>
    %174 = vector.broadcast %153 : vector<1x32xf32> to vector<32x32xf32>
    %175 = arith.mulf %173, %174 : vector<32x32xf32>
    %176 = vector.broadcast %155 : vector<1x32xf32> to vector<32x32xf32>
    %177 = arith.addf %175, %176 : vector<32x32xf32>
    %c1_i32_122 = arith.constant 1 : i32
    %178 = tpu.dynamic_rotate %177 by %c1_i32_122 dim 0 : vector<32x32xf32>, i32 -> vector<32x32xf32>
    %179 = vector.broadcast %10 : vector<32x1xf32> to vector<32x32xf32>
    %180 = arith.mulf %178, %179 : vector<32x32xf32>
    %181 = arith.truncf %180 : vector<32x32xf32> to vector<32x32xbf16>
    %c0_123 = arith.constant 0 : index
    %c0_124 = arith.constant 0 : index
    %c0_125 = arith.constant 0 : index
    %c0_126 = arith.constant 0 : index
    %182 = vector.load %arg11[%c0_123, %c0_124, %c0_125, %c0_126] : memref<2x3x32x64xbf16, #tpu.memory_space<vmem>>, vector<1x1x32x64xbf16>
    %183 = vector.shape_cast %182 : vector<1x1x32x64xbf16> to vector<32x64xbf16>
    %cst_127 = arith.constant dense<0.000000e+00> : vector<32x64xf32>
    %184 = tpu.matmul %181, %183, %cst_127 {dimension_numbers = #tpu.dot_dimension_numbers<[1], [0], [0], [1], [0, 0, 1, 1], [], []>} : vector<32x32xbf16>, vector<32x64xbf16>, vector<32x64xf32> -> vector<32x64xf32>
    %185 = arith.truncf %177 : vector<32x32xf32> to vector<32x32xbf16>
    %c0_128 = arith.constant 0 : index
    %c1_129 = arith.constant 1 : index
    %c0_130 = arith.constant 0 : index
    %c0_131 = arith.constant 0 : index
    %186 = vector.load %arg11[%c0_128, %c1_129, %c0_130, %c0_131] : memref<2x3x32x64xbf16, #tpu.memory_space<vmem>>, vector<1x1x32x64xbf16>
    %187 = vector.shape_cast %186 : vector<1x1x32x64xbf16> to vector<32x64xbf16>
    %cst_132 = arith.constant dense<0.000000e+00> : vector<32x64xf32>
    %188 = tpu.matmul %185, %187, %cst_132 {dimension_numbers = #tpu.dot_dimension_numbers<[1], [0], [0], [1], [0, 0, 1, 1], [], []>} : vector<32x32xbf16>, vector<32x64xbf16>, vector<32x64xf32> -> vector<32x64xf32>
    %189 = arith.addf %184, %188 : vector<32x64xf32>
    %c31_i32 = arith.constant 31 : i32
    %190 = tpu.dynamic_rotate %177 by %c31_i32 dim 0 : vector<32x32xf32>, i32 -> vector<32x32xf32>
    %191 = vector.broadcast %14 : vector<32x1xf32> to vector<32x32xf32>
    %192 = arith.mulf %190, %191 : vector<32x32xf32>
    %193 = arith.truncf %192 : vector<32x32xf32> to vector<32x32xbf16>
    %c0_133 = arith.constant 0 : index
    %c2_134 = arith.constant 2 : index
    %c0_135 = arith.constant 0 : index
    %c0_136 = arith.constant 0 : index
    %194 = vector.load %arg11[%c0_133, %c2_134, %c0_135, %c0_136] : memref<2x3x32x64xbf16, #tpu.memory_space<vmem>>, vector<1x1x32x64xbf16>
    %195 = vector.shape_cast %194 : vector<1x1x32x64xbf16> to vector<32x64xbf16>
    %cst_137 = arith.constant dense<0.000000e+00> : vector<32x64xf32>
    %196 = tpu.matmul %193, %195, %cst_137 {dimension_numbers = #tpu.dot_dimension_numbers<[1], [0], [0], [1], [0, 0, 1, 1], [], []>} : vector<32x32xbf16>, vector<32x64xbf16>, vector<32x64xf32> -> vector<32x64xf32>
    %197 = arith.addf %189, %196 : vector<32x64xf32>
    %c0_138 = arith.constant 0 : index
    %c0_139 = arith.constant 0 : index
    %c0_140 = arith.constant 0 : index
    %198 = vector.load %arg12[%c0_138, %c0_139, %c0_140] : memref<2x1x64xf32, #tpu.memory_space<vmem>>, vector<1x1x64xf32>
    %199 = vector.shape_cast %198 : vector<1x1x64xf32> to vector<1x64xf32>
    %200 = vector.broadcast %199 : vector<1x64xf32> to vector<32x64xf32>
    %201 = arith.addf %197, %200 : vector<32x64xf32>
    %cst_141 = arith.constant 0.000000e+00 : f32
    %202 = vector.broadcast %cst_141 : f32 to vector<32x64xf32>
    %203 = arith.maximumf %201, %202 : vector<32x64xf32>
    %c1_i32_142 = arith.constant 1 : i32
    %204 = tpu.dynamic_rotate %203 by %c1_i32_142 dim 0 : vector<32x64xf32>, i32 -> vector<32x64xf32>
    %205 = vector.broadcast %10 : vector<32x1xf32> to vector<32x64xf32>
    %206 = arith.mulf %204, %205 : vector<32x64xf32>
    %207 = arith.truncf %206 : vector<32x64xf32> to vector<32x64xbf16>
    %c0_143 = arith.constant 0 : index
    %c0_144 = arith.constant 0 : index
    %c0_145 = arith.constant 0 : index
    %c0_146 = arith.constant 0 : index
    %208 = vector.load %arg13[%c0_143, %c0_144, %c0_145, %c0_146] : memref<2x3x64x32xbf16, #tpu.memory_space<vmem>>, vector<1x1x64x32xbf16>
    %209 = vector.shape_cast %208 : vector<1x1x64x32xbf16> to vector<64x32xbf16>
    %cst_147 = arith.constant dense<0.000000e+00> : vector<32x32xf32>
    %210 = tpu.matmul %207, %209, %cst_147 {dimension_numbers = #tpu.dot_dimension_numbers<[1], [0], [0], [1], [0, 0, 1, 1], [], []>} : vector<32x64xbf16>, vector<64x32xbf16>, vector<32x32xf32> -> vector<32x32xf32>
    %211 = arith.truncf %203 : vector<32x64xf32> to vector<32x64xbf16>
    %c0_148 = arith.constant 0 : index
    %c1_149 = arith.constant 1 : index
    %c0_150 = arith.constant 0 : index
    %c0_151 = arith.constant 0 : index
    %212 = vector.load %arg13[%c0_148, %c1_149, %c0_150, %c0_151] : memref<2x3x64x32xbf16, #tpu.memory_space<vmem>>, vector<1x1x64x32xbf16>
    %213 = vector.shape_cast %212 : vector<1x1x64x32xbf16> to vector<64x32xbf16>
    %cst_152 = arith.constant dense<0.000000e+00> : vector<32x32xf32>
    %214 = tpu.matmul %211, %213, %cst_152 {dimension_numbers = #tpu.dot_dimension_numbers<[1], [0], [0], [1], [0, 0, 1, 1], [], []>} : vector<32x64xbf16>, vector<64x32xbf16>, vector<32x32xf32> -> vector<32x32xf32>
    %215 = arith.addf %210, %214 : vector<32x32xf32>
    %c31_i32_153 = arith.constant 31 : i32
    %216 = tpu.dynamic_rotate %203 by %c31_i32_153 dim 0 : vector<32x64xf32>, i32 -> vector<32x64xf32>
    %217 = vector.broadcast %14 : vector<32x1xf32> to vector<32x64xf32>
    %218 = arith.mulf %216, %217 : vector<32x64xf32>
    %219 = arith.truncf %218 : vector<32x64xf32> to vector<32x64xbf16>
    %c0_154 = arith.constant 0 : index
    %c2_155 = arith.constant 2 : index
    %c0_156 = arith.constant 0 : index
    %c0_157 = arith.constant 0 : index
    %220 = vector.load %arg13[%c0_154, %c2_155, %c0_156, %c0_157] : memref<2x3x64x32xbf16, #tpu.memory_space<vmem>>, vector<1x1x64x32xbf16>
    %221 = vector.shape_cast %220 : vector<1x1x64x32xbf16> to vector<64x32xbf16>
    %cst_158 = arith.constant dense<0.000000e+00> : vector<32x32xf32>
    %222 = tpu.matmul %219, %221, %cst_158 {dimension_numbers = #tpu.dot_dimension_numbers<[1], [0], [0], [1], [0, 0, 1, 1], [], []>} : vector<32x64xbf16>, vector<64x32xbf16>, vector<32x32xf32> -> vector<32x32xf32>
    %223 = arith.addf %215, %222 : vector<32x32xf32>
    %224 = arith.addf %151, %223 : vector<32x32xf32>
    %c0_159 = arith.constant 0 : index
    %c0_160 = arith.constant 0 : index
    %c0_161 = arith.constant 0 : index
    %225 = vector.load %arg14[%c0_159, %c0_160, %c0_161] : memref<2x1x32xf32, #tpu.memory_space<vmem>>, vector<1x1x32xf32>
    %226 = vector.shape_cast %225 : vector<1x1x32xf32> to vector<1x32xf32>
    %227 = vector.broadcast %226 : vector<1x32xf32> to vector<32x32xf32>
    %228 = arith.addf %224, %227 : vector<32x32xf32>
    %c1_162 = arith.constant 1 : index
    %c0_163 = arith.constant 0 : index
    %c0_164 = arith.constant 0 : index
    %229 = vector.load %arg3[%c1_162, %c0_163, %c0_164] : memref<2x1x32xf32, #tpu.memory_space<vmem>>, vector<1x1x32xf32>
    %230 = vector.shape_cast %229 : vector<1x1x32xf32> to vector<1x32xf32>
    %c1_165 = arith.constant 1 : index
    %c0_166 = arith.constant 0 : index
    %c0_167 = arith.constant 0 : index
    %231 = vector.load %arg4[%c1_165, %c0_166, %c0_167] : memref<2x1x32xf32, #tpu.memory_space<vmem>>, vector<1x1x32xf32>
    %232 = vector.shape_cast %231 : vector<1x1x32xf32> to vector<1x32xf32>
    %cst_168 = arith.constant dense<0.000000e+00> : vector<32xf32>
    %233 = vector.multi_reduction <add>, %228, %cst_168 [1] : vector<32x32xf32> to vector<32xf32>
    %234 = vector.shape_cast %233 : vector<32xf32> to vector<32x1xf32>
    %cst_169 = arith.constant 3.200000e+01 : f32
    %235 = vector.broadcast %cst_169 : f32 to vector<32x1xf32>
    %236 = arith.divf %234, %235 : vector<32x1xf32>
    %237 = vector.broadcast %236 : vector<32x1xf32> to vector<32x32xf32>
    %238 = arith.subf %228, %237 : vector<32x32xf32>
    %239 = arith.mulf %238, %238 : vector<32x32xf32>
    %cst_170 = arith.constant dense<0.000000e+00> : vector<32xf32>
    %240 = vector.multi_reduction <add>, %239, %cst_170 [1] : vector<32x32xf32> to vector<32xf32>
    %241 = vector.shape_cast %240 : vector<32xf32> to vector<32x1xf32>
    %cst_171 = arith.constant 3.200000e+01 : f32
    %242 = vector.broadcast %cst_171 : f32 to vector<32x1xf32>
    %243 = arith.divf %241, %242 : vector<32x1xf32>
    %244 = vector.broadcast %236 : vector<32x1xf32> to vector<32x32xf32>
    %245 = arith.subf %228, %244 : vector<32x32xf32>
    %cst_172 = arith.constant 9.99999974E-6 : f32
    %246 = vector.broadcast %cst_172 : f32 to vector<32x1xf32>
    %247 = arith.addf %243, %246 : vector<32x1xf32>
    %248 = math.rsqrt %247 : vector<32x1xf32>
    %249 = vector.broadcast %248 : vector<32x1xf32> to vector<32x32xf32>
    %250 = arith.mulf %245, %249 : vector<32x32xf32>
    %251 = vector.broadcast %230 : vector<1x32xf32> to vector<32x32xf32>
    %252 = arith.mulf %250, %251 : vector<32x32xf32>
    %253 = vector.broadcast %232 : vector<1x32xf32> to vector<32x32xf32>
    %254 = arith.addf %252, %253 : vector<32x32xf32>
    %255 = arith.truncf %254 : vector<32x32xf32> to vector<32x32xbf16>
    %cst_173 = arith.constant 0.000000e+00 : f32
    %256 = vector.broadcast %cst_173 : f32 to vector<32x32xf32>
    %c1_174 = arith.constant 1 : index
    %c0_175 = arith.constant 0 : index
    %c0_176 = arith.constant 0 : index
    %c0_177 = arith.constant 0 : index
    %c0_178 = arith.constant 0 : index
    %257 = vector.load %arg5[%c1_174, %c0_175, %c0_176, %c0_177, %c0_178] : memref<2x3x2x32x16xbf16, #tpu.memory_space<vmem>>, vector<1x1x1x32x16xbf16>
    %258 = vector.shape_cast %257 : vector<1x1x1x32x16xbf16> to vector<32x16xbf16>
    %cst_179 = arith.constant dense<0.000000e+00> : vector<32x16xf32>
    %259 = tpu.matmul %255, %258, %cst_179 {dimension_numbers = #tpu.dot_dimension_numbers<[1], [0], [0], [1], [0, 0, 1, 1], [], []>} : vector<32x32xbf16>, vector<32x16xbf16>, vector<32x16xf32> -> vector<32x16xf32>
    %c1_180 = arith.constant 1 : index
    %c0_181 = arith.constant 0 : index
    %c0_182 = arith.constant 0 : index
    %c0_183 = arith.constant 0 : index
    %c0_184 = arith.constant 0 : index
    %260 = vector.load %arg6[%c1_180, %c0_181, %c0_182, %c0_183, %c0_184] : memref<2x3x2x1x16xf32, #tpu.memory_space<vmem>>, vector<1x1x1x1x16xf32>
    %261 = vector.shape_cast %260 : vector<1x1x1x1x16xf32> to vector<1x16xf32>
    %262 = vector.broadcast %261 : vector<1x16xf32> to vector<32x16xf32>
    %263 = arith.addf %259, %262 : vector<32x16xf32>
    %c1_185 = arith.constant 1 : index
    %c1_186 = arith.constant 1 : index
    %c0_187 = arith.constant 0 : index
    %c0_188 = arith.constant 0 : index
    %c0_189 = arith.constant 0 : index
    %264 = vector.load %arg5[%c1_185, %c1_186, %c0_187, %c0_188, %c0_189] : memref<2x3x2x32x16xbf16, #tpu.memory_space<vmem>>, vector<1x1x1x32x16xbf16>
    %265 = vector.shape_cast %264 : vector<1x1x1x32x16xbf16> to vector<32x16xbf16>
    %cst_190 = arith.constant dense<0.000000e+00> : vector<32x16xf32>
    %266 = tpu.matmul %255, %265, %cst_190 {dimension_numbers = #tpu.dot_dimension_numbers<[1], [0], [0], [1], [0, 0, 1, 1], [], []>} : vector<32x32xbf16>, vector<32x16xbf16>, vector<32x16xf32> -> vector<32x16xf32>
    %c1_191 = arith.constant 1 : index
    %c1_192 = arith.constant 1 : index
    %c0_193 = arith.constant 0 : index
    %c0_194 = arith.constant 0 : index
    %c0_195 = arith.constant 0 : index
    %267 = vector.load %arg6[%c1_191, %c1_192, %c0_193, %c0_194, %c0_195] : memref<2x3x2x1x16xf32, #tpu.memory_space<vmem>>, vector<1x1x1x1x16xf32>
    %268 = vector.shape_cast %267 : vector<1x1x1x1x16xf32> to vector<1x16xf32>
    %269 = vector.broadcast %268 : vector<1x16xf32> to vector<32x16xf32>
    %270 = arith.addf %266, %269 : vector<32x16xf32>
    %c1_196 = arith.constant 1 : index
    %c2_197 = arith.constant 2 : index
    %c0_198 = arith.constant 0 : index
    %c0_199 = arith.constant 0 : index
    %c0_200 = arith.constant 0 : index
    %271 = vector.load %arg5[%c1_196, %c2_197, %c0_198, %c0_199, %c0_200] : memref<2x3x2x32x16xbf16, #tpu.memory_space<vmem>>, vector<1x1x1x32x16xbf16>
    %272 = vector.shape_cast %271 : vector<1x1x1x32x16xbf16> to vector<32x16xbf16>
    %cst_201 = arith.constant dense<0.000000e+00> : vector<32x16xf32>
    %273 = tpu.matmul %255, %272, %cst_201 {dimension_numbers = #tpu.dot_dimension_numbers<[1], [0], [0], [1], [0, 0, 1, 1], [], []>} : vector<32x32xbf16>, vector<32x16xbf16>, vector<32x16xf32> -> vector<32x16xf32>
    %c1_202 = arith.constant 1 : index
    %c2_203 = arith.constant 2 : index
    %c0_204 = arith.constant 0 : index
    %c0_205 = arith.constant 0 : index
    %c0_206 = arith.constant 0 : index
    %274 = vector.load %arg6[%c1_202, %c2_203, %c0_204, %c0_205, %c0_206] : memref<2x3x2x1x16xf32, #tpu.memory_space<vmem>>, vector<1x1x1x1x16xf32>
    %275 = vector.shape_cast %274 : vector<1x1x1x1x16xf32> to vector<1x16xf32>
    %276 = vector.broadcast %275 : vector<1x16xf32> to vector<32x16xf32>
    %277 = arith.addf %273, %276 : vector<32x16xf32>
    %278 = vector.shape_cast %263 : vector<32x16xf32> to vector<2x16x16xf32>
    %279 = arith.truncf %278 : vector<2x16x16xf32> to vector<2x16x16xbf16>
    %280 = vector.shape_cast %270 : vector<32x16xf32> to vector<2x16x16xf32>
    %281 = arith.truncf %280 : vector<2x16x16xf32> to vector<2x16x16xbf16>
    %282 = vector.shape_cast %277 : vector<32x16xf32> to vector<2x16x16xf32>
    %283 = arith.truncf %282 : vector<2x16x16xf32> to vector<2x16x16xbf16>
    %cst_207 = arith.constant dense<0.000000e+00> : vector<2x16x16xf32>
    %284 = tpu.matmul %279, %281, %cst_207 {dimension_numbers = #tpu.dot_dimension_numbers<[2], [2], [1], [1], [0, 0, 0, 1, 1, 1], [0], [0]>} : vector<2x16x16xbf16>, vector<2x16x16xbf16>, vector<2x16x16xf32> -> vector<2x16x16xf32>
    %cst_208 = arith.constant 2.500000e-01 : f32
    %285 = vector.broadcast %cst_208 : f32 to vector<2x16x16xf32>
    %286 = arith.mulf %284, %285 : vector<2x16x16xf32>
    %287 = arith.addf %286, %4 : vector<2x16x16xf32>
    %cst_209 = arith.constant dense<0xFF800000> : vector<2x16xf32>
    %288 = vector.multi_reduction <maximumf>, %287, %cst_209 [2] : vector<2x16x16xf32> to vector<2x16xf32>
    %289 = vector.shape_cast %288 : vector<2x16xf32> to vector<2x16x1xf32>
    %290 = vector.broadcast %289 : vector<2x16x1xf32> to vector<2x16x16xf32>
    %291 = arith.subf %287, %290 : vector<2x16x16xf32>
    %292 = math.exp %291 : vector<2x16x16xf32>
    %cst_210 = arith.constant dense<0.000000e+00> : vector<2x16xf32>
    %293 = vector.multi_reduction <add>, %292, %cst_210 [2] : vector<2x16x16xf32> to vector<2x16xf32>
    %294 = vector.shape_cast %293 : vector<2x16xf32> to vector<2x16x1xf32>
    %295 = vector.broadcast %294 : vector<2x16x1xf32> to vector<2x16x16xf32>
    %296 = arith.divf %292, %295 : vector<2x16x16xf32>
    %297 = arith.truncf %296 : vector<2x16x16xf32> to vector<2x16x16xbf16>
    %c0_211 = arith.constant 0 : index
    %c2_212 = arith.constant 2 : index
    %c0_213 = arith.constant 0 : index
    %c0_214 = arith.constant 0 : index
    %298 = vector.load %arg20[%c0_211, %c2_212, %c0_213, %c0_214] : memref<2x4x16x16xbf16, #tpu.memory_space<vmem>>, vector<2x1x16x16xbf16>
    %299 = vector.shape_cast %298 : vector<2x1x16x16xbf16> to vector<2x16x16xbf16>
    %300 = vector.shape_cast %297 : vector<2x16x16xbf16> to vector<2x1x16x16xbf16>
    tpu.vector_store %arg20[%c0_211, %c2_212, %c0_213, %c0_214], %300 {strides = array<i32>} : memref<2x4x16x16xbf16, #tpu.memory_space<vmem>>, vector<2x1x16x16xbf16>,
    %301 = arith.truncf %296 : vector<2x16x16xf32> to vector<2x16x16xbf16>
    %cst_215 = arith.constant dense<0.000000e+00> : vector<2x16x16xf32>
    %302 = tpu.matmul %301, %283, %cst_215 {dimension_numbers = #tpu.dot_dimension_numbers<[2], [1], [1], [2], [0, 0, 0, 1, 1, 2], [0], [0]>} : vector<2x16x16xbf16>, vector<2x16x16xbf16>, vector<2x16x16xf32> -> vector<2x16x16xf32>
    %303 = vector.shape_cast %302 : vector<2x16x16xf32> to vector<32x16xf32>
    %304 = arith.truncf %303 : vector<32x16xf32> to vector<32x16xbf16>
    %c1_216 = arith.constant 1 : index
    %c0_217 = arith.constant 0 : index
    %c0_218 = arith.constant 0 : index
    %c0_219 = arith.constant 0 : index
    %305 = vector.load %arg7[%c1_216, %c0_217, %c0_218, %c0_219] : memref<2x2x16x32xbf16, #tpu.memory_space<vmem>>, vector<1x1x16x32xbf16>
    %306 = vector.shape_cast %305 : vector<1x1x16x32xbf16> to vector<16x32xbf16>
    %cst_220 = arith.constant dense<0.000000e+00> : vector<32x32xf32>
    %307 = tpu.matmul %304, %306, %cst_220 {dimension_numbers = #tpu.dot_dimension_numbers<[1], [0], [0], [1], [0, 0, 1, 1], [], []>} : vector<32x16xbf16>, vector<16x32xbf16>, vector<32x32xf32> -> vector<32x32xf32>
    %308 = arith.addf %256, %307 : vector<32x32xf32>
    %c1_221 = arith.constant 1 : index
    %c0_222 = arith.constant 0 : index
    %c1_223 = arith.constant 1 : index
    %c0_224 = arith.constant 0 : index
    %c0_225 = arith.constant 0 : index
    %309 = vector.load %arg5[%c1_221, %c0_222, %c1_223, %c0_224, %c0_225] : memref<2x3x2x32x16xbf16, #tpu.memory_space<vmem>>, vector<1x1x1x32x16xbf16>
    %310 = vector.shape_cast %309 : vector<1x1x1x32x16xbf16> to vector<32x16xbf16>
    %cst_226 = arith.constant dense<0.000000e+00> : vector<32x16xf32>
    %311 = tpu.matmul %255, %310, %cst_226 {dimension_numbers = #tpu.dot_dimension_numbers<[1], [0], [0], [1], [0, 0, 1, 1], [], []>} : vector<32x32xbf16>, vector<32x16xbf16>, vector<32x16xf32> -> vector<32x16xf32>
    %c1_227 = arith.constant 1 : index
    %c0_228 = arith.constant 0 : index
    %c1_229 = arith.constant 1 : index
    %c0_230 = arith.constant 0 : index
    %c0_231 = arith.constant 0 : index
    %312 = vector.load %arg6[%c1_227, %c0_228, %c1_229, %c0_230, %c0_231] : memref<2x3x2x1x16xf32, #tpu.memory_space<vmem>>, vector<1x1x1x1x16xf32>
    %313 = vector.shape_cast %312 : vector<1x1x1x1x16xf32> to vector<1x16xf32>
    %314 = vector.broadcast %313 : vector<1x16xf32> to vector<32x16xf32>
    %315 = arith.addf %311, %314 : vector<32x16xf32>
    %c1_232 = arith.constant 1 : index
    %c1_233 = arith.constant 1 : index
    %c1_234 = arith.constant 1 : index
    %c0_235 = arith.constant 0 : index
    %c0_236 = arith.constant 0 : index
    %316 = vector.load %arg5[%c1_232, %c1_233, %c1_234, %c0_235, %c0_236] : memref<2x3x2x32x16xbf16, #tpu.memory_space<vmem>>, vector<1x1x1x32x16xbf16>
    %317 = vector.shape_cast %316 : vector<1x1x1x32x16xbf16> to vector<32x16xbf16>
    %cst_237 = arith.constant dense<0.000000e+00> : vector<32x16xf32>
    %318 = tpu.matmul %255, %317, %cst_237 {dimension_numbers = #tpu.dot_dimension_numbers<[1], [0], [0], [1], [0, 0, 1, 1], [], []>} : vector<32x32xbf16>, vector<32x16xbf16>, vector<32x16xf32> -> vector<32x16xf32>
    %c1_238 = arith.constant 1 : index
    %c1_239 = arith.constant 1 : index
    %c1_240 = arith.constant 1 : index
    %c0_241 = arith.constant 0 : index
    %c0_242 = arith.constant 0 : index
    %319 = vector.load %arg6[%c1_238, %c1_239, %c1_240, %c0_241, %c0_242] : memref<2x3x2x1x16xf32, #tpu.memory_space<vmem>>, vector<1x1x1x1x16xf32>
    %320 = vector.shape_cast %319 : vector<1x1x1x1x16xf32> to vector<1x16xf32>
    %321 = vector.broadcast %320 : vector<1x16xf32> to vector<32x16xf32>
    %322 = arith.addf %318, %321 : vector<32x16xf32>
    %c1_243 = arith.constant 1 : index
    %c2_244 = arith.constant 2 : index
    %c1_245 = arith.constant 1 : index
    %c0_246 = arith.constant 0 : index
    %c0_247 = arith.constant 0 : index
    %323 = vector.load %arg5[%c1_243, %c2_244, %c1_245, %c0_246, %c0_247] : memref<2x3x2x32x16xbf16, #tpu.memory_space<vmem>>, vector<1x1x1x32x16xbf16>
    %324 = vector.shape_cast %323 : vector<1x1x1x32x16xbf16> to vector<32x16xbf16>
    %cst_248 = arith.constant dense<0.000000e+00> : vector<32x16xf32>
    %325 = tpu.matmul %255, %324, %cst_248 {dimension_numbers = #tpu.dot_dimension_numbers<[1], [0], [0], [1], [0, 0, 1, 1], [], []>} : vector<32x32xbf16>, vector<32x16xbf16>, vector<32x16xf32> -> vector<32x16xf32>
    %c1_249 = arith.constant 1 : index
    %c2_250 = arith.constant 2 : index
    %c1_251 = arith.constant 1 : index
    %c0_252 = arith.constant 0 : index
    %c0_253 = arith.constant 0 : index
    %326 = vector.load %arg6[%c1_249, %c2_250, %c1_251, %c0_252, %c0_253] : memref<2x3x2x1x16xf32, #tpu.memory_space<vmem>>, vector<1x1x1x1x16xf32>
    %327 = vector.shape_cast %326 : vector<1x1x1x1x16xf32> to vector<1x16xf32>
    %328 = vector.broadcast %327 : vector<1x16xf32> to vector<32x16xf32>
    %329 = arith.addf %325, %328 : vector<32x16xf32>
    %330 = vector.shape_cast %315 : vector<32x16xf32> to vector<2x16x16xf32>
    %331 = arith.truncf %330 : vector<2x16x16xf32> to vector<2x16x16xbf16>
    %332 = vector.shape_cast %322 : vector<32x16xf32> to vector<2x16x16xf32>
    %333 = arith.truncf %332 : vector<2x16x16xf32> to vector<2x16x16xbf16>
    %334 = vector.shape_cast %329 : vector<32x16xf32> to vector<2x16x16xf32>
    %335 = arith.truncf %334 : vector<2x16x16xf32> to vector<2x16x16xbf16>
    %cst_254 = arith.constant dense<0.000000e+00> : vector<2x16x16xf32>
    %336 = tpu.matmul %331, %333, %cst_254 {dimension_numbers = #tpu.dot_dimension_numbers<[2], [2], [1], [1], [0, 0, 0, 1, 1, 1], [0], [0]>} : vector<2x16x16xbf16>, vector<2x16x16xbf16>, vector<2x16x16xf32> -> vector<2x16x16xf32>
    %cst_255 = arith.constant 2.500000e-01 : f32
    %337 = vector.broadcast %cst_255 : f32 to vector<2x16x16xf32>
    %338 = arith.mulf %336, %337 : vector<2x16x16xf32>
    %339 = arith.addf %338, %4 : vector<2x16x16xf32>
    %cst_256 = arith.constant dense<0xFF800000> : vector<2x16xf32>
    %340 = vector.multi_reduction <maximumf>, %339, %cst_256 [2] : vector<2x16x16xf32> to vector<2x16xf32>
    %341 = vector.shape_cast %340 : vector<2x16xf32> to vector<2x16x1xf32>
    %342 = vector.broadcast %341 : vector<2x16x1xf32> to vector<2x16x16xf32>
    %343 = arith.subf %339, %342 : vector<2x16x16xf32>
    %344 = math.exp %343 : vector<2x16x16xf32>
    %cst_257 = arith.constant dense<0.000000e+00> : vector<2x16xf32>
    %345 = vector.multi_reduction <add>, %344, %cst_257 [2] : vector<2x16x16xf32> to vector<2x16xf32>
    %346 = vector.shape_cast %345 : vector<2x16xf32> to vector<2x16x1xf32>
    %347 = vector.broadcast %346 : vector<2x16x1xf32> to vector<2x16x16xf32>
    %348 = arith.divf %344, %347 : vector<2x16x16xf32>
    %349 = arith.truncf %348 : vector<2x16x16xf32> to vector<2x16x16xbf16>
    %c0_258 = arith.constant 0 : index
    %c3 = arith.constant 3 : index
    %c0_259 = arith.constant 0 : index
    %c0_260 = arith.constant 0 : index
    %350 = vector.load %arg20[%c0_258, %c3, %c0_259, %c0_260] : memref<2x4x16x16xbf16, #tpu.memory_space<vmem>>, vector<2x1x16x16xbf16>
    %351 = vector.shape_cast %350 : vector<2x1x16x16xbf16> to vector<2x16x16xbf16>
    %352 = vector.shape_cast %349 : vector<2x16x16xbf16> to vector<2x1x16x16xbf16>
    tpu.vector_store %arg20[%c0_258, %c3, %c0_259, %c0_260], %352 {strides = array<i32>} : memref<2x4x16x16xbf16, #tpu.memory_space<vmem>>, vector<2x1x16x16xbf16>,
    %353 = arith.truncf %348 : vector<2x16x16xf32> to vector<2x16x16xbf16>
    %cst_261 = arith.constant dense<0.000000e+00> : vector<2x16x16xf32>
    %354 = tpu.matmul %353, %335, %cst_261 {dimension_numbers = #tpu.dot_dimension_numbers<[2], [1], [1], [2], [0, 0, 0, 1, 1, 2], [0], [0]>} : vector<2x16x16xbf16>, vector<2x16x16xbf16>, vector<2x16x16xf32> -> vector<2x16x16xf32>
    %355 = vector.shape_cast %354 : vector<2x16x16xf32> to vector<32x16xf32>
    %356 = arith.truncf %355 : vector<32x16xf32> to vector<32x16xbf16>
    %c1_262 = arith.constant 1 : index
    %c1_263 = arith.constant 1 : index
    %c0_264 = arith.constant 0 : index
    %c0_265 = arith.constant 0 : index
    %357 = vector.load %arg7[%c1_262, %c1_263, %c0_264, %c0_265] : memref<2x2x16x32xbf16, #tpu.memory_space<vmem>>, vector<1x1x16x32xbf16>
    %358 = vector.shape_cast %357 : vector<1x1x16x32xbf16> to vector<16x32xbf16>
    %cst_266 = arith.constant dense<0.000000e+00> : vector<32x32xf32>
    %359 = tpu.matmul %356, %358, %cst_266 {dimension_numbers = #tpu.dot_dimension_numbers<[1], [0], [0], [1], [0, 0, 1, 1], [], []>} : vector<32x16xbf16>, vector<16x32xbf16>, vector<32x32xf32> -> vector<32x32xf32>
    %360 = arith.addf %308, %359 : vector<32x32xf32>
    %361 = arith.addf %228, %360 : vector<32x32xf32>
    %c1_267 = arith.constant 1 : index
    %c0_268 = arith.constant 0 : index
    %c0_269 = arith.constant 0 : index
    %362 = vector.load %arg8[%c1_267, %c0_268, %c0_269] : memref<2x1x32xf32, #tpu.memory_space<vmem>>, vector<1x1x32xf32>
    %363 = vector.shape_cast %362 : vector<1x1x32xf32> to vector<1x32xf32>
    %364 = vector.broadcast %363 : vector<1x32xf32> to vector<32x32xf32>
    %365 = arith.addf %361, %364 : vector<32x32xf32>
    %c1_270 = arith.constant 1 : index
    %c0_271 = arith.constant 0 : index
    %c0_272 = arith.constant 0 : index
    %366 = vector.load %arg9[%c1_270, %c0_271, %c0_272] : memref<2x1x32xf32, #tpu.memory_space<vmem>>, vector<1x1x32xf32>
    %367 = vector.shape_cast %366 : vector<1x1x32xf32> to vector<1x32xf32>
    %c1_273 = arith.constant 1 : index
    %c0_274 = arith.constant 0 : index
    %c0_275 = arith.constant 0 : index
    %368 = vector.load %arg10[%c1_273, %c0_274, %c0_275] : memref<2x1x32xf32, #tpu.memory_space<vmem>>, vector<1x1x32xf32>
    %369 = vector.shape_cast %368 : vector<1x1x32xf32> to vector<1x32xf32>
    %cst_276 = arith.constant dense<0.000000e+00> : vector<32xf32>
    %370 = vector.multi_reduction <add>, %365, %cst_276 [1] : vector<32x32xf32> to vector<32xf32>
    %371 = vector.shape_cast %370 : vector<32xf32> to vector<32x1xf32>
    %cst_277 = arith.constant 3.200000e+01 : f32
    %372 = vector.broadcast %cst_277 : f32 to vector<32x1xf32>
    %373 = arith.divf %371, %372 : vector<32x1xf32>
    %374 = vector.broadcast %373 : vector<32x1xf32> to vector<32x32xf32>
    %375 = arith.subf %365, %374 : vector<32x32xf32>
    %376 = arith.mulf %375, %375 : vector<32x32xf32>
    %cst_278 = arith.constant dense<0.000000e+00> : vector<32xf32>
    %377 = vector.multi_reduction <add>, %376, %cst_278 [1] : vector<32x32xf32> to vector<32xf32>
    %378 = vector.shape_cast %377 : vector<32xf32> to vector<32x1xf32>
    %cst_279 = arith.constant 3.200000e+01 : f32
    %379 = vector.broadcast %cst_279 : f32 to vector<32x1xf32>
    %380 = arith.divf %378, %379 : vector<32x1xf32>
    %381 = vector.broadcast %373 : vector<32x1xf32> to vector<32x32xf32>
    %382 = arith.subf %365, %381 : vector<32x32xf32>
    %cst_280 = arith.constant 9.99999974E-6 : f32
    %383 = vector.broadcast %cst_280 : f32 to vector<32x1xf32>
    %384 = arith.addf %380, %383 : vector<32x1xf32>
    %385 = math.rsqrt %384 : vector<32x1xf32>
    %386 = vector.broadcast %385 : vector<32x1xf32> to vector<32x32xf32>
    %387 = arith.mulf %382, %386 : vector<32x32xf32>
    %388 = vector.broadcast %367 : vector<1x32xf32> to vector<32x32xf32>
    %389 = arith.mulf %387, %388 : vector<32x32xf32>
    %390 = vector.broadcast %369 : vector<1x32xf32> to vector<32x32xf32>
    %391 = arith.addf %389, %390 : vector<32x32xf32>
    %c1_i32_281 = arith.constant 1 : i32
    %392 = tpu.dynamic_rotate %391 by %c1_i32_281 dim 0 : vector<32x32xf32>, i32 -> vector<32x32xf32>
    %393 = vector.broadcast %10 : vector<32x1xf32> to vector<32x32xf32>
    %394 = arith.mulf %392, %393 : vector<32x32xf32>
    %395 = arith.truncf %394 : vector<32x32xf32> to vector<32x32xbf16>
    %c1_282 = arith.constant 1 : index
    %c0_283 = arith.constant 0 : index
    %c0_284 = arith.constant 0 : index
    %c0_285 = arith.constant 0 : index
    %396 = vector.load %arg11[%c1_282, %c0_283, %c0_284, %c0_285] : memref<2x3x32x64xbf16, #tpu.memory_space<vmem>>, vector<1x1x32x64xbf16>
    %397 = vector.shape_cast %396 : vector<1x1x32x64xbf16> to vector<32x64xbf16>
    %cst_286 = arith.constant dense<0.000000e+00> : vector<32x64xf32>
    %398 = tpu.matmul %395, %397, %cst_286 {dimension_numbers = #tpu.dot_dimension_numbers<[1], [0], [0], [1], [0, 0, 1, 1], [], []>} : vector<32x32xbf16>, vector<32x64xbf16>, vector<32x64xf32> -> vector<32x64xf32>
    %399 = arith.truncf %391 : vector<32x32xf32> to vector<32x32xbf16>
    %c1_287 = arith.constant 1 : index
    %c1_288 = arith.constant 1 : index
    %c0_289 = arith.constant 0 : index
    %c0_290 = arith.constant 0 : index
    %400 = vector.load %arg11[%c1_287, %c1_288, %c0_289, %c0_290] : memref<2x3x32x64xbf16, #tpu.memory_space<vmem>>, vector<1x1x32x64xbf16>
    %401 = vector.shape_cast %400 : vector<1x1x32x64xbf16> to vector<32x64xbf16>
    %cst_291 = arith.constant dense<0.000000e+00> : vector<32x64xf32>
    %402 = tpu.matmul %399, %401, %cst_291 {dimension_numbers = #tpu.dot_dimension_numbers<[1], [0], [0], [1], [0, 0, 1, 1], [], []>} : vector<32x32xbf16>, vector<32x64xbf16>, vector<32x64xf32> -> vector<32x64xf32>
    %403 = arith.addf %398, %402 : vector<32x64xf32>
    %c31_i32_292 = arith.constant 31 : i32
    %404 = tpu.dynamic_rotate %391 by %c31_i32_292 dim 0 : vector<32x32xf32>, i32 -> vector<32x32xf32>
    %405 = vector.broadcast %14 : vector<32x1xf32> to vector<32x32xf32>
    %406 = arith.mulf %404, %405 : vector<32x32xf32>
    %407 = arith.truncf %406 : vector<32x32xf32> to vector<32x32xbf16>
    %c1_293 = arith.constant 1 : index
    %c2_294 = arith.constant 2 : index
    %c0_295 = arith.constant 0 : index
    %c0_296 = arith.constant 0 : index
    %408 = vector.load %arg11[%c1_293, %c2_294, %c0_295, %c0_296] : memref<2x3x32x64xbf16, #tpu.memory_space<vmem>>, vector<1x1x32x64xbf16>
    %409 = vector.shape_cast %408 : vector<1x1x32x64xbf16> to vector<32x64xbf16>
    %cst_297 = arith.constant dense<0.000000e+00> : vector<32x64xf32>
    %410 = tpu.matmul %407, %409, %cst_297 {dimension_numbers = #tpu.dot_dimension_numbers<[1], [0], [0], [1], [0, 0, 1, 1], [], []>} : vector<32x32xbf16>, vector<32x64xbf16>, vector<32x64xf32> -> vector<32x64xf32>
    %411 = arith.addf %403, %410 : vector<32x64xf32>
    %c1_298 = arith.constant 1 : index
    %c0_299 = arith.constant 0 : index
    %c0_300 = arith.constant 0 : index
    %412 = vector.load %arg12[%c1_298, %c0_299, %c0_300] : memref<2x1x64xf32, #tpu.memory_space<vmem>>, vector<1x1x64xf32>
    %413 = vector.shape_cast %412 : vector<1x1x64xf32> to vector<1x64xf32>
    %414 = vector.broadcast %413 : vector<1x64xf32> to vector<32x64xf32>
    %415 = arith.addf %411, %414 : vector<32x64xf32>
    %cst_301 = arith.constant 0.000000e+00 : f32
    %416 = vector.broadcast %cst_301 : f32 to vector<32x64xf32>
    %417 = arith.maximumf %415, %416 : vector<32x64xf32>
    %c1_i32_302 = arith.constant 1 : i32
    %418 = tpu.dynamic_rotate %417 by %c1_i32_302 dim 0 : vector<32x64xf32>, i32 -> vector<32x64xf32>
    %419 = vector.broadcast %10 : vector<32x1xf32> to vector<32x64xf32>
    %420 = arith.mulf %418, %419 : vector<32x64xf32>
    %421 = arith.truncf %420 : vector<32x64xf32> to vector<32x64xbf16>
    %c1_303 = arith.constant 1 : index
    %c0_304 = arith.constant 0 : index
    %c0_305 = arith.constant 0 : index
    %c0_306 = arith.constant 0 : index
    %422 = vector.load %arg13[%c1_303, %c0_304, %c0_305, %c0_306] : memref<2x3x64x32xbf16, #tpu.memory_space<vmem>>, vector<1x1x64x32xbf16>
    %423 = vector.shape_cast %422 : vector<1x1x64x32xbf16> to vector<64x32xbf16>
    %cst_307 = arith.constant dense<0.000000e+00> : vector<32x32xf32>
    %424 = tpu.matmul %421, %423, %cst_307 {dimension_numbers = #tpu.dot_dimension_numbers<[1], [0], [0], [1], [0, 0, 1, 1], [], []>} : vector<32x64xbf16>, vector<64x32xbf16>, vector<32x32xf32> -> vector<32x32xf32>
    %425 = arith.truncf %417 : vector<32x64xf32> to vector<32x64xbf16>
    %c1_308 = arith.constant 1 : index
    %c1_309 = arith.constant 1 : index
    %c0_310 = arith.constant 0 : index
    %c0_311 = arith.constant 0 : index
    %426 = vector.load %arg13[%c1_308, %c1_309, %c0_310, %c0_311] : memref<2x3x64x32xbf16, #tpu.memory_space<vmem>>, vector<1x1x64x32xbf16>
    %427 = vector.shape_cast %426 : vector<1x1x64x32xbf16> to vector<64x32xbf16>
    %cst_312 = arith.constant dense<0.000000e+00> : vector<32x32xf32>
    %428 = tpu.matmul %425, %427, %cst_312 {dimension_numbers = #tpu.dot_dimension_numbers<[1], [0], [0], [1], [0, 0, 1, 1], [], []>} : vector<32x64xbf16>, vector<64x32xbf16>, vector<32x32xf32> -> vector<32x32xf32>
    %429 = arith.addf %424, %428 : vector<32x32xf32>
    %c31_i32_313 = arith.constant 31 : i32
    %430 = tpu.dynamic_rotate %417 by %c31_i32_313 dim 0 : vector<32x64xf32>, i32 -> vector<32x64xf32>
    %431 = vector.broadcast %14 : vector<32x1xf32> to vector<32x64xf32>
    %432 = arith.mulf %430, %431 : vector<32x64xf32>
    %433 = arith.truncf %432 : vector<32x64xf32> to vector<32x64xbf16>
    %c1_314 = arith.constant 1 : index
    %c2_315 = arith.constant 2 : index
    %c0_316 = arith.constant 0 : index
    %c0_317 = arith.constant 0 : index
    %434 = vector.load %arg13[%c1_314, %c2_315, %c0_316, %c0_317] : memref<2x3x64x32xbf16, #tpu.memory_space<vmem>>, vector<1x1x64x32xbf16>
    %435 = vector.shape_cast %434 : vector<1x1x64x32xbf16> to vector<64x32xbf16>
    %cst_318 = arith.constant dense<0.000000e+00> : vector<32x32xf32>
    %436 = tpu.matmul %433, %435, %cst_318 {dimension_numbers = #tpu.dot_dimension_numbers<[1], [0], [0], [1], [0, 0, 1, 1], [], []>} : vector<32x64xbf16>, vector<64x32xbf16>, vector<32x32xf32> -> vector<32x32xf32>
    %437 = arith.addf %429, %436 : vector<32x32xf32>
    %438 = arith.addf %365, %437 : vector<32x32xf32>
    %c1_319 = arith.constant 1 : index
    %c0_320 = arith.constant 0 : index
    %c0_321 = arith.constant 0 : index
    %439 = vector.load %arg14[%c1_319, %c0_320, %c0_321] : memref<2x1x32xf32, #tpu.memory_space<vmem>>, vector<1x1x32xf32>
    %440 = vector.shape_cast %439 : vector<1x1x32xf32> to vector<1x32xf32>
    %441 = vector.broadcast %440 : vector<1x32xf32> to vector<32x32xf32>
    %442 = arith.addf %438, %441 : vector<32x32xf32>
    %c0_322 = arith.constant 0 : index
    %c0_323 = arith.constant 0 : index
    %443 = vector.load %arg15[%c0_322, %c0_323] : memref<1x32xf32, #tpu.memory_space<vmem>>, vector<1x32xf32>
    %c0_324 = arith.constant 0 : index
    %c0_325 = arith.constant 0 : index
    %444 = vector.load %arg16[%c0_324, %c0_325] : memref<1x32xf32, #tpu.memory_space<vmem>>, vector<1x32xf32>
    %cst_326 = arith.constant dense<0.000000e+00> : vector<32xf32>
    %445 = vector.multi_reduction <add>, %442, %cst_326 [1] : vector<32x32xf32> to vector<32xf32>
    %446 = vector.shape_cast %445 : vector<32xf32> to vector<32x1xf32>
    %cst_327 = arith.constant 3.200000e+01 : f32
    %447 = vector.broadcast %cst_327 : f32 to vector<32x1xf32>
    %448 = arith.divf %446, %447 : vector<32x1xf32>
    %449 = vector.broadcast %448 : vector<32x1xf32> to vector<32x32xf32>
    %450 = arith.subf %442, %449 : vector<32x32xf32>
    %451 = arith.mulf %450, %450 : vector<32x32xf32>
    %cst_328 = arith.constant dense<0.000000e+00> : vector<32xf32>
    %452 = vector.multi_reduction <add>, %451, %cst_328 [1] : vector<32x32xf32> to vector<32xf32>
    %453 = vector.shape_cast %452 : vector<32xf32> to vector<32x1xf32>
    %cst_329 = arith.constant 3.200000e+01 : f32
    %454 = vector.broadcast %cst_329 : f32 to vector<32x1xf32>
    %455 = arith.divf %453, %454 : vector<32x1xf32>
    %456 = vector.broadcast %448 : vector<32x1xf32> to vector<32x32xf32>
    %457 = arith.subf %442, %456 : vector<32x32xf32>
    %cst_330 = arith.constant 9.99999974E-6 : f32
    %458 = vector.broadcast %cst_330 : f32 to vector<32x1xf32>
    %459 = arith.addf %455, %458 : vector<32x1xf32>
    %460 = math.rsqrt %459 : vector<32x1xf32>
    %461 = vector.broadcast %460 : vector<32x1xf32> to vector<32x32xf32>
    %462 = arith.mulf %457, %461 : vector<32x32xf32>
    %463 = vector.broadcast %443 : vector<1x32xf32> to vector<32x32xf32>
    %464 = arith.mulf %462, %463 : vector<32x32xf32>
    %465 = vector.broadcast %444 : vector<1x32xf32> to vector<32x32xf32>
    %466 = arith.addf %464, %465 : vector<32x32xf32>
    %467 = arith.truncf %466 : vector<32x32xf32> to vector<32x32xbf16>
    %c0_331 = arith.constant 0 : index
    %c0_332 = arith.constant 0 : index
    %468 = vector.load %arg17[%c0_331, %c0_332] : memref<32x96xbf16, #tpu.memory_space<vmem>>, vector<32x96xbf16>
    %cst_333 = arith.constant dense<0.000000e+00> : vector<32x96xf32>
    %469 = tpu.matmul %467, %468, %cst_333 {dimension_numbers = #tpu.dot_dimension_numbers<[1], [0], [0], [1], [0, 0, 1, 1], [], []>} : vector<32x32xbf16>, vector<32x96xbf16>, vector<32x96xf32> -> vector<32x96xf32>
    %c0_334 = arith.constant 0 : index
    %c0_335 = arith.constant 0 : index
    %470 = vector.load %arg18[%c0_334, %c0_335] : memref<1x96xf32, #tpu.memory_space<vmem>>, vector<1x96xf32>
    %471 = vector.broadcast %470 : vector<1x96xf32> to vector<32x96xf32>
    %472 = arith.addf %469, %471 : vector<32x96xf32>
    %473 = arith.negf %472 : vector<32x96xf32>
    %474 = math.exp %473 : vector<32x96xf32>
    %cst_336 = arith.constant 1.000000e+00 : f32
    %475 = vector.broadcast %cst_336 : f32 to vector<32x96xf32>
    %476 = arith.addf %475, %474 : vector<32x96xf32>
    %477 = arith.divf %475, %476 : vector<32x96xf32>
    %478 = tpu.concatenate %466, %477 in 1 : vector<32x32xf32>, vector<32x96xf32> -> vector<32x128xf32>
    %479 = vector.shape_cast %478 : vector<32x128xf32> to vector<2x16x128xf32>
    %c0_337 = arith.constant 0 : index
    %c0_338 = arith.constant 0 : index
    %c0_339 = arith.constant 0 : index
    %480 = vector.load %arg19[%c0_337, %c0_338, %c0_339] : memref<2x16x128xf32, #tpu.memory_space<vmem>>, vector<2x16x128xf32>
    tpu.vector_store %arg19[%c0_337, %c0_338, %c0_339], %479 {strides = array<i32>} : memref<2x16x128xf32, #tpu.memory_space<vmem>>, vector<2x16x128xf32>,
    return
  }
  func.func @transform_0(%arg0: i32) -> (i32, i32, i32) {
    %c0_i32 = arith.constant 0 : i32
    %c0_i32_0 = arith.constant 0 : i32
    %c0_i32_1 = arith.constant 0 : i32
    return %arg0, %c0_i32, %c0_i32_0 : i32, i32, i32
  }
  func.func @transform_1(%arg0: i32) -> (i32, i32, i32) {
    %c0_i32 = arith.constant 0 : i32
    %c0_i32_0 = arith.constant 0 : i32
    %c0_i32_1 = arith.constant 0 : i32
    return %arg0, %c0_i32, %c0_i32_0 : i32, i32, i32
  }
  func.func @transform_2(%arg0: i32) -> (i32, i32, i32) {
    %c0_i32 = arith.constant 0 : i32
    %c0_i32_0 = arith.constant 0 : i32
    %c0_i32_1 = arith.constant 0 : i32
    %c0_i32_2 = arith.constant 0 : i32
    return %c0_i32, %c0_i32_0, %c0_i32_1 : i32, i32, i32
  }
  func.func @transform_3(%arg0: i32) -> (i32, i32, i32) {
    %c0_i32 = arith.constant 0 : i32
    %c0_i32_0 = arith.constant 0 : i32
    %c0_i32_1 = arith.constant 0 : i32
    %c0_i32_2 = arith.constant 0 : i32
    return %c0_i32, %c0_i32_0, %c0_i32_1 : i32, i32, i32
  }
  func.func @transform_4(%arg0: i32) -> (i32, i32, i32, i32, i32) {
    %c0_i32 = arith.constant 0 : i32
    %c0_i32_0 = arith.constant 0 : i32
    %c0_i32_1 = arith.constant 0 : i32
    %c0_i32_2 = arith.constant 0 : i32
    %c0_i32_3 = arith.constant 0 : i32
    %c0_i32_4 = arith.constant 0 : i32
    return %c0_i32, %c0_i32_0, %c0_i32_1, %c0_i32_2, %c0_i32_3 : i32, i32, i32, i32, i32
  }
  func.func @transform_5(%arg0: i32) -> (i32, i32, i32, i32, i32) {
    %c0_i32 = arith.constant 0 : i32
    %c0_i32_0 = arith.constant 0 : i32
    %c0_i32_1 = arith.constant 0 : i32
    %c0_i32_2 = arith.constant 0 : i32
    %c0_i32_3 = arith.constant 0 : i32
    %c0_i32_4 = arith.constant 0 : i32
    return %c0_i32, %c0_i32_0, %c0_i32_1, %c0_i32_2, %c0_i32_3 : i32, i32, i32, i32, i32
  }
  func.func @transform_6(%arg0: i32) -> (i32, i32, i32, i32) {
    %c0_i32 = arith.constant 0 : i32
    %c0_i32_0 = arith.constant 0 : i32
    %c0_i32_1 = arith.constant 0 : i32
    %c0_i32_2 = arith.constant 0 : i32
    %c0_i32_3 = arith.constant 0 : i32
    return %c0_i32, %c0_i32_0, %c0_i32_1, %c0_i32_2 : i32, i32, i32, i32
  }
  func.func @transform_7(%arg0: i32) -> (i32, i32, i32) {
    %c0_i32 = arith.constant 0 : i32
    %c0_i32_0 = arith.constant 0 : i32
    %c0_i32_1 = arith.constant 0 : i32
    %c0_i32_2 = arith.constant 0 : i32
    return %c0_i32, %c0_i32_0, %c0_i32_1 : i32, i32, i32
  }
  func.func @transform_8(%arg0: i32) -> (i32, i32, i32) {
    %c0_i32 = arith.constant 0 : i32
    %c0_i32_0 = arith.constant 0 : i32
    %c0_i32_1 = arith.constant 0 : i32
    %c0_i32_2 = arith.constant 0 : i32
    return %c0_i32, %c0_i32_0, %c0_i32_1 : i32, i32, i32
  }
  func.func @transform_9(%arg0: i32) -> (i32, i32, i32) {
    %c0_i32 = arith.constant 0 : i32
    %c0_i32_0 = arith.constant 0 : i32
    %c0_i32_1 = arith.constant 0 : i32
    %c0_i32_2 = arith.constant 0 : i32
    return %c0_i32, %c0_i32_0, %c0_i32_1 : i32, i32, i32
  }
  func.func @transform_10(%arg0: i32) -> (i32, i32, i32, i32) {
    %c0_i32 = arith.constant 0 : i32
    %c0_i32_0 = arith.constant 0 : i32
    %c0_i32_1 = arith.constant 0 : i32
    %c0_i32_2 = arith.constant 0 : i32
    %c0_i32_3 = arith.constant 0 : i32
    return %c0_i32, %c0_i32_0, %c0_i32_1, %c0_i32_2 : i32, i32, i32, i32
  }
  func.func @transform_11(%arg0: i32) -> (i32, i32, i32) {
    %c0_i32 = arith.constant 0 : i32
    %c0_i32_0 = arith.constant 0 : i32
    %c0_i32_1 = arith.constant 0 : i32
    %c0_i32_2 = arith.constant 0 : i32
    return %c0_i32, %c0_i32_0, %c0_i32_1 : i32, i32, i32
  }
  func.func @transform_12(%arg0: i32) -> (i32, i32, i32, i32) {
    %c0_i32 = arith.constant 0 : i32
    %c0_i32_0 = arith.constant 0 : i32
    %c0_i32_1 = arith.constant 0 : i32
    %c0_i32_2 = arith.constant 0 : i32
    %c0_i32_3 = arith.constant 0 : i32
    return %c0_i32, %c0_i32_0, %c0_i32_1, %c0_i32_2 : i32, i32, i32, i32
  }
  func.func @transform_13(%arg0: i32) -> (i32, i32, i32) {
    %c0_i32 = arith.constant 0 : i32
    %c0_i32_0 = arith.constant 0 : i32
    %c0_i32_1 = arith.constant 0 : i32
    %c0_i32_2 = arith.constant 0 : i32
    return %c0_i32, %c0_i32_0, %c0_i32_1 : i32, i32, i32
  }
  func.func @transform_14(%arg0: i32) -> (i32, i32) {
    %c0_i32 = arith.constant 0 : i32
    %c0_i32_0 = arith.constant 0 : i32
    %c0_i32_1 = arith.constant 0 : i32
    return %c0_i32, %c0_i32_0 : i32, i32
  }
  func.func @transform_15(%arg0: i32) -> (i32, i32) {
    %c0_i32 = arith.constant 0 : i32
    %c0_i32_0 = arith.constant 0 : i32
    %c0_i32_1 = arith.constant 0 : i32
    return %c0_i32, %c0_i32_0 : i32, i32
  }
  func.func @transform_16(%arg0: i32) -> (i32, i32) {
    %c0_i32 = arith.constant 0 : i32
    %c0_i32_0 = arith.constant 0 : i32
    %c0_i32_1 = arith.constant 0 : i32
    return %c0_i32, %c0_i32_0 : i32, i32
  }
  func.func @transform_17(%arg0: i32) -> (i32, i32) {
    %c0_i32 = arith.constant 0 : i32
    %c0_i32_0 = arith.constant 0 : i32
    %c0_i32_1 = arith.constant 0 : i32
    return %c0_i32, %c0_i32_0 : i32, i32
  }
  func.func @transform_18(%arg0: i32) -> (i32, i32, i32) {
    %c0_i32 = arith.constant 0 : i32
    %c0_i32_0 = arith.constant 0 : i32
    %c0_i32_1 = arith.constant 0 : i32
    return %arg0, %c0_i32, %c0_i32_0 : i32, i32, i32
  }
  func.func @transform_19(%arg0: i32) -> (i32, i32, i32, i32) {
    %c0_i32 = arith.constant 0 : i32
    %c0_i32_0 = arith.constant 0 : i32
    %c0_i32_1 = arith.constant 0 : i32
    %c0_i32_2 = arith.constant 0 : i32
    return %arg0, %c0_i32, %c0_i32_0, %c0_i32_1 : i32, i32, i32, i32
  }
}

</mosaic_0001>

<bundles_post_ra>
// kernel: autotts_forward.1
= control target key start
LH: loop header
LB: loop body
LE: loop exit
PB: predicated region body
PF: predicated region fallthrough
CT: control target
= control target key end

     0   :  { %s6906_s0 = inlined_call_operand.vmem [shape: f32[4,16,32], index: 0, kind: input, shape index: {}]   ;;  %s6907_s1 = inlined_call_operand.vmem [shape: f32[4,1,16], index: 1, kind: input, shape index: {}]   ;;  %s6908_s2 = inlined_call_operand.vmem [shape: f32[2,1,32], index: 2, kind: input, shape index: {}]   ;;  %s6909_s3 = inlined_call_operand.vmem [shape: f32[2,1,32], index: 3, kind: input, shape index: {}]   ;;  %s6910_s4 = inlined_call_operand.vmem [shape: bf16[2,3,2,32,16], index: 4, kind: input, shape index: {}]   ;;  %s6911_s5 = inlined_call_operand.vmem [shape: f32[2,3,2,1,16], index: 5, kind: input, shape index: {}]   ;;  %s6912_s6 = inlined_call_operand.vmem [shape: bf16[2,2,16,32], index: 6, kind: input, shape index: {}]   ;;  %s6913_s7 = inlined_call_operand.vmem [shape: f32[2,1,32], index: 7, kind: input, shape index: {}]   ;;  %s6914_s8 = inlined_call_operand.vmem [shape: f32[2,1,32], index: 8, kind: input, shape index: {}]   ;;  %s6915_s9 = inlined_call_operand.vmem [shape: f32[2,1,32], index: 9, kind: input, shape index: {}]   ;;  %s6916_s10 = inlined_call_operand.vmem [shape: bf16[2,3,32,64], index: 10, kind: input, shape index: {}]   ;;  %s6917_s11 = inlined_call_operand.vmem [shape: f32[2,1,64], index: 11, kind: input, shape index: {}]   ;;  %s6918_s12 = inlined_call_operand.vmem [shape: bf16[2,3,64,32], index: 12, kind: input, shape index: {}]   ;;  %s6919_s13 = inlined_call_operand.vmem [shape: f32[2,1,32], index: 13, kind: input, shape index: {}]   ;;  %s6920_s14 = inlined_call_operand.vmem [shape: f32[1,32], index: 14, kind: input, shape index: {}]   ;;  %s6921_s15 = inlined_call_operand.vmem [shape: f32[1,32], index: 15, kind: input, shape index: {}]   ;;  %s6922_s16 = inlined_call_operand.vmem [shape: bf16[32,96], index: 16, kind: input, shape index: {}]   ;;  %s6923_s17 = inlined_call_operand.vmem [shape: f32[1,96], index: 17, kind: input, shape index: {}]   ;;  %s6924_s18 = inlined_call_operand.vmem [shape: f32[4,16,128], index: 18, kind: output, shape index: {0}]   ;;  %s6925_s19 = inlined_call_operand.hbm [shape: bf16[4,4,16,16], index: 19, kind: output, shape index: {1}]  }
   0x1   :  { %6938 = sst [smem:[#allocation11_spill]] %s6906_s0 }
   0x2   :  { %6939 = sst [smem:[#allocation12_spill]] %s6907_s1 }
   0x3   :  { %6940 = sst [smem:[#allocation13_spill]] %s6908_s2 }
   0x4   :  { %6941 = sst [smem:[#allocation14_spill]] %s6909_s3 }
   0x5   :  { %6942 = sst [smem:[#allocation15_spill]] %s6910_s4 }
   0x6   :  { %6943 = sst [smem:[#allocation16_spill]] %s6924_s18 }
   0x7   :  { %25 = vsyncpa [#allocation3], 0 }
   0x8   :  { %27 = vsyncpa [#allocation3 + $0x1], 0  ;;  %s5977_s0 = smov 0   ;;  %s5979_s30 = smov 0  }
   0x9   :  { %s5981_s20 = smov 0   ;;  %s5983_s21 = smov 0  }
   0xa LB: > { %6944 = sst [smem:[#allocation5_spill]] %s5857_s0  ;;  %s5998_s1 = sadd.s32 4294967295, %s5869_s21   ;;  %s5869_s21 = sphi %s5983_s21, %s6964_s21   ;;  %s5865_s20 = sphi %s5981_s20, %s6966_s20   ;;  %s5861_s30 = sphi %s5979_s30, %s6968_s30   ;;  %s5857_s0 = sphi %s5977_s0, %s6967_s0  }
   0xb   : > { %6945 = sst [smem:[#allocation6_spill]] %s5865_s20  ;;  %s4702_s22 = sadd.s32 4294967294, %s5869_s21  }
   0xc   : > { %6946 = sst [smem:[#allocation7_spill]] %s5869_s21  ;;  %s6002_s2 = sadd.s32 1, %s5869_s21  }
   0xd   : > { %6947 = sst [smem:[#allocation8_spill]] %s6002_s2  ;;  %s454_s23 = sadd.s32 1, %s5865_s20 }
   0xe   : > { %s451_s24 = ssub.s32 %s5869_s21, %s6002_s2  ;;  %p464_p0 = scmp.ne.s32.totalorder %s5865_s20, %s5861_s30 }
   0xf   : > { %p452_p1 = scmp.eq.s32.totalorder %s451_s24, 0  ;;  %p465_p2 = scmp.eq.s32.totalorder %s5998_s1, 1 }
  0x10   : > { %p470_p3 = scmp.ne.s32.totalorder %s5861_s30, %s5857_s0  ;;  %p471_p4 = scmp.eq.s32.totalorder %s4702_s22, 1 }
  0x11   : > { %s6013_s25 = scalar_select %p452_p1, %s5865_s20, %s454_s23  }
  0x12   : > { %p6015_p5 = por %p465_p2, %p464_p0  ;;  %p6019_p6 = por %p471_p4, %p470_p3 }
  0x13   : > { %6948 = sst [smem:[#allocation9_spill]] %s6013_s25  ;;  %p4705_p7 = scmp.ge.s32.totalorder %s5869_s21, 1 }
  0x14   : > { %s6950_s26 = scalar_select %p6019_p6, 1, 0 }
  0x15   : > { %p555_p8 = scmp.lt.s32.totalorder %s5869_s21, 3 }
  0x16   : > { %6951 = sst [smem:[#allocation10_spill]] %s6950_s26 }
  0x17   : > { %p556_p9 = pnand %p4705_p7, %p555_p8 }
  0x18   : > { %s4707_s27 = sshll.u32 (!%p556_p9), %s5998_s1, 1  ;;  %s6952_s23 = sld [smem:[#allocation11_spill]] (!%p556_p9) }
  0x19   : > { %559 = sbr.rel (%p556_p9) target bundleno = 6590 (0x19be), region = 92  ;;  %p623_p10 = scmp.lt.s32.totalorder (!%p556_p9), %s4707_s27, 3 }
  0x1a   : > { %s6953_s4 = sld [smem:[#allocation15_spill]] (!%p556_p9)  ;;  %s5072_s2 = sshll.u32 (!%p556_p9), %s5998_s1, 10 }
  0x1b   : > { %s6954_s25 = sld [smem:[#allocation13_spill]] (!%p556_p9)  ;;  %s6843_s18 = scalar_lea.hbm (!%p556_p9), %s6925_s19, %s5072_s2 }
  0x1c   : > { %s6956_s26 = sld [smem:[#allocation12_spill]] (!%p556_p9)  ;;  %s6936_s21 = smov (!%p556_p9), 32  }
  0x1e   : > { %s6970_s27 = smov (!%p623_p10, %s4707_s27), 3  ;;  %vm678_vm0 = vcmask 261120   ;;  %vm5872_vm1 = vmmov 0   ;;  %vm986_vm2 = vcmask 130048   ;;  %vm1149_vm3 = vcmask 125952  }
  0x1f   : > { %s6928_s28 = sshll.u32 %s6970_s27, 4  ;;  %vm2268_vm8 = vcmask 523264  }
  0x20   : > { %s6034_s24 = scalar_lea.vmem %s6952_s23, %s6928_s28  ;;  %v5617_v28 = vld [vmem:[%s6953_s4 + $0x8] sm:$0xff]   ;;  %v5619_v30 = vld [vmem:[%s6953_s4] sm:$0xff]   ;;  %s6955_s23 = sld [smem:[#allocation14_spill]] }
  0x21   : > { %v643_v0 = vld [vmem:[%s6034_s24] sm:$0xff]  ;;  %v645_v1 = vld [vmem:[%s6034_s24 + $0x10] sm:$0xff]  ;;  %v644_v2 = vld [vmem:[%s6034_s24 + $0x8] sm:$0xff]  ;;  %5229 = vmatprep.subr.bf16.mxu0 %v5617_v28 }
  0x22   : > { %v679_v3 = vsel %vm678_vm0, %v643_v0, 0.0  ;;  %v685_v4 = vsel %vm678_vm0, %v645_v1, 0.0  ;;  %v646_v5 = vld [vmem:[%s6034_s24 + $0x18] sm:$0xff]  ;;  %v682_v6 = vsel %vm678_vm0, %v644_v2, 0.0  ;;  %v5618_v29 = vld [vmem:[%s6953_s4 + $0x28] sm:$0xff]   ;;  %5230 = vmatpush3.bf16.msra.mxu0 %v5617_v28  ;;  %v5620_v31 = vld [vmem:[%s6953_s4 + $0x20] sm:$0xff]   ;;  %s6117_s28 = scalar_lea.vmem %s6956_s26, %s6970_s27 }
  0x23   : > { %680 = vadd.xlane.f32.xlu0 %v679_v3  ;;  %686 = vadd.xlane.f32.xlu1 %v685_v4  ;;  %v688_v7 = vsel %vm678_vm0, %v646_v5, 0.0  ;;  %v5621_v32 = vld [vmem:[%s6953_s4 + $0x48] sm:$0xff]   ;;  %v4718_v47 = vld [vmem:[%s6954_s25] ss:$0 sm:$0xff]  ;;  %s6934_s26 = sand.u32 1, %s5861_s30  }
  0x24   : > { %5237 = vmatprep.subr.bf16.mxu1 %v5618_v29  ;;  %5231 = vmatprep.subr.bf16.mxu0 %v5619_v30  ;;  %s4706_s0 = sshll.u32 %s6934_s26, 6  ;;  %s6957_s26 = sand.u32 1, %s5861_s30  }
  0x25   : > { %5238 = vmatpush3.bf16.msra.mxu1 %v5618_v29  ;;  %s6146_s29 = scalar_lea.vmem [#allocation2], %s4706_s0  ;;  %s6850_s20 = scalar_lea.sflag [#allocation3], %s6957_s26 }
  0x26   : > { %5239 = vmatprep.subr.bf16.mxu1 %v5620_v31  ;;  %5232 = vmatpush3.bf16.msra.mxu0 %v5619_v30  ;;  %v4719_v53 = vld [vmem:[%s6955_s23] ss:$0 sm:$0xff] }
  0x27   : > { %683 = vadd.xlane.f32.xlu0 %v682_v6  ;;  %689 = vadd.xlane.f32.xlu1 %v688_v7 }
  0x28   : > { %5245 = vmatprep.subr.bf16.mxu0 %v5621_v32 }
  0x29   : > { %5240 = vmatpush3.bf16.msra.mxu1 %v5620_v31 }
  0xac   : > { %v681_v8 = vpop.xlane.xlu0 %680  ;;  %v687_v9 = vpop.xlane.xlu1 %686 }
  0xad   : > { %v692_v10 = vmul.f32 0.03125, %v681_v8  ;;  %v694_v11 = vmul.f32 0.03125, %v687_v9 }
  0xaf   : > { %v696_v12 = vsub.f32 %v643_v0, %v692_v10  ;;  %v698_v13 = vsub.f32 %v645_v1, %v694_v11  ;;  %v5622_v1 = vld [vmem:[%s6953_s4 + $0x40] sm:$0xff]  }
  0xb0   : > { %v684_v14 = vpop.xlane.xlu0 %683  ;;  %v690_v15 = vpop.xlane.xlu1 %689 }
  0xb1   : > { %v693_v16 = vmul.f32 0.03125, %v684_v14  ;;  %v695_v17 = vmul.f32 0.03125, %v690_v15  ;;  %v700_v18 = vmul.f32 %v696_v12, %v696_v12  ;;  %v702_v19 = vmul.f32 %v698_v13, %v698_v13 }
  0xb3   : > { %v697_v20 = vsub.f32 %v644_v2, %v693_v16  ;;  %v699_v21 = vsub.f32 %v646_v5, %v695_v17  ;;  %v704_v22 = vsel %vm678_vm0, %v700_v18, 0.0  ;;  %v710_v23 = vsel %vm678_vm0, %v702_v19, 0.0  ;;  %v4730_v5 = vld [vmem:[%s6911_s5 + $0x2] ss:$0 sm:$0xff] }
  0xb4   : > { %705 = vadd.xlane.f32.xlu0 %v704_v22  ;;  %v5871_v2 = vmov 0.0  }
  0xb5   : > { %v701_v24 = vmul.f32 %v697_v20, %v697_v20  ;;  %v703_v25 = vmul.f32 %v699_v21, %v699_v21  ;;  %5253 = vmatprep.subr.bf16.mxu1 %v5871_v2 }
  0xb7   : > { %v707_v26 = vsel %vm678_vm0, %v701_v24, 0.0  ;;  %v713_v27 = vsel %vm678_vm0, %v703_v25, 0.0 }
  0xb8   : > { %711 = vadd.xlane.f32.xlu0 %v710_v23  ;;  %708 = vadd.xlane.f32.xlu1 %v707_v26 }
  0xbc   : > { %714 = vadd.xlane.f32.xlu1 %v713_v27 }
 0x13d   : > { %v706_v33 = vpop.xlane.xlu0 %705 }
 0x13e   : > { %v716_v34 = vmul.f32 0.03125, %v706_v33 }
 0x140   : > { %v720_v35 = vadd.f32 1e-05, %v716_v34 }
 0x141   : > { %v709_v36 = vpop.xlane.xlu1 %708  ;;  %v712_v37 = vpop.xlane.xlu0 %711 }
 0x142   : > { %5683 = vrsqrt.f32 %v720_v35  ;;  %v717_v38 = vmul.f32 0.03125, %v709_v36  ;;  %v718_v39 = vmul.f32 0.03125, %v712_v37 }
 0x144   : > { %v721_v40 = vadd.f32 1e-05, %v717_v38  ;;  %v722_v41 = vadd.f32 1e-05, %v718_v39  ;;  %v6120_v38 = vld [vmem:[%s6117_s28 + $0x1] ss:$0 sm:$0xff] }
 0x145   : > { %v715_v42 = vpop.xlane.xlu1 %714 }
 0x146   : > { %5685 = vrsqrt.f32 %v721_v40  ;;  %v719_v43 = vmul.f32 0.03125, %v715_v42 }
 0x147   : > { %5687 = vrsqrt.f32 %v722_v41  ;;  %v6123_v41 = vld [vmem:[%s6117_s28] ss:$0 sm:$0xff] }
 0x148   : > { %v723_v44 = vadd.f32 1e-05, %v719_v43 }
 0x14a   : > { %5689 = vrsqrt.f32 %v723_v44 }
 0x14f   : > { %v5684_v45 = vpop.eup %5683 }
 0x150   : > { %v728_v46 = vmul.f32 %v5684_v45, %v696_v12 }
 0x152   : > { %v738_v50 = vmul.f32 %v4718_v47, %v728_v46 }
 0x153   : > { %v5686_v48 = vpop.eup %5685 }
 0x154   : > { %v5688_v49 = vpop.eup %5687  ;;  %v729_v51 = vmul.f32 %v5686_v48, %v697_v20  ;;  %v748_v58 = vadd.f32 %v4719_v53, %v738_v50  ;;  %v4720_v20 = vld [vmem:[%s6911_s5] ss:$0 sm:$0xff] }
 0x155   : > { %v730_v52 = vmul.f32 %v5688_v49, %v698_v13 }
 0x156   : > { %v739_v54 = vmul.f32 %v4718_v47, %v729_v51 }
 0x157   : > { %v5690_v55 = vpop.eup %5689  ;;  %v740_v56 = vmul.f32 %v4718_v47, %v730_v52 }
 0x158   : > { %v731_v57 = vmul.f32 %v5690_v55, %v699_v21  ;;  %v749_v59 = vadd.f32 %v4719_v53, %v739_v54  ;;  %v4740_v21 = vld [vmem:[%s6911_s5 + $0x4] ss:$0 sm:$0xff] }
 0x159   : > { %v750_v62 = vadd.f32 %v4719_v53, %v740_v56 }
 0x15a   : > { %v741_v60 = vmul.f32 %v4718_v47, %v731_v57  ;;  %v6069_v61 = vpack.c.bf16 %v749_v59, %v748_v58 }
 0x15c   : > { %5233 = vmatprep.mubr.msk.bf16.mxu0 %vm678_vm0, %v6069_v61  ;;  %5241 = vmatprep.mubr.msk.bf16.mxu1 %vm678_vm0, %v6069_v61  ;;  %v751_v63 = vadd.f32 %v4719_v53, %v741_v60 }
 0x15e   : > { %v6075_v0 = vpack.c.bf16 %v751_v63, %v750_v62 }
 0x160   : > { %5234 = vmatmul.mubr.msk.bf16.vlgmr.msra.gmra.mxu0 %vm678_vm0, %v6075_v0  ;;  %5242 = vmatmul.mubr.msk.bf16.vlgmr.msra.gmra.mxu1 %vm678_vm0, %v6075_v0 }
 0x161   : > { %5246 = vmatpush3.bf16.msra.mxu0 %v5621_v32  ;;  %5249 = vmatprep.mubr.msk.bf16.mxu0 %vm678_vm0, %v6069_v61 }
 0x162   : > { %5247 = vmatprep.subr.bf16.mxu0 %v5622_v1  ;;  %5255 = vmatprep.mubr.msk.bf16.mxu1 %vm5872_vm1, %v5871_v2 }
 0x165   : > { %5248 = vmatpush3.bf16.msra.mxu0 %v5622_v1 }
 0x166   : > { %5259 = vmatprep.subr.bf16.mxu0 %v5871_v2 }
 0x168   : > { %5250 = vmatmul.mubr.msk.bf16.vlgmr.msra.gmra.mxu0 %vm678_vm0, %v6075_v0 }
 0x169   : > { %5261 = vmatprep.mubr.msk.bf16.mxu0 %vm5872_vm1, %v5871_v2 }
 0x220   : > { %v5235_v3 = vpop.f32.mrf.mxu0  ;;  %v5243_v4 = vpop.f32.mrf.mxu1 }
 0x221   : > { %v900_v10 = vadd.f32 %v5243_v4, %v4730_v5  ;;  %v826_v26 = vadd.f32 %v5235_v3, %v4720_v20 }
 0x222   : > { %v817_v6 = vpop.f32.mrf.mxu0  ;;  %v891_v7 = vpop.f32.mrf.mxu1 }
 0x223   : > { %v892_v14 = vadd.f32 %v4730_v5, %v891_v7  ;;  %v818_v30 = vadd.f32 %v4720_v20, %v817_v6 }
 0x224   : > { %v5236_v8 = vpop.f32.mrf.mxu0  ;;  %v5244_v9 = vpop.f32.mrf.mxu1 }
 0x225   : > { %v903_v11 = vadd.f32 %v5244_v9, %v4730_v5  ;;  %v829_v23 = vadd.f32 %v5236_v8, %v4720_v20 }
 0x226   : > { %v820_v12 = vpop.f32.mrf.mxu0  ;;  %v894_v13 = vpop.f32.mrf.mxu1 }
 0x227   : > { %v983_v15 = vpack.c.bf16 %v903_v11, %v900_v10  ;;  %v895_v16 = vadd.f32 %v4730_v5, %v894_v13  ;;  %v821_v27 = vadd.f32 %v4720_v20, %v820_v12  ;;  %v981_v32 = vpack.c.bf16 %v829_v23, %v826_v26  ;;  %v5624_v20 = vld [vmem:[%s6953_s4 + $0x18] sm:$0xff]  }
 0x228   : > { %v5251_v17 = vpop.f32.mrf.mxu0 }
 0x229   : > { %v982_v18 = vpack.c.bf16 %v895_v16, %v892_v14  ;;  %v1038_v19 = vsel %vm986_vm2, %v983_v15, 0  ;;  %v974_v28 = vadd.f32 %v5251_v17, %v4740_v21  ;;  %v980_v36 = vpack.c.bf16 %v821_v27, %v818_v30 }
 0x22a   : > { %v965_v22 = vpop.f32.mrf.mxu0  ;;  %5260 = vmatpush3.bf16.xpose.msra.mxu0 %v1038_v19  ;;  %v5623_v19 = vld [vmem:[%s6953_s4 + $0x38] sm:$0xff]  }
 0x22b   : > { %v991_v24 = vsel %vm986_vm2, %v982_v18, 0  ;;  %5271 = vmatprep.subr.bf16.mxu0 %v5871_v2  ;;  %v966_v33 = vadd.f32 %v4740_v21, %v965_v22 }
 0x22c   : > { %v5252_v25 = vpop.f32.mrf.mxu0  ;;  %5254 = vmatpush3.bf16.xpose.msra.mxu1 %v991_v24 }
 0x22d   : > { %v977_v29 = vadd.f32 %v5252_v25, %v4740_v21  ;;  %5265 = vmatprep.subr.bf16.mxu1 %v5871_v2 }
 0x22e   : > { %v968_v31 = vpop.f32.mrf.mxu0 }
 0x22f   : > { %v985_v34 = vpack.c.bf16 %v977_v29, %v974_v28  ;;  %v969_v35 = vadd.f32 %v4740_v21, %v968_v31 }
 0x231   : > { %v984_v37 = vpack.c.bf16 %v969_v35, %v966_v33  ;;  %5262 = vmatmul.mubr.msk.bf16.vlgmr.msra.gmra.mxu0 %vm986_vm2, %v981_v32 }
 0x232   : > { %5272 = vmatpush3.bf16.msra.mxu0 %v985_v34  ;;  %5273 = vmatprep.mubr.msk.bf16.mxu0 %vm5872_vm1, %v5871_v2  ;;  %v5625_v34 = vld [vmem:[%s6953_s4 + $0x30] sm:$0xff]  }
 0x233   : > { %5256 = vmatmul.mubr.msk.bf16.vlgmr.msra.gmra.mxu1 %vm986_vm2, %v980_v36  ;;  %5285 = vmatprep.subr.bf16.mxu0 %v5623_v19 }
 0x234   : > { %5266 = vmatpush3.bf16.msra.mxu1 %v984_v37  ;;  %5267 = vmatprep.mubr.msk.bf16.mxu1 %vm5872_vm1, %v5871_v2 }
 0x235   : > { %5277 = vmatprep.subr.bf16.mxu1 %v5624_v20 }
 0x2f1   : > { %v1074_v39 = vpop.f32.mrf.mxu0 }
 0x2f2   : > { %v1083_v40 = vmul.f32 0.25, %v1074_v39 }
 0x2f3   : > { %v1027_v42 = vpop.f32.mrf.mxu1  ;;  %v5263_v43 = vpop.f32.mrf.mxu0 }
 0x2f4   : > { %v1081_v44 = vmul.f32 0.25, %v1027_v42  ;;  %v1087_v45 = vadd.f32 %v6120_v38, %v1083_v40  ;;  %v5626_v42 = vld [vmem:[%s6953_s4 + $0x10] sm:$0xff]   ;;  %v5627_v43 = vld [vmem:[%s6953_s4 + $0x58] sm:$0xff]  }
 0x2f5   : > { %v5257_v46 = vpop.f32.mrf.mxu1  ;;  %v1077_v47 = vpop.f32.mrf.mxu0 }
 0x2f6   : > { %v1084_v48 = vmul.f32 0.25, %v1077_v47  ;;  %v1095_v49 = vsel %vm986_vm2, %v1087_v45, -inf  ;;  %v1085_v50 = vadd.f32 %v6123_v41, %v1081_v44  ;;  %v5628_v44 = vld [vmem:[%s6953_s4 + $0x50] sm:$0xff]  }
 0x2f7   : > { %1096 = vmax.xlane.f32.xlu0 %v1095_v49  ;;  %v1030_v51 = vpop.f32.mrf.mxu1  ;;  %v5264_v52 = vpop.f32.mrf.mxu0 }
 0x2f8   : > { %v1082_v53 = vmul.f32 0.25, %v1030_v51  ;;  %v1088_v54 = vadd.f32 %v6120_v38, %v1084_v48  ;;  %v1089_v57 = vsel %vm986_vm2, %v1085_v50, -inf }
 0x2f9   : > { %v5258_v55 = vpop.f32.mrf.mxu1 }
 0x2fa   : > { %v1098_v56 = vsel %vm986_vm2, %v1088_v54, -inf  ;;  %v1086_v58 = vadd.f32 %v6123_v41, %v1082_v53 }
 0x2fb   : > { %1099 = vmax.xlane.f32.xlu1 %v1098_v56  ;;  %1090 = vmax.xlane.f32.xlu0 %v1089_v57 }
 0x2fc   : > { %v1092_v59 = vsel %vm986_vm2, %v1086_v58, -inf }
 0x2ff   : > { %1093 = vmax.xlane.f32.xlu1 %v1092_v59 }
 0x380   : > { %v1097_v60 = vpop.xlane.xlu0 %1096 }
 0x381   : > { %v1103_v62 = vsub.f32 %v1087_v45, %v1097_v60 }
 0x383   : > { %v1109_v63 = vmul.f32 1.442695, %v1103_v62 }
 0x384   : > { %v1100_v1 = vpop.xlane.xlu1 %1099  ;;  %v1091_v3 = vpop.xlane.xlu0 %1090 }
 0x385   : > { %5691 = vpow2.f32 %v1109_v63  ;;  %v1104_v4 = vsub.f32 %v1088_v54, %v1100_v1  ;;  %v1101_v5 = vsub.f32 %v1085_v50, %v1091_v3  ;;  %v4768_v54 = vld [vmem:[%s6911_s5 + $0x3] ss:$0 sm:$0xff] }
 0x387   : > { %v1111_v6 = vmul.f32 1.442695, %v1104_v4  ;;  %v1105_v7 = vmul.f32 1.442695, %v1101_v5 }
 0x388   : > { %v1094_v8 = vpop.xlane.xlu1 %1093 }
 0x389   : > { %5693 = vpow2.f32 %v1111_v6  ;;  %v1102_v9 = vsub.f32 %v1086_v58, %v1094_v8  ;;  %v4758_v8 = vld [vmem:[%s6911_s5 + $0x1] ss:$0 sm:$0xff] }
 0x38a   : > { %5695 = vpow2.f32 %v1105_v7 }
 0x38b   : > { %v1107_v10 = vmul.f32 1.442695, %v1102_v9 }
 0x38d   : > { %5697 = vpow2.f32 %v1107_v10 }
 0x392   : > { %v5692_v11 = vpop.eup %5691 }
 0x393   : > { %v1119_v12 = vsel %vm986_vm2, %v5692_v11, 0.0 }
 0x394   : > { %1120 = vadd.xlane.f32.xlu0 %v1119_v12 }
 0x396   : > { %v5694_v13 = vpop.eup %5693 }
 0x397   : > { %v5696_v14 = vpop.eup %5695  ;;  %v1122_v15 = vsel %vm986_vm2, %v5694_v13, 0.0 }
 0x398   : > { %v1113_v16 = vsel %vm986_vm2, %v5696_v14, 0.0  ;;  %1123 = vadd.xlane.f32.xlu1 %v1122_v15 }
 0x399   : > { %1114 = vadd.xlane.f32.xlu0 %v1113_v16 }
 0x39a   : > { %v5698_v17 = vpop.eup %5697 }
 0x39b   : > { %v1116_v18 = vsel %vm986_vm2, %v5698_v17, 0.0 }
 0x39c   : > { %1117 = vadd.xlane.f32.xlu1 %v1116_v18 }
 0x41d   : > { %v1121_v21 = vpop.xlane.xlu0 %1120 }
 0x41e   : > { %5699 = vrcp.f32 %v1121_v21 }
 0x421   : > { %v1124_v22 = vpop.xlane.xlu1 %1123 }
 0x422   : > { %v1115_v23 = vpop.xlane.xlu0 %1114  ;;  %5701 = vrcp.f32 %v1124_v22 }
 0x423   : > { %5703 = vrcp.f32 %v1115_v23 }
 0x425   : > { %v1118_v24 = vpop.xlane.xlu1 %1117 }
 0x426   : > { %5705 = vrcp.f32 %v1118_v24 }
 0x42b   : > { %v5700_v25 = vpop.eup %5699 }
 0x42c   : > { %v1130_v26 = vmul.f32 %v5700_v25, %v5692_v11 }
 0x42e   : > { %v5057_v27 = vpack.c.bf16 %v1130_v26, %v1130_v26 }
 0x42f   : > { %v5702_v28 = vpop.eup %5701 }
 0x430   : > { %v5704_v29 = vpop.eup %5703  ;;  %v1132_v30 = vmul.f32 %v5702_v28, %v5694_v13  ;;  %1152 = vst.msk [vmem:[%s6146_s29 + $0x20] sm:$0xf] %vm1149_vm3, %v5057_v27 }
 0x431   : > { %v1126_v31 = vmul.f32 %v5704_v29, %v5696_v14  ;;  %v4778_v14 = vld [vmem:[%s6911_s5 + $0x5] ss:$0 sm:$0xff] }
 0x432   : > { %v1134_v32 = vpack.c.bf16 %v1132_v30, %v1130_v26  ;;  %v5058_v33 = vpack.c.bf16 %v1132_v30, %v1132_v30 }
 0x433   : > { %v5706_v35 = vpop.eup %5705  ;;  %v5055_v36 = vpack.c.bf16 %v1126_v31, %v1126_v31 }
 0x434   : > { %1153 = vst.msk [vmem:[%s6146_s29 + $0x24] sm:$0xf] %vm1149_vm3, %v5058_v33  ;;  %5274 = vmatmul.mubr.msk.bf16.vlgmr.msra.gmra.mxu0 %vm986_vm2, %v1134_v32  ;;  %v1128_v37 = vmul.f32 %v5706_v35, %v5698_v17 }
 0x435   : > { %5286 = vmatpush3.bf16.msra.mxu0 %v5623_v19  ;;  %5289 = vmatprep.mubr.msk.bf16.mxu0 %vm678_vm0, %v6069_v61  ;;  %1150 = vst.msk [vmem:[%s6146_s29] sm:$0xf] %vm1149_vm3, %v5055_v36 }
 0x436   : > { %v1133_v39 = vpack.c.bf16 %v1128_v37, %v1126_v31  ;;  %v5056_v40 = vpack.c.bf16 %v1128_v37, %v1128_v37  ;;  %5287 = vmatprep.subr.bf16.mxu0 %v5625_v34 }
 0x438   : > { %1151 = vst.msk [vmem:[%s6146_s29 + $0x4] sm:$0xf] %vm1149_vm3, %v5056_v40  ;;  %5268 = vmatmul.mubr.msk.bf16.vlgmr.msra.gmra.mxu1 %vm986_vm2, %v1133_v39 }
 0x439   : > { %5278 = vmatpush3.bf16.msra.mxu1 %v5624_v20  ;;  %5281 = vmatprep.mubr.msk.bf16.mxu1 %vm678_vm0, %v6069_v61 }
 0x43a   : > { %5288 = vmatpush3.bf16.msra.mxu0 %v5625_v34  ;;  %5279 = vmatprep.subr.bf16.mxu1 %v5626_v42 }
 0x43b   : > { %5301 = vmatprep.subr.bf16.mxu0 %v5871_v2 }
 0x43d   : > { %5290 = vmatmul.mubr.msk.bf16.vlgmr.msra.gmra.mxu0 %vm678_vm0, %v6075_v0  ;;  %5280 = vmatpush3.bf16.msra.mxu1 %v5626_v42 }
 0x43e   : > { %5293 = vmatprep.subr.bf16.mxu1 %v5627_v43  ;;  %5303 = vmatprep.mubr.msk.bf16.mxu0 %vm5872_vm1, %v5871_v2 }
 0x440   : > { %5282 = vmatmul.mubr.msk.bf16.vlgmr.msra.gmra.mxu1 %vm678_vm0, %v6075_v0 }
 0x441   : > { %5294 = vmatpush3.bf16.msra.mxu1 %v5627_v43  ;;  %5297 = vmatprep.mubr.msk.bf16.mxu1 %vm678_vm0, %v6069_v61 }
 0x442   : > { %5295 = vmatprep.subr.bf16.mxu1 %v5628_v44 }
 0x445   : > { %5296 = vmatpush3.bf16.msra.mxu1 %v5628_v44 }
 0x446   : > { %5307 = vmatprep.subr.bf16.mxu1 %v5871_v2 }
 0x448   : > { %5298 = vmatmul.mubr.msk.bf16.vlgmr.msra.gmra.mxu1 %vm678_vm0, %v6075_v0 }
 0x449   : > { %5309 = vmatprep.mubr.msk.bf16.mxu1 %vm5872_vm1, %v5871_v2 }
 0x4f4   : > { %v6188_v45 = vpop.f32.mrf.mxu0 }
 0x4f6   : > { %v5275_v46 = vpop.f32.mrf.mxu0 }
 0x4f8   : > { %v6190_v47 = vpop.f32.mrf.mxu1  ;;  %v6192_v48 = vpop.f32.mrf.mxu0 }
 0x4f9   : > { %v1243_v61 = vpack.c.bf16 %v6192_v48, %v6188_v45 }
 0x4fa   : > { %v5269_v49 = vpop.f32.mrf.mxu1  ;;  %v5276_v50 = vpop.f32.mrf.mxu0 }
 0x4fc   : > { %v6196_v51 = vpop.f32.mrf.mxu1 }
 0x4fd   : > { %v1242_v0 = vpack.c.bf16 %v6196_v51, %v6190_v47  ;;  %v5291_v52 = vpop.f32.mrf.mxu0 }
 0x4fe   : > { %v5270_v53 = vpop.f32.mrf.mxu1  ;;  %v1388_v58 = vadd.f32 %v5291_v52, %v4768_v54 }
 0x4ff   : > { %v1379_v55 = vpop.f32.mrf.mxu0 }
 0x500   : > { %v5283_v56 = vpop.f32.mrf.mxu1  ;;  %v1380_v63 = vadd.f32 %v4768_v54, %v1379_v55 }
 0x501   : > { %v5292_v57 = vpop.f32.mrf.mxu0  ;;  %v1314_v12 = vadd.f32 %v5283_v56, %v4758_v8 }
 0x502   : > { %v1391_v59 = vadd.f32 %v5292_v57, %v4768_v54  ;;  %v1305_v60 = vpop.f32.mrf.mxu1 }
 0x503   : > { %v1382_v62 = vpop.f32.mrf.mxu0  ;;  %v1306_v16 = vadd.f32 %v4758_v8, %v1305_v60 }
 0x504   : > { %v1471_v1 = vpack.c.bf16 %v1391_v59, %v1388_v58  ;;  %v1383_v3 = vadd.f32 %v4768_v54, %v1382_v62  ;;  %v5284_v4 = vpop.f32.mrf.mxu1 }
 0x505   : > { %v1317_v9 = vadd.f32 %v5284_v4, %v4758_v8 }
 0x506   : > { %v1470_v5 = vpack.c.bf16 %v1383_v3, %v1380_v63  ;;  %v1308_v6 = vpop.f32.mrf.mxu1  ;;  %v1525_v7 = vsel %vm986_vm2, %v1471_v1, 0 }
 0x507   : > { %5308 = vmatpush3.bf16.xpose.msra.mxu1 %v1525_v7  ;;  %v1309_v13 = vadd.f32 %v4758_v8, %v1308_v6  ;;  %v1469_v17 = vpack.c.bf16 %v1317_v9, %v1314_v12 }
 0x508   : > { %v5299_v10 = vpop.f32.mrf.mxu1  ;;  %v1478_v11 = vsel %vm986_vm2, %v1470_v5, 0  ;;  %5319 = vmatprep.subr.bf16.mxu1 %v5871_v2 }
 0x509   : > { %5302 = vmatpush3.bf16.xpose.msra.mxu0 %v1478_v11  ;;  %v1462_v19 = vadd.f32 %v5299_v10, %v4778_v14  ;;  %v1468_v21 = vpack.c.bf16 %v1309_v13, %v1306_v16  ;;  %v5629_v10 = vld [vmem:[%s6912_s6] sm:$0xff]  }
 0x50a   : > { %v1453_v15 = vpop.f32.mrf.mxu1  ;;  %5313 = vmatprep.subr.bf16.mxu0 %v5871_v2 }
 0x50b   : > { %v1454_v23 = vadd.f32 %v4778_v14, %v1453_v15 }
 0x50c   : > { %v5300_v18 = vpop.f32.mrf.mxu1 }
 0x50d   : > { %v1465_v20 = vadd.f32 %v5300_v18, %v4778_v14 }
 0x50e   : > { %5310 = vmatmul.mubr.msk.bf16.vlgmr.msra.gmra.mxu1 %vm986_vm2, %v1469_v17  ;;  %v1456_v22 = vpop.f32.mrf.mxu1 }
 0x50f   : > { %v1473_v24 = vpack.c.bf16 %v1465_v20, %v1462_v19  ;;  %v1457_v25 = vadd.f32 %v4778_v14, %v1456_v22  ;;  %5321 = vmatprep.mubr.msk.bf16.mxu1 %vm5872_vm1, %v5871_v2 }
 0x510   : > { %5304 = vmatmul.mubr.msk.bf16.vlgmr.msra.gmra.mxu0 %vm986_vm2, %v1468_v21 }
 0x511   : > { %v1472_v26 = vpack.c.bf16 %v1457_v25, %v1454_v23  ;;  %5320 = vmatpush3.bf16.msra.mxu1 %v1473_v24  ;;  %5315 = vmatprep.mubr.msk.bf16.mxu0 %vm5872_vm1, %v5871_v2 }
 0x512   : > { %5331 = vmatprep.subr.bf16.mxu1 %v5629_v10 }
 0x513   : > { %5314 = vmatpush3.bf16.msra.mxu0 %v1472_v26 }
 0x5ce   : > { %v1561_v27 = vpop.f32.mrf.mxu1 }
 0x5cf   : > { %v1570_v30 = vmul.f32 0.25, %v1561_v27 }
 0x5d0   : > { %v1514_v28 = vpop.f32.mrf.mxu0  ;;  %v5311_v29 = vpop.f32.mrf.mxu1 }
 0x5d1   : > { %v1568_v31 = vmul.f32 0.25, %v1514_v28  ;;  %v1574_v42 = vadd.f32 %v6120_v38, %v1570_v30  ;;  %v5630_v29 = vld [vmem:[%s6912_s6 + $0x8] sm:$0xff]  }
 0x5d2   : > { %v5305_v32 = vpop.f32.mrf.mxu0  ;;  %v1564_v33 = vpop.f32.mrf.mxu1  ;;  %5325 = vmatprep.subr.bf16.mxu0 %v5630_v29 }
 0x5d3   : > { %v1572_v34 = vadd.f32 %v6123_v41, %v1568_v31  ;;  %v1571_v37 = vmul.f32 0.25, %v1564_v33  ;;  %v1582_v46 = vsel %vm986_vm2, %v1574_v42, -inf }
 0x5d4   : > { %v1517_v35 = vpop.f32.mrf.mxu0  ;;  %v5312_v36 = vpop.f32.mrf.mxu1 }
 0x5d5   : > { %v1569_v39 = vmul.f32 0.25, %v1517_v35  ;;  %v1576_v40 = vsel %vm986_vm2, %v1572_v34, -inf  ;;  %v1575_v50 = vadd.f32 %v6120_v38, %v1571_v37 }
 0x5d6   : > { %1577 = vmax.xlane.f32.xlu0 %v1576_v40  ;;  %v5306_v43 = vpop.f32.mrf.mxu0 }
 0x5d7   : > { %v1573_v44 = vadd.f32 %v6123_v41, %v1569_v39  ;;  %v1585_v52 = vsel %vm986_vm2, %v1575_v50, -inf }
 0x5d9   : > { %v1579_v49 = vsel %vm986_vm2, %v1573_v44, -inf }
 0x5da   : > { %1583 = vmax.xlane.f32.xlu0 %v1582_v46  ;;  %1580 = vmax.xlane.f32.xlu1 %v1579_v49  ;;  %v5804_v49 = vld [vmem:[%s6034_s24] sm:$0xff] }
 0x5de   : > { %1586 = vmax.xlane.f32.xlu1 %v1585_v52 }
 0x65f   : > { %v1578_v53 = vpop.xlane.xlu0 %1577 }
 0x660   : > { %v1588_v54 = vsub.f32 %v1572_v34, %v1578_v53 }
 0x662   : > { %v1592_v55 = vmul.f32 1.442695, %v1588_v54  ;;  %v4803_v54 = vld [vmem:[%s6913_s7] ss:$0 sm:$0xff] }
 0x663   : > { %v1584_v56 = vpop.xlane.xlu0 %1583  ;;  %v1581_v57 = vpop.xlane.xlu1 %1580 }
 0x664   : > { %5707 = vpow2.f32 %v1592_v55  ;;  %v1590_v58 = vsub.f32 %v1574_v42, %v1584_v56  ;;  %v1589_v59 = vsub.f32 %v1573_v44, %v1581_v57  ;;  %v5803_v44 = vld [vmem:[%s6034_s24 + $0x10] sm:$0xff] }
 0x666   : > { %v1596_v41 = vmul.f32 1.442695, %v1590_v58  ;;  %v1594_v60 = vmul.f32 1.442695, %v1589_v59  ;;  %v5805_v59 = vld [vmem:[%s6034_s24 + $0x18] sm:$0xff] }
 0x667   : > { %v1587_v62 = vpop.xlane.xlu1 %1586 }
 0x668   : > { %5709 = vpow2.f32 %v1596_v41  ;;  %v1591_v63 = vsub.f32 %v1575_v50, %v1587_v62 }
 0x669   : > { %5711 = vpow2.f32 %v1594_v60  ;;  %v5806_v60 = vld [vmem:[%s6034_s24 + $0x8] sm:$0xff]  ;;  %s4605_s24 = sshll.u32 %s6146_s29, 4  ;;  %s6845_s24 = int_to_ptr.vmem [resolvable:$true] %s4605_s24 }
 0x66a   : > { %v1598_v38 = vmul.f32 1.442695, %v1591_v63  ;;  %s5809_s1 = scalar_lea.vmem %s6845_s24, 1024 }
 0x66b   : > { %p5810_p11 = scmp.ne.s32.totalorder %s6845_s24, %s5809_s1 }
 0x66c   : > { %5713 = vpow2.f32 %v1598_v38 }
 0x66d   : > { %p5811_p12 = pnand %p5810_p11, %p6015_p5 }
 0x66f   : > { %p5812_p13 = pneg %p5811_p12 }
 0x671   : > { %v5708_v1 = vpop.eup %5707 }
 0x672   : > { %v1600_v3 = vsel %vm986_vm2, %v5708_v1, 0.0 }
 0x673   : > { %1601 = vadd.xlane.f32.xlu0 %v1600_v3 }
 0x675   : > { %v5710_v4 = vpop.eup %5709 }
 0x676   : > { %v5712_v5 = vpop.eup %5711  ;;  %v1606_v6 = vsel %vm986_vm2, %v5710_v4, 0.0 }
 0x677   : > { %1607 = vadd.xlane.f32.xlu0 %v1606_v6  ;;  %v1603_v7 = vsel %vm986_vm2, %v5712_v5, 0.0 }
 0x678   : > { %1604 = vadd.xlane.f32.xlu1 %v1603_v7 }
 0x679   : > { %v5714_v8 = vpop.eup %5713 }
 0x67a   : > { %v1609_v9 = vsel %vm986_vm2, %v5714_v8, 0.0 }
 0x67c   : > { %1610 = vadd.xlane.f32.xlu1 %v1609_v9 }
 0x6fc   : > { %v1602_v11 = vpop.xlane.xlu0 %1601 }
 0x6fd   : > { %5715 = vrcp.f32 %v1602_v11 }
 0x700   : > { %v1608_v12 = vpop.xlane.xlu0 %1607 }
 0x701   : > { %5717 = vrcp.f32 %v1608_v12  ;;  %v1605_v13 = vpop.xlane.xlu1 %1604 }
 0x702   : > { %5719 = vrcp.f32 %v1605_v13 }
 0x705   : > { %v1611_v14 = vpop.xlane.xlu1 %1610 }
 0x706   : > { %5721 = vrcp.f32 %v1611_v14 }
 0x70a   : > { %v5716_v15 = vpop.eup %5715 }
 0x70b   : > { %v1613_v16 = vmul.f32 %v5716_v15, %v5708_v1 }
 0x70d   : > { %v5059_v17 = vpack.c.bf16 %v1613_v16, %v1613_v16 }
 0x70e   : > { %v5718_v18 = vpop.eup %5717 }
 0x70f   : > { %v5720_v19 = vpop.eup %5719  ;;  %4789 = vst.msk [vmem:[%s6146_s29 + $0x8] sm:$0xf] %vm1149_vm3, %v5059_v17  ;;  %v1617_v20 = vmul.f32 %v5718_v18, %v5710_v4 }
 0x710   : > { %v1615_v21 = vmul.f32 %v5720_v19, %v5712_v5 }
 0x711   : > { %v5061_v22 = vpack.c.bf16 %v1617_v20, %v1617_v20 }
 0x712   : > { %v1620_v23 = vpack.c.bf16 %v1615_v21, %v1613_v16  ;;  %v5060_v24 = vpack.c.bf16 %v1615_v21, %v1615_v21 }
 0x713   : > { %v5722_v25 = vpop.eup %5721  ;;  %4791 = vst.msk [vmem:[%s6146_s29 + $0x28] sm:$0xf] %vm1149_vm3, %v5061_v22 }
 0x714   : > { %4790 = vst.msk [vmem:[%s6146_s29 + $0xc] sm:$0xf] %vm1149_vm3, %v5060_v24  ;;  %5316 = vmatmul.mubr.msk.bf16.vlgmr.msra.gmra.mxu0 %vm986_vm2, %v1620_v23  ;;  %v1619_v26 = vmul.f32 %v5722_v25, %v5714_v8 }
 0x715   : > { %5326 = vmatpush3.bf16.msra.mxu0 %v5630_v29  ;;  %v6300_v29 = vld [vmem:[%s6916_s10 + $0x28] sm:$0xff]  }
 0x716   : > { %v1621_v27 = vpack.c.bf16 %v1619_v26, %v1617_v20  ;;  %v5062_v28 = vpack.c.bf16 %v1619_v26, %v1619_v26  ;;  %v5631_v26 = vld [vmem:[%s6916_s10 + $0x18] sm:$0xff]  }
 0x717   : > { %5337 = vmatprep.subr.bf16.mxu0 %v5631_v26 }
 0x718   : > { %4792 = vst.msk [vmem:[%s6146_s29 + $0x2c] sm:$0xf] %vm1149_vm3, %v5062_v28  ;;  %5322 = vmatmul.mubr.msk.bf16.vlgmr.msra.gmra.mxu1 %vm986_vm2, %v1621_v27  ;;  %v5632_v27 = vld [vmem:[%s6916_s10 + $0x10] sm:$0xff]   ;;  %v5633_v28 = vld [vmem:[%s6916_s10 + $0x8] sm:$0xff]  }
 0x719   : > { %5333 = vmatprep.mubr.msk.bf16.mxu1 %vm986_vm2, %v1242_v0  ;;  %5332 = vmatpush3.bf16.msra.mxu1 %v5629_v10 }
 0x71a   : > { %5345 = vmatprep.subr.bf16.mxu1 %v5633_v28 }
 0x720   : > { %5334 = vmatmul.mubr.msk.bf16.vlgmr.msra.gmra.mxu1 %vm986_vm2, %v1243_v61 }
 0x721   : > { %5346 = vmatpush3.bf16.msra.mxu1 %v5633_v28 }
 0x7d4   : > { %v1678_v30 = vpop.f32.mrf.mxu0 }
 0x7d6   : > { %v5317_v31 = vpop.f32.mrf.mxu0 }
 0x7d8   : > { %v1681_v32 = vpop.f32.mrf.mxu0  ;;  %v1722_v33 = vpop.f32.mrf.mxu1 }
 0x7d9   : > { %v1729_v34 = vpack.c.bf16 %v1681_v32, %v1678_v30  ;;  %v5635_v30 = vld [vmem:[%s6916_s10] sm:$0xff]  }
 0x7da   : > { %v5318_v47 = vpop.f32.mrf.mxu0  ;;  %v5323_v51 = vpop.f32.mrf.mxu1  ;;  %5347 = vmatprep.subr.bf16.mxu1 %v5635_v30 }
 0x7db   : > { %5327 = vmatprep.mubr.msk.bf16.mxu0 %vm986_vm2, %v1729_v34  ;;  %5348 = vmatpush3.bf16.msra.mxu1 %v5635_v30 }
 0x7dc   : > { %v1725_v45 = vpop.f32.mrf.mxu1 }
 0x7dd   : > { %v1730_v48 = vpack.c.bf16 %v1725_v45, %v1722_v33 }
 0x7de   : > { %v5324_v61 = vpop.f32.mrf.mxu1 }
 0x7df   : > { %5328 = vmatmul.mubr.msk.bf16.vlgmr.msra.gmra.mxu0 %vm986_vm2, %v1730_v48 }
 0x7e0   : > { %v5335_v0 = vpop.f32.mrf.mxu1  ;;  %5338 = vmatpush3.bf16.msra.mxu0 %v5631_v26 }
 0x7e1   : > { %5339 = vmatprep.subr.bf16.mxu0 %v5632_v27 }
 0x7e2   : > { %v1841_v35 = vpop.f32.mrf.mxu1 }
 0x7e4   : > { %v5336_v39 = vpop.f32.mrf.mxu1  ;;  %5340 = vmatpush3.bf16.msra.mxu0 %v5632_v27 }
 0x7e5   : > { %5353 = vmatprep.subr.bf16.mxu0 %v6300_v29 }
 0x7e6   : > { %v1844_v53 = vpop.f32.mrf.mxu1 }
 0x89f   : > { %v5329_v36 = vpop.f32.mrf.mxu0 }
 0x8a0   : > { %v1850_v37 = vadd.f32 %v5335_v0, %v5329_v36 }
 0x8a1   : > { %v1780_v40 = vpop.f32.mrf.mxu0 }
 0x8a2   : > { %v1842_v42 = vadd.f32 %v1841_v35, %v1780_v40  ;;  %v1858_v46 = vadd.f32 %v5803_v44, %v1850_v37  ;;  %v661_v37 = vlaneseq }
 0x8a3   : > { %v5330_v43 = vpop.f32.mrf.mxu0 }
 0x8a4   : > { %v1856_v50 = vadd.f32 %v5804_v49, %v1842_v42  ;;  %v1853_v52 = vadd.f32 %v5336_v39, %v5330_v43  ;;  %v6264_v58 = vadd.f32 %v4803_v54, %v1858_v46  ;;  %v6306_v40 = vshrl.u32 %v661_v37, 7  ;;  %v4804_v43 = vld [vmem:[%s6914_s8] ss:$0 sm:$0xff] }
 0x8a5   : > { %v1783_v55 = vpop.f32.mrf.mxu0 }
 0x8a6   : > { %v6262_v56 = vadd.f32 %v4803_v54, %v1856_v50  ;;  %v1845_v57 = vadd.f32 %v1844_v53, %v1783_v55  ;;  %v1859_v41 = vadd.f32 %v5805_v59, %v1853_v52  ;;  %v1879_v3 = vsel %vm678_vm0, %v6264_v58, 0.0  ;;  %v4805_v55 = vld [vmem:[%s6915_s9] ss:$0 sm:$0xff] }
 0x8a7   : > { %v663_v46 = vadd.s32 8, %v6306_v40  ;;  %vm2109_vm5 = vcmp.lt.s32.totalorder %v6306_v40, 7  ;;  %vm1949_vm6 = vcmp.lt.s32.totalorder %v6306_v40, 1  ;;  %vm664_vm7 = vcmp.ge.s32.totalorder %v6306_v40, 1 }
 0x8a8   : > { %v1857_v62 = vadd.f32 %v5806_v60, %v1845_v57  ;;  %v1873_v63 = vsel %vm678_vm0, %v6262_v56, 0.0  ;;  %v6272_v1 = vadd.f32 %v4803_v54, %v1859_v41 }
 0x8a9   : > { %1874 = vadd.xlane.f32.xlu0 %v1873_v63  ;;  %vm671_vm4 = vcmp.lt.s32.totalorder %v663_v46, 15 }
 0x8aa   : > { %v6270_v38 = vadd.f32 %v4803_v54, %v1857_v62  ;;  %v1882_v5 = vsel %vm678_vm0, %v6272_v1, 0.0 }
 0x8ac   : > { %v1876_v4 = vsel %vm678_vm0, %v6270_v38, 0.0 }
 0x8ad   : > { %1880 = vadd.xlane.f32.xlu0 %v1879_v3  ;;  %1877 = vadd.xlane.f32.xlu1 %v1876_v4  ;;  %v6316_v4 = vsel %vm671_vm4, 1.0, %v5871_v2 }
 0x8b1   : > { %1883 = vadd.xlane.f32.xlu1 %v1882_v5 }
 0x932   : > { %v1875_v6 = vpop.xlane.xlu0 %1874 }
 0x933   : > { %v1885_v7 = vmul.f32 0.03125, %v1875_v6 }
 0x935   : > { %v1889_v8 = vsub.f32 %v6262_v56, %v1885_v7 }
 0x936   : > { %v1881_v9 = vpop.xlane.xlu0 %1880  ;;  %v1878_v10 = vpop.xlane.xlu1 %1877 }
 0x937   : > { %v1887_v11 = vmul.f32 0.03125, %v1881_v9  ;;  %v1886_v12 = vmul.f32 0.03125, %v1878_v10  ;;  %v1893_v13 = vmul.f32 %v1889_v8, %v1889_v8 }
 0x939   : > { %v1891_v14 = vsub.f32 %v6264_v58, %v1887_v11  ;;  %v1890_v15 = vsub.f32 %v6270_v38, %v1886_v12  ;;  %v1897_v16 = vsel %vm678_vm0, %v1893_v13, 0.0 }
 0x93a   : > { %1898 = vadd.xlane.f32.xlu0 %v1897_v16  ;;  %v1884_v17 = vpop.xlane.xlu1 %1883 }
 0x93b   : > { %v1888_v18 = vmul.f32 0.03125, %v1884_v17  ;;  %v1895_v19 = vmul.f32 %v1891_v14, %v1891_v14  ;;  %v1894_v20 = vmul.f32 %v1890_v15, %v1890_v15 }
 0x93d   : > { %v1892_v21 = vsub.f32 %v6272_v1, %v1888_v18  ;;  %v1903_v22 = vsel %vm678_vm0, %v1895_v19, 0.0  ;;  %v1900_v23 = vsel %vm678_vm0, %v1894_v20, 0.0  ;;  %v6331_v19 = vsel %vm664_vm7, 1.0, %v5871_v2 }
 0x93e   : > { %1904 = vadd.xlane.f32.xlu0 %v1903_v22  ;;  %1901 = vadd.xlane.f32.xlu1 %v1900_v23 }
 0x93f   : > { %v1896_v24 = vmul.f32 %v1892_v21, %v1892_v21 }
 0x941   : > { %v1906_v25 = vsel %vm678_vm0, %v1896_v24, 0.0 }
 0x942   : > { %1907 = vadd.xlane.f32.xlu1 %v1906_v25 }
 0x9c3   : > { %v1899_v31 = vpop.xlane.xlu0 %1898 }
 0x9c4   : > { %v1909_v32 = vmul.f32 0.03125, %v1899_v31 }
 0x9c6   : > { %v1913_v33 = vadd.f32 1e-05, %v1909_v32 }
 0x9c7   : > { %v1905_v34 = vpop.xlane.xlu0 %1904  ;;  %v1902_v47 = vpop.xlane.xlu1 %1901 }
 0x9c8   : > { %5723 = vrsqrt.f32 %v1913_v33  ;;  %v1911_v51 = vmul.f32 0.03125, %v1905_v34  ;;  %v1910_v45 = vmul.f32 0.03125, %v1902_v47  ;;  %v5637_v34 = vld [vmem:[%s6918_s12 + $0x38] sm:$0xff]   ;;  %v5638_v47 = vld [vmem:[%s6918_s12 + $0x30] sm:$0xff]  }
 0x9c9   : > { %5361 = vmatprep.subr.bf16.mxu1 %v5637_v34 }
 0x9ca   : > { %v1915_v48 = vadd.f32 1e-05, %v1911_v51  ;;  %v1914_v61 = vadd.f32 1e-05, %v1910_v45  ;;  %v5639_v51 = vld [vmem:[%s6918_s12 + $0x18] sm:$0xff]   ;;  %v5640_v45 = vld [vmem:[%s6918_s12 + $0x28] sm:$0xff]  }
 0x9cb   : > { %v1908_v0 = vpop.xlane.xlu1 %1907 }
 0x9cc   : > { %5725 = vrsqrt.f32 %v1915_v48  ;;  %v1912_v35 = vmul.f32 0.03125, %v1908_v0  ;;  %v5641_v48 = vld [vmem:[%s6918_s12 + $0x10] sm:$0xff]   ;;  %v5643_v0 = vld [vmem:[%s6918_s12 + $0x8] sm:$0xff]  }
 0x9cd   : > { %5727 = vrsqrt.f32 %v1914_v61  ;;  %v5642_v61 = vld [vmem:[%s6918_s12 + $0x20] sm:$0xff]  }
 0x9ce   : > { %v1916_v36 = vadd.f32 1e-05, %v1912_v35  ;;  %v5644_v35 = vld [vmem:[%s6918_s12 + $0x58] sm:$0xff]  }
 0x9d0   : > { %5729 = vrsqrt.f32 %v1916_v36  ;;  %v5645_v36 = vld [vmem:[%s6918_s12] sm:$0xff]  }
 0x9d5   : > { %v5724_v39 = vpop.eup %5723 }
 0x9d6   : > { %v1921_v42 = vmul.f32 %v5724_v39, %v1889_v8 }
 0x9d8   : > { %v1931_v53 = vmul.f32 %v4804_v43, %v1921_v42 }
 0x9d9   : > { %v5726_v44 = vpop.eup %5725 }
 0x9da   : > { %v5728_v49 = vpop.eup %5727  ;;  %v1923_v50 = vmul.f32 %v5726_v44, %v1891_v14  ;;  %v1941_v62 = vadd.f32 %v4805_v55, %v1931_v53 }
 0x9db   : > { %v1922_v52 = vmul.f32 %v5728_v49, %v1890_v15  ;;  %v5636_v15 = vld [vmem:[%s6916_s10 + $0x20] sm:$0xff]  }
 0x9dc   : > { %v1933_v54 = vmul.f32 %v4804_v43, %v1923_v50  ;;  %v2105_v11 = vrot.slane %v1941_v62, 1  ;;  %v1945_v16 = vrot.slane %v1941_v62, 7 }
 0x9dd   : > { %v5730_v57 = vpop.eup %5729  ;;  %v1932_v59 = vmul.f32 %v4804_v43, %v1922_v52 }
 0x9de   : > { %v1924_v41 = vmul.f32 %v5730_v57, %v1892_v21  ;;  %v1943_v60 = vadd.f32 %v4805_v55, %v1933_v54  ;;  %v4826_v54 = vld [vmem:[%s6917_s11] ss:$0 sm:$0xff] }
 0x9df   : > { %v1942_v63 = vadd.f32 %v4805_v55, %v1932_v59 }
 0x9e0   : > { %v1934_v3 = vmul.f32 %v4804_v43, %v1924_v41  ;;  %v2107_v5 = vrot.slane %v1943_v60, 1  ;;  %v1947_v9 = vrot.slane %v1943_v60, 7 }
 0x9e1   : > { %v1964_v6 = vpack.c.bf16 %v1942_v63, %v1941_v62  ;;  %v2106_v7 = vrot.slane %v1942_v63, 1  ;;  %v1946_v8 = vrot.slane %v1942_v63, 7 }
 0x9e2   : > { %v1944_v10 = vadd.f32 %v4805_v55, %v1934_v3 }
 0x9e3   : > { %5341 = vmatprep.mubr.msk.bf16.mxu0 %vm678_vm0, %v1964_v6  ;;  %v2111_v12 = vsel %vm2109_vm5, %v2106_v7, %v2107_v5  ;;  %v2112_v18 = vsel %vm2109_vm5, %v2105_v11, %v2106_v7  ;;  %v1951_v20 = vsel %vm1949_vm6, %v1946_v8, %v1947_v9  ;;  %v1952_v27 = vsel %vm1949_vm6, %v1945_v16, %v1946_v8 }
 0x9e4   : > { %v1965_v13 = vpack.c.bf16 %v1944_v10, %v1943_v60  ;;  %v2115_v14 = vmul.f32 %v6316_v4, %v2111_v12  ;;  %v1948_v17 = vrot.slane %v1944_v10, 7  ;;  %v2108_v21 = vrot.slane %v1944_v10, 1 }
 0x9e5   : > { %v1956_v28 = vmul.f32 %v6331_v19, %v1951_v20 }
 0x9e6   : > { %5342 = vmatmul.mubr.msk.bf16.vlgmr.msra.gmra.mxu0 %vm678_vm0, %v1965_v13  ;;  %v2118_v22 = vpack.c.bf16 %v2115_v14, %v2112_v18  ;;  %v1953_v23 = vsel %vm1949_vm6, %v1948_v17, %v1945_v16  ;;  %v1950_v25 = vsel %vm1949_vm6, %v1947_v9, %v1948_v17  ;;  %v2113_v26 = vsel %vm2109_vm5, %v2108_v21, %v2105_v11 }
 0x9e7   : > { %5354 = vmatpush3.bf16.msra.mxu0 %v6300_v29  ;;  %v1954_v24 = vmul.f32 %v6331_v19, %v1953_v23  ;;  %v2117_v30 = vmul.f32 %v6316_v4, %v2113_v26  ;;  %v1959_v29 = vpack.c.bf16 %v1950_v25, %v1956_v28  ;;  %v2110_v32 = vsel %vm2109_vm5, %v2107_v5, %v2108_v21  ;;  %v5646_v26 = vld [vmem:[%s6918_s12 + $0x50] sm:$0xff]  }
 0x9e8   : > { %5357 = vmatprep.mubr.msk.bf16.mxu0 %vm678_vm0, %v2118_v22  ;;  %5355 = vmatprep.subr.bf16.mxu0 %v5636_v15 }
 0x9e9   : > { %v1958_v31 = vpack.c.bf16 %v1952_v27, %v1954_v24  ;;  %v2119_v33 = vpack.c.bf16 %v2117_v30, %v2110_v32 }
 0x9eb   : > { %5349 = vmatprep.mubr.msk.bf16.mxu1 %vm678_vm0, %v1958_v31  ;;  %5356 = vmatpush3.bf16.msra.mxu0 %v5636_v15 }
 0x9ec   : > { %5350 = vmatmul.mubr.msk.bf16.vlgmr.msra.gmra.mxu1 %vm678_vm0, %v1959_v29  ;;  %5373 = vmatprep.subr.bf16.mxu0 %v5639_v51 }
 0x9ed   : > { %5362 = vmatpush3.bf16.msra.mxu1 %v5637_v34 }
 0x9ee   : > { %5358 = vmatmul.mubr.msk.bf16.vlgmr.msra.gmra.mxu0 %vm678_vm0, %v2119_v33  ;;  %5363 = vmatprep.subr.bf16.mxu1 %v5638_v47 }
 0x9ef   : > { %5374 = vmatpush3.bf16.msra.mxu0 %v5639_v51 }
 0x9f0   : > { %5375 = vmatprep.subr.bf16.mxu0 %v5641_v48 }
 0x9f1   : > { %5364 = vmatpush3.bf16.msra.mxu1 %v5638_v47 }
 0x9f2   : > { %5365 = vmatprep.subr.bf16.mxu1 %v5640_v45 }
 0x9f3   : > { %5376 = vmatpush3.bf16.msra.mxu0 %v5641_v48  ;;  %v5647_v48 = vld [vmem:[%s6918_s12 + $0x48] sm:$0xff]  }
 0x9f4   : > { %5377 = vmatprep.subr.bf16.mxu0 %v5643_v0 }
 0x9f5   : > { %5366 = vmatpush3.bf16.msra.mxu1 %v5640_v45 }
 0x9f6   : > { %5367 = vmatprep.subr.bf16.mxu1 %v5642_v61 }
 0x9f7   : > { %5378 = vmatpush3.bf16.msra.mxu0 %v5643_v0  ;;  %v5648_v0 = vld [vmem:[%s6918_s12 + $0x40] sm:$0xff]  }
 0x9f8   : > { %5379 = vmatprep.subr.bf16.mxu0 %v5645_v36 }
 0x9f9   : > { %5368 = vmatpush3.bf16.msra.mxu1 %v5642_v61 }
 0x9fa   : > { %5385 = vmatprep.subr.bf16.mxu1 %v5644_v35 }
 0x9fb   : > { %5380 = vmatpush3.bf16.msra.mxu0 %v5645_v36 }
 0xaa6   : > { %v5343_v37 = vpop.f32.mrf.mxu0 }
 0xaa8   : > { %v2023_v39 = vpop.f32.mrf.mxu0 }
 0xaaa   : > { %v5344_v42 = vpop.f32.mrf.mxu0 }
 0xaac   : > { %v2026_v43 = vpop.f32.mrf.mxu0  ;;  %v5351_v44 = vpop.f32.mrf.mxu1 }
 0xaad   : > { %v2099_v46 = vadd.f32 %v5351_v44, %v5343_v37 }
 0xaae   : > { %v2090_v49 = vpop.f32.mrf.mxu1  ;;  %v5359_v50 = vpop.f32.mrf.mxu0 }
 0xaaf   : > { %v2091_v52 = vadd.f32 %v2090_v49, %v2023_v39  ;;  %v2194_v53 = vadd.f32 %v5359_v50, %v2099_v46 }
 0xab0   : > { %v5352_v55 = vpop.f32.mrf.mxu1  ;;  %v2177_v57 = vpop.f32.mrf.mxu0 }
 0xab1   : > { %v2102_v59 = vadd.f32 %v5352_v55, %v5344_v42  ;;  %v2192_v41 = vadd.f32 %v2177_v57, %v2091_v52  ;;  %v2205_v63 = vadd.f32 %v4826_v54, %v2194_v53 }
 0xab2   : > { %v2093_v60 = vpop.f32.mrf.mxu1  ;;  %v5360_v62 = vpop.f32.mrf.mxu0 }
 0xab3   : > { %v2203_v3 = vadd.f32 %v4826_v54, %v2192_v41  ;;  %v2094_v5 = vadd.f32 %v2093_v60, %v2026_v43  ;;  %v2195_v6 = vadd.f32 %v5360_v62, %v2102_v59  ;;  %v2209_v11 = vmax.f32 %v2205_v63, 0.0 }
 0xab4   : > { %v2180_v7 = vpop.f32.mrf.mxu0 }
 0xab5   : > { %v2207_v8 = vmax.f32 %v2203_v3, 0.0  ;;  %v2206_v9 = vadd.f32 %v4826_v54, %v2195_v6  ;;  %v2193_v10 = vadd.f32 %v2180_v7, %v2094_v5  ;;  %v2213_v17 = vrot.slane %v2209_v11, 7 }
 0xab6   : > { %v2405_v20 = vrot.slane %v2209_v11, 1 }
 0xab7   : > { %v2210_v12 = vmax.f32 %v2206_v9, 0.0  ;;  %v2204_v13 = vadd.f32 %v4826_v54, %v2193_v10  ;;  %v2211_v14 = vrot.slane %v2207_v8, 7  ;;  %v2403_v27 = vrot.slane %v2207_v8, 1 }
 0xab9   : > { %v2214_v15 = vrot.slane %v2210_v12, 7  ;;  %v2208_v16 = vmax.f32 %v2204_v13, 0.0  ;;  %v2234_v24 = vpack.c.bf16 %v2210_v12, %v2209_v11  ;;  %v2406_v61 = vrot.slane %v2210_v12, 1 }
 0xabb   : > { %v2218_v18 = vsel %vm1949_vm6, %v2214_v15, %v2211_v14  ;;  %v2212_v21 = vrot.slane %v2208_v16, 7  ;;  %v2404_v22 = vrot.slane %v2208_v16, 1  ;;  %v2233_v23 = vpack.c.bf16 %v2208_v16, %v2207_v8  ;;  %v4861_v8 = vld [vmem:[%s6919_s13] ss:$0 sm:$0xff] }
 0xabc   : > { %v2219_v25 = vmul.f32 %v6331_v19, %v2218_v18  ;;  %v2215_v34 = vsel %vm1949_vm6, %v2213_v17, %v2214_v15  ;;  %v2407_v37 = vsel %vm2109_vm5, %v2405_v20, %v2406_v61 }
 0xabd   : > { %v2216_v28 = vsel %vm1949_vm6, %v2212_v21, %v2213_v17  ;;  %5369 = vmatprep.mubr.msk.bf16.mxu1 %vm2268_vm8, %v2233_v23  ;;  %v2217_v30 = vsel %vm1949_vm6, %v2211_v14, %v2212_v21  ;;  %v2408_v31 = vsel %vm2109_vm5, %v2404_v22, %v2405_v20  ;;  %v2409_v47 = vsel %vm2109_vm5, %v2403_v27, %v2404_v22 }
 0xabe   : > { %v2221_v29 = vmul.f32 %v6331_v19, %v2216_v28  ;;  %5370 = vmatmul.mubr.msk.bf16.vlgmr.msra.gmra.mxu1 %vm2268_vm8, %v2234_v24  ;;  %v2223_v32 = vpack.c.bf16 %v2217_v30, %v2219_v25  ;;  %v2412_v33 = vmul.f32 %v6316_v4, %v2408_v31 }
 0xabf   : > { %5386 = vmatpush3.bf16.msra.mxu1 %v5644_v35  ;;  %v2410_v35 = vsel %vm2109_vm5, %v2406_v61, %v2403_v27  ;;  %v5650_v61 = vld [vmem:[%s6953_s4 + $0xa8] sm:$0xff]  }
 0xac0   : > { %5381 = vmatprep.mubr.msk.bf16.mxu0 %vm2268_vm8, %v2223_v32  ;;  %5387 = vmatprep.subr.bf16.mxu1 %v5646_v26  ;;  %v2224_v51 = vpack.c.bf16 %v2215_v34, %v2221_v29  ;;  %v2415_v45 = vpack.c.bf16 %v2412_v33, %v2409_v47  ;;  %v2414_v36 = vmul.f32 %v6316_v4, %v2410_v35  ;;  %v5652_v35 = vld [vmem:[%s6953_s4 + $0xa0] sm:$0xff]  }
 0xac2   : > { %5382 = vmatmul.mubr.msk.bf16.vlgmr.msra.gmra.mxu0 %vm2268_vm8, %v2224_v51  ;;  %5393 = vmatprep.mubr.msk.bf16.mxu1 %vm2268_vm8, %v2415_v45  ;;  %v2416_v39 = vpack.c.bf16 %v2414_v36, %v2407_v37  ;;  %v5653_v36 = vld [vmem:[%s6953_s4 + $0x88] sm:$0xff]  }
 0xac3   : > { %5388 = vmatpush3.bf16.msra.mxu1 %v5646_v26 }
 0xac4   : > { %5389 = vmatprep.subr.bf16.mxu1 %v5647_v48 }
 0xac7   : > { %5390 = vmatpush3.bf16.msra.mxu1 %v5647_v48  ;;  %v5649_v48 = vld [vmem:[%s6953_s4 + $0x68] sm:$0xff]  }
 0xac8   : > { %5391 = vmatprep.subr.bf16.mxu1 %v5648_v0  ;;  %5397 = vmatprep.subr.bf16.mxu0 %v5649_v48 }
 0xac9   : > { %5398 = vmatpush3.bf16.msra.mxu0 %v5649_v48 }
 0xacb   : > { %5392 = vmatpush3.bf16.msra.mxu1 %v5648_v0  ;;  %v5651_v0 = vld [vmem:[%s6953_s4 + $0x60] sm:$0xff]  }
 0xacc   : > { %5413 = vmatprep.subr.bf16.mxu1 %v5650_v61  ;;  %5399 = vmatprep.subr.bf16.mxu0 %v5651_v0 }
 0xacd   : > { %5400 = vmatpush3.bf16.msra.mxu0 %v5651_v0  ;;  %v4891_v0 = vld [vmem:[%s6911_s5 + $0xa] ss:$0 sm:$0xff] }
 0xace   : > { %5394 = vmatmul.mubr.msk.bf16.vlgmr.msra.gmra.mxu1 %vm2268_vm8, %v2416_v39  ;;  %5405 = vmatprep.subr.bf16.mxu0 %v5653_v36 }
 0xacf   : > { %5414 = vmatpush3.bf16.msra.mxu1 %v5650_v61  ;;  %v4871_v61 = vld [vmem:[%s6911_s5 + $0x6] ss:$0 sm:$0xff] }
 0xad0   : > { %5415 = vmatprep.subr.bf16.mxu1 %v5652_v35 }
 0xad3   : > { %5416 = vmatpush3.bf16.msra.mxu1 %v5652_v35 }
 0xad4   : > { %5427 = vmatprep.subr.bf16.mxu1 %v5871_v2 }
 0xb7e   : > { %v5371_v42 = vpop.f32.mrf.mxu1 }
 0xb80   : > { %v2309_v43 = vpop.f32.mrf.mxu1 }
 0xb82   : > { %v5383_v44 = vpop.f32.mrf.mxu0  ;;  %v5372_v46 = vpop.f32.mrf.mxu1 }
 0xb83   : > { %v2397_v53 = vadd.f32 %v5383_v44, %v5371_v42 }
 0xb84   : > { %v2388_v49 = vpop.f32.mrf.mxu0  ;;  %v2312_v50 = vpop.f32.mrf.mxu1 }
 0xb85   : > { %v2389_v55 = vadd.f32 %v2388_v49, %v2309_v43 }
 0xb86   : > { %v5384_v52 = vpop.f32.mrf.mxu0 }
 0xb87   : > { %v2400_v60 = vadd.f32 %v5384_v52, %v5372_v46 }
 0xb88   : > { %v2391_v59 = vpop.f32.mrf.mxu0 }
 0xb89   : > { %v2392_v3 = vadd.f32 %v2391_v59, %v2312_v50 }
 0xb8e   : > { %v5395_v54 = vpop.f32.mrf.mxu1 }
 0xb8f   : > { %v2507_v57 = vadd.f32 %v5395_v54, %v2397_v53 }
 0xb90   : > { %v2490_v41 = vpop.f32.mrf.mxu1 }
 0xb91   : > { %v2505_v62 = vadd.f32 %v2490_v41, %v2389_v55  ;;  %v2511_v5 = vadd.f32 %v2507_v57, %v6264_v58  ;;  %v4864_v41 = vld [vmem:[%s6954_s25 + $0x1] ss:$0 sm:$0xff] }
 0xb92   : > { %v5396_v63 = vpop.f32.mrf.mxu1 }
 0xb93   : > { %v2509_v6 = vadd.f32 %v2505_v62, %v6262_v56  ;;  %v2508_v7 = vadd.f32 %v5396_v63, %v2400_v60  ;;  %v6426_v12 = vadd.f32 %v4861_v8, %v2511_v5 }
 0xb94   : > { %v2493_v9 = vpop.f32.mrf.mxu1 }
 0xb95   : > { %v6424_v10 = vadd.f32 %v4861_v8, %v2509_v6  ;;  %v2506_v11 = vadd.f32 %v2493_v9, %v2392_v3  ;;  %v2512_v13 = vadd.f32 %v2508_v7, %v6272_v1  ;;  %v2534_v17 = vsel %vm678_vm0, %v6426_v12, 0.0  ;;  %v4865_v6 = vld [vmem:[%s6955_s23 + $0x1] ss:$0 sm:$0xff] }
 0xb97   : > { %v2510_v14 = vadd.f32 %v2506_v11, %v6270_v38  ;;  %v2528_v58 = vsel %vm678_vm0, %v6424_v10, 0.0  ;;  %v6434_v15 = vadd.f32 %v4861_v8, %v2512_v13 }
 0xb98   : > { %2529 = vadd.xlane.f32.xlu0 %v2528_v58 }
 0xb99   : > { %v6432_v56 = vadd.f32 %v4861_v8, %v2510_v14  ;;  %v2537_v1 = vsel %vm678_vm0, %v6434_v15, 0.0 }
 0xb9b   : > { %v2531_v16 = vsel %vm678_vm0, %v6432_v56, 0.0 }
 0xb9c   : > { %2532 = vadd.xlane.f32.xlu1 %v2531_v16  ;;  %2535 = vadd.xlane.f32.xlu0 %v2534_v17 }
 0xba0   : > { %2538 = vadd.xlane.f32.xlu1 %v2537_v1 }
 0xc21   : > { %v2530_v38 = vpop.xlane.xlu0 %2529 }
 0xc22   : > { %v2540_v18 = vmul.f32 0.03125, %v2530_v38 }
 0xc24   : > { %v2544_v20 = vsub.f32 %v6424_v10, %v2540_v18  ;;  %v5654_v18 = vld [vmem:[%s6953_s4 + $0x80] sm:$0xff]  }
 0xc25   : > { %v2533_v21 = vpop.xlane.xlu1 %2532  ;;  %v2536_v22 = vpop.xlane.xlu0 %2535 }
 0xc26   : > { %v2541_v23 = vmul.f32 0.03125, %v2533_v21  ;;  %v2542_v24 = vmul.f32 0.03125, %v2536_v22  ;;  %v2548_v25 = vmul.f32 %v2544_v20, %v2544_v20 }
 0xc28   : > { %v2545_v26 = vsub.f32 %v6432_v56, %v2541_v23  ;;  %v2546_v27 = vsub.f32 %v6426_v12, %v2542_v24  ;;  %v2552_v28 = vsel %vm678_vm0, %v2548_v25, 0.0 }
 0xc29   : > { %v2539_v30 = vpop.xlane.xlu1 %2538  ;;  %2553 = vadd.xlane.f32.xlu0 %v2552_v28 }
 0xc2a   : > { %v2543_v31 = vmul.f32 0.03125, %v2539_v30  ;;  %v2549_v29 = vmul.f32 %v2545_v26, %v2545_v26  ;;  %v2550_v32 = vmul.f32 %v2546_v27, %v2546_v27 }
 0xc2c   : > { %v2547_v33 = vsub.f32 %v6434_v15, %v2543_v31  ;;  %v2555_v34 = vsel %vm678_vm0, %v2549_v29, 0.0  ;;  %v2558_v47 = vsel %vm678_vm0, %v2550_v32, 0.0 }
 0xc2d   : > { %2556 = vadd.xlane.f32.xlu1 %v2555_v34  ;;  %2559 = vadd.xlane.f32.xlu0 %v2558_v47 }
 0xc2e   : > { %v2551_v51 = vmul.f32 %v2547_v33, %v2547_v33 }
 0xc30   : > { %v2561_v45 = vsel %vm678_vm0, %v2551_v51, 0.0 }
 0xc31   : > { %2562 = vadd.xlane.f32.xlu1 %v2561_v45 }
 0xcb2   : > { %v2554_v37 = vpop.xlane.xlu0 %2553 }
 0xcb3   : > { %v2564_v39 = vmul.f32 0.03125, %v2554_v37 }
 0xcb5   : > { %v2568_v42 = vadd.f32 1e-05, %v2564_v39 }
 0xcb6   : > { %v2557_v43 = vpop.xlane.xlu1 %2556  ;;  %v2560_v44 = vpop.xlane.xlu0 %2559 }
 0xcb7   : > { %5731 = vrsqrt.f32 %v2568_v42  ;;  %v2565_v46 = vmul.f32 0.03125, %v2557_v43  ;;  %v2566_v49 = vmul.f32 0.03125, %v2560_v44 }
 0xcb9   : > { %v2569_v50 = vadd.f32 1e-05, %v2565_v46  ;;  %v2570_v52 = vadd.f32 1e-05, %v2566_v49 }
 0xcba   : > { %v2563_v53 = vpop.xlane.xlu1 %2562 }
 0xcbb   : > { %5733 = vrsqrt.f32 %v2569_v50  ;;  %v2567_v54 = vmul.f32 0.03125, %v2563_v53 }
 0xcbc   : > { %5735 = vrsqrt.f32 %v2570_v52 }
 0xcbd   : > { %v2571_v55 = vadd.f32 1e-05, %v2567_v54 }
 0xcbf   : > { %5737 = vrsqrt.f32 %v2571_v55 }
 0xcc4   : > { %v5732_v57 = vpop.eup %5731 }
 0xcc5   : > { %v2576_v59 = vmul.f32 %v5732_v57, %v2544_v20 }
 0xcc7   : > { %v2586_v63 = vmul.f32 %v4864_v41, %v2576_v59 }
 0xcc8   : > { %v5734_v60 = vpop.eup %5733 }
 0xcc9   : > { %v5736_v62 = vpop.eup %5735  ;;  %v2577_v3 = vmul.f32 %v5734_v60, %v2545_v26  ;;  %v2596_v13 = vadd.f32 %v4865_v6, %v2586_v63  ;;  %v4881_v26 = vld [vmem:[%s6911_s5 + $0x8] ss:$0 sm:$0xff]  ;;  %v6516_v63 = vld [vmem:[%s6117_s28 + $0x1] ss:$0 sm:$0xff] }
 0xcca   : > { %v2578_v5 = vmul.f32 %v5736_v62, %v2546_v27 }
 0xccb   : > { %v2587_v7 = vmul.f32 %v4864_v41, %v2577_v3 }
 0xccc   : > { %v5738_v8 = vpop.eup %5737  ;;  %v2588_v9 = vmul.f32 %v4864_v41, %v2578_v5 }
 0xccd   : > { %v2579_v11 = vmul.f32 %v5738_v8, %v2547_v33  ;;  %v2597_v14 = vadd.f32 %v4865_v6, %v2587_v7 }
 0xcce   : > { %v2598_v17 = vadd.f32 %v4865_v6, %v2588_v9  ;;  %v6521_v9 = vld [vmem:[%s6117_s28] ss:$0 sm:$0xff] }
 0xccf   : > { %v2589_v58 = vmul.f32 %v4864_v41, %v2579_v11  ;;  %v6472_v16 = vpack.c.bf16 %v2597_v14, %v2596_v13 }
 0xcd1   : > { %5401 = vmatprep.mubr.msk.bf16.mxu0 %vm678_vm0, %v6472_v16  ;;  %5417 = vmatprep.mubr.msk.bf16.mxu1 %vm678_vm0, %v6472_v16  ;;  %v2599_v1 = vadd.f32 %v4865_v6, %v2589_v58 }
 0xcd3   : > { %v6478_v38 = vpack.c.bf16 %v2599_v1, %v2598_v17 }
 0xcd5   : > { %5402 = vmatmul.mubr.msk.bf16.vlgmr.msra.gmra.mxu0 %vm678_vm0, %v6478_v38  ;;  %5418 = vmatmul.mubr.msk.bf16.vlgmr.msra.gmra.mxu1 %vm678_vm0, %v6478_v38 }
 0xcd6   : > { %5406 = vmatpush3.bf16.msra.mxu0 %v5653_v36  ;;  %5409 = vmatprep.mubr.msk.bf16.mxu0 %vm678_vm0, %v6472_v16 }
 0xcd7   : > { %5407 = vmatprep.subr.bf16.mxu0 %v5654_v18  ;;  %5429 = vmatprep.mubr.msk.bf16.mxu1 %vm5872_vm1, %v5871_v2 }
 0xcda   : > { %5408 = vmatpush3.bf16.msra.mxu0 %v5654_v18 }
 0xcdb   : > { %5421 = vmatprep.subr.bf16.mxu0 %v5871_v2 }
 0xcdd   : > { %5410 = vmatmul.mubr.msk.bf16.vlgmr.msra.gmra.mxu0 %vm678_vm0, %v6478_v38 }
 0xcde   : > { %5423 = vmatprep.mubr.msk.bf16.mxu0 %vm5872_vm1, %v5871_v2 }
 0xd95   : > { %v5403_v20 = vpop.f32.mrf.mxu0  ;;  %v5419_v24 = vpop.f32.mrf.mxu1 }
 0xd96   : > { %v2676_v42 = vadd.f32 %v5403_v20, %v4871_v61  ;;  %v2824_v44 = vadd.f32 %v5419_v24, %v4891_v0 }
 0xd97   : > { %v2667_v21 = vpop.f32.mrf.mxu0  ;;  %v2815_v28 = vpop.f32.mrf.mxu1 }
 0xd98   : > { %v2668_v49 = vadd.f32 %v4871_v61, %v2667_v21  ;;  %v2816_v52 = vadd.f32 %v4891_v0, %v2815_v28 }
 0xd99   : > { %v5404_v22 = vpop.f32.mrf.mxu0  ;;  %v5420_v33 = vpop.f32.mrf.mxu1 }
 0xd9a   : > { %v2679_v35 = vadd.f32 %v5404_v22, %v4871_v61  ;;  %v2827_v39 = vadd.f32 %v5420_v33, %v4891_v0 }
 0xd9b   : > { %v2670_v23 = vpop.f32.mrf.mxu0  ;;  %v2818_v36 = vpop.f32.mrf.mxu1 }
 0xd9c   : > { %v2671_v43 = vadd.f32 %v4871_v61, %v2670_v23  ;;  %v2819_v46 = vadd.f32 %v4891_v0, %v2818_v36  ;;  %v2831_v50 = vpack.c.bf16 %v2679_v35, %v2676_v42  ;;  %v2835_v53 = vpack.c.bf16 %v2827_v39, %v2824_v44  ;;  %v5656_v39 = vld [vmem:[%s6953_s4 + $0x78] sm:$0xff]  }
 0xd9d   : > { %v5411_v25 = vpop.f32.mrf.mxu0 }
 0xd9e   : > { %v2750_v31 = vadd.f32 %v5411_v25, %v4881_v26  ;;  %v2830_v54 = vpack.c.bf16 %v2671_v43, %v2668_v49  ;;  %v2834_v55 = vpack.c.bf16 %v2819_v46, %v2816_v52 }
 0xd9f   : > { %v2741_v27 = vpop.f32.mrf.mxu0 }
 0xda0   : > { %v2742_v34 = vadd.f32 %v4881_v26, %v2741_v27 }
 0xda1   : > { %v5412_v30 = vpop.f32.mrf.mxu0 }
 0xda2   : > { %v2753_v29 = vadd.f32 %v5412_v30, %v4881_v26 }
 0xda3   : > { %v2744_v32 = vpop.f32.mrf.mxu0 }
 0xda4   : > { %v2833_v47 = vpack.c.bf16 %v2753_v29, %v2750_v31  ;;  %v2745_v51 = vadd.f32 %v4881_v26, %v2744_v32 }
 0xda6   : > { %v2832_v45 = vpack.c.bf16 %v2745_v51, %v2742_v34  ;;  %v2887_v48 = vsel %vm986_vm2, %v2833_v47, 0 }
 0xda7   : > { %5428 = vmatpush3.bf16.xpose.msra.mxu1 %v2887_v48 }
 0xda8   : > { %v2840_v37 = vsel %vm986_vm2, %v2832_v45, 0  ;;  %5439 = vmatprep.subr.bf16.mxu1 %v5871_v2 }
 0xda9   : > { %5422 = vmatpush3.bf16.xpose.msra.mxu0 %v2840_v37  ;;  %v5655_v37 = vld [vmem:[%s6953_s4 + $0x98] sm:$0xff]  }
 0xdaa   : > { %5433 = vmatprep.subr.bf16.mxu0 %v5871_v2 }
 0xdae   : > { %5430 = vmatmul.mubr.msk.bf16.vlgmr.msra.gmra.mxu1 %vm986_vm2, %v2831_v50 }
 0xdaf   : > { %5440 = vmatpush3.bf16.msra.mxu1 %v2835_v53  ;;  %5441 = vmatprep.mubr.msk.bf16.mxu1 %vm5872_vm1, %v5871_v2 }
 0xdb0   : > { %5424 = vmatmul.mubr.msk.bf16.vlgmr.msra.gmra.mxu0 %vm986_vm2, %v2830_v54  ;;  %5453 = vmatprep.subr.bf16.mxu1 %v5655_v37 }
 0xdb1   : > { %5434 = vmatpush3.bf16.msra.mxu0 %v2834_v55  ;;  %5435 = vmatprep.mubr.msk.bf16.mxu0 %vm5872_vm1, %v5871_v2 }
 0xdb2   : > { %5445 = vmatprep.subr.bf16.mxu0 %v5656_v39 }
 0xe6e   : > { %v2923_v57 = vpop.f32.mrf.mxu1 }
 0xe6f   : > { %v2932_v59 = vmul.f32 0.25, %v2923_v57 }
 0xe70   : > { %v2876_v41 = vpop.f32.mrf.mxu0  ;;  %v5431_v60 = vpop.f32.mrf.mxu1 }
 0xe71   : > { %v2930_v62 = vmul.f32 0.25, %v2876_v41  ;;  %v2936_v3 = vadd.f32 %v6516_v63, %v2932_v59  ;;  %v5657_v60 = vld [vmem:[%s6953_s4 + $0x90] sm:$0xff]  }
 0xe72   : > { %v5425_v5 = vpop.f32.mrf.mxu0  ;;  %v2926_v6 = vpop.f32.mrf.mxu1 }
 0xe73   : > { %v2933_v7 = vmul.f32 0.25, %v2926_v6  ;;  %v2944_v8 = vsel %vm986_vm2, %v2936_v3, -inf  ;;  %v2934_v11 = vadd.f32 %v6521_v9, %v2930_v62 }
 0xe74   : > { %2945 = vmax.xlane.f32.xlu0 %v2944_v8  ;;  %v2879_v13 = vpop.f32.mrf.mxu0  ;;  %v5432_v14 = vpop.f32.mrf.mxu1  ;;  %v5658_v8 = vld [vmem:[%s6953_s4 + $0x70] sm:$0xff]  }
 0xe75   : > { %v2931_v58 = vmul.f32 0.25, %v2879_v13  ;;  %v2937_v17 = vadd.f32 %v6516_v63, %v2933_v7  ;;  %v2938_v20 = vsel %vm986_vm2, %v2934_v11, -inf  ;;  %v5660_v13 = vld [vmem:[%s6953_s4 + $0xb0] sm:$0xff]  }
 0xe76   : > { %v5426_v1 = vpop.f32.mrf.mxu0 }
 0xe77   : > { %v2947_v18 = vsel %vm986_vm2, %v2937_v17, -inf  ;;  %v2935_v21 = vadd.f32 %v6521_v9, %v2931_v58 }
 0xe78   : > { %2948 = vmax.xlane.f32.xlu1 %v2947_v18  ;;  %2939 = vmax.xlane.f32.xlu0 %v2938_v20 }
 0xe79   : > { %v2941_v22 = vsel %vm986_vm2, %v2935_v21, -inf }
 0xe7c   : > { %2942 = vmax.xlane.f32.xlu1 %v2941_v22 }
 0xefd   : > { %v2946_v23 = vpop.xlane.xlu0 %2945 }
 0xefe   : > { %v2952_v24 = vsub.f32 %v2936_v3, %v2946_v23 }
 0xf00   : > { %v2958_v25 = vmul.f32 1.442695, %v2952_v24  ;;  %v4925_v24 = vld [vmem:[%s6911_s5 + $0x9] ss:$0 sm:$0xff] }
 0xf01   : > { %v2949_v26 = vpop.xlane.xlu1 %2948  ;;  %v2940_v27 = vpop.xlane.xlu0 %2939 }
 0xf02   : > { %5739 = vpow2.f32 %v2958_v25  ;;  %v2953_v28 = vsub.f32 %v2937_v17, %v2949_v26  ;;  %v2950_v30 = vsub.f32 %v2934_v11, %v2940_v27  ;;  %v5659_v11 = vld [vmem:[%s6953_s4 + $0xb8] sm:$0xff]  }
 0xf04   : > { %v2960_v31 = vmul.f32 1.442695, %v2953_v28  ;;  %v2954_v29 = vmul.f32 1.442695, %v2950_v30 }
 0xf05   : > { %v2943_v32 = vpop.xlane.xlu1 %2942 }
 0xf06   : > { %5741 = vpow2.f32 %v2960_v31  ;;  %v2951_v33 = vsub.f32 %v2935_v21, %v2943_v32 }
 0xf07   : > { %5743 = vpow2.f32 %v2954_v29 }
 0xf08   : > { %v2956_v34 = vmul.f32 1.442695, %v2951_v33 }
 0xf0a   : > { %5745 = vpow2.f32 %v2956_v34 }
 0xf0f   : > { %v5740_v47 = vpop.eup %5739 }
 0xf10   : > { %v2968_v51 = vsel %vm986_vm2, %v5740_v47, 0.0 }
 0xf11   : > { %2969 = vadd.xlane.f32.xlu0 %v2968_v51 }
 0xf13   : > { %v5742_v45 = vpop.eup %5741 }
 0xf14   : > { %v5744_v48 = vpop.eup %5743  ;;  %v2971_v61 = vsel %vm986_vm2, %v5742_v45, 0.0 }
 0xf15   : > { %v2962_v0 = vsel %vm986_vm2, %v5744_v48, 0.0  ;;  %2972 = vadd.xlane.f32.xlu1 %v2971_v61  ;;  %v4915_v61 = vld [vmem:[%s6911_s5 + $0x7] ss:$0 sm:$0xff] }
 0xf16   : > { %2963 = vadd.xlane.f32.xlu0 %v2962_v0 }
 0xf17   : > { %v5746_v35 = vpop.eup %5745 }
 0xf18   : > { %v2965_v36 = vsel %vm986_vm2, %v5746_v35, 0.0 }
 0xf19   : > { %2966 = vadd.xlane.f32.xlu1 %v2965_v36 }
 0xf9a   : > { %v2970_v42 = vpop.xlane.xlu0 %2969 }
 0xf9b   : > { %5747 = vrcp.f32 %v2970_v42  ;;  %v4935_v42 = vld [vmem:[%s6911_s5 + $0xb] ss:$0 sm:$0xff] }
 0xf9e   : > { %v2973_v43 = vpop.xlane.xlu1 %2972 }
 0xf9f   : > { %v2964_v44 = vpop.xlane.xlu0 %2963  ;;  %5749 = vrcp.f32 %v2973_v43 }
 0xfa0   : > { %5751 = vrcp.f32 %v2964_v44 }
 0xfa2   : > { %v2967_v46 = vpop.xlane.xlu1 %2966 }
 0xfa3   : > { %5753 = vrcp.f32 %v2967_v46 }
 0xfa8   : > { %v5748_v49 = vpop.eup %5747 }
 0xfa9   : > { %v2979_v50 = vmul.f32 %v5748_v49, %v5740_v47 }
 0xfab   : > { %v5065_v52 = vpack.c.bf16 %v2979_v50, %v2979_v50 }
 0xfac   : > { %v5750_v53 = vpop.eup %5749 }
 0xfad   : > { %v5752_v54 = vpop.eup %5751  ;;  %v2981_v55 = vmul.f32 %v5750_v53, %v5742_v45  ;;  %4904 = vst.msk [vmem:[%s6146_s29 + $0x30] sm:$0xf] %vm1149_vm3, %v5065_v52 }
 0xfae   : > { %v2975_v57 = vmul.f32 %v5752_v54, %v5744_v48 }
 0xfaf   : > { %v2983_v59 = vpack.c.bf16 %v2981_v55, %v2979_v50  ;;  %v5066_v41 = vpack.c.bf16 %v2981_v55, %v2981_v55 }
 0xfb0   : > { %v5754_v62 = vpop.eup %5753  ;;  %v5063_v3 = vpack.c.bf16 %v2975_v57, %v2975_v57 }
 0xfb1   : > { %4905 = vst.msk [vmem:[%s6146_s29 + $0x34] sm:$0xf] %vm1149_vm3, %v5066_v41  ;;  %5442 = vmatmul.mubr.msk.bf16.vlgmr.msra.gmra.mxu1 %vm986_vm2, %v2983_v59  ;;  %v2977_v5 = vmul.f32 %v5754_v62, %v5746_v35 }
 0xfb2   : > { %5454 = vmatpush3.bf16.msra.mxu1 %v5655_v37  ;;  %5457 = vmatprep.mubr.msk.bf16.mxu1 %vm678_vm0, %v6472_v16  ;;  %4902 = vst.msk [vmem:[%s6146_s29 + $0x10] sm:$0xf] %vm1149_vm3, %v5063_v3 }
 0xfb3   : > { %v2982_v6 = vpack.c.bf16 %v2977_v5, %v2975_v57  ;;  %v5064_v7 = vpack.c.bf16 %v2977_v5, %v2977_v5  ;;  %5455 = vmatprep.subr.bf16.mxu1 %v5657_v60 }
 0xfb5   : > { %4903 = vst.msk [vmem:[%s6146_s29 + $0x14] sm:$0xf] %vm1149_vm3, %v5064_v7  ;;  %5436 = vmatmul.mubr.msk.bf16.vlgmr.msra.gmra.mxu0 %vm986_vm2, %v2982_v6 }
 0xfb6   : > { %5446 = vmatpush3.bf16.msra.mxu0 %v5656_v39  ;;  %5449 = vmatprep.mubr.msk.bf16.mxu0 %vm678_vm0, %v6472_v16 }
 0xfb7   : > { %5456 = vmatpush3.bf16.msra.mxu1 %v5657_v60  ;;  %5447 = vmatprep.subr.bf16.mxu0 %v5658_v8 }
 0xfb8   : > { %5469 = vmatprep.subr.bf16.mxu1 %v5871_v2 }
 0xfba   : > { %5458 = vmatmul.mubr.msk.bf16.vlgmr.msra.gmra.mxu1 %vm678_vm0, %v6478_v38  ;;  %5448 = vmatpush3.bf16.msra.mxu0 %v5658_v8 }
 0xfbb   : > { %5461 = vmatprep.subr.bf16.mxu0 %v5659_v11  ;;  %5471 = vmatprep.mubr.msk.bf16.mxu1 %vm5872_vm1, %v5871_v2 }
 0xfbd   : > { %5450 = vmatmul.mubr.msk.bf16.vlgmr.msra.gmra.mxu0 %vm678_vm0, %v6478_v38 }
 0xfbe   : > { %5462 = vmatpush3.bf16.msra.mxu0 %v5659_v11  ;;  %5465 = vmatprep.mubr.msk.bf16.mxu0 %vm678_vm0, %v6472_v16 }
 0xfbf   : > { %5463 = vmatprep.subr.bf16.mxu0 %v5660_v13 }
 0xfc2   : > { %5464 = vmatpush3.bf16.msra.mxu0 %v5660_v13 }
 0xfc3   : > { %5475 = vmatprep.subr.bf16.mxu0 %v5871_v2 }
 0xfc5   : > { %5466 = vmatmul.mubr.msk.bf16.vlgmr.msra.gmra.mxu0 %vm678_vm0, %v6478_v38 }
 0xfc6   : > { %5477 = vmatprep.mubr.msk.bf16.mxu0 %vm5872_vm1, %v5871_v2 }
0x1071   : > { %v6579_v14 = vpop.f32.mrf.mxu1 }
0x1073   : > { %v5443_v58 = vpop.f32.mrf.mxu1 }
0x1075   : > { %v6581_v17 = vpop.f32.mrf.mxu0  ;;  %v6583_v1 = vpop.f32.mrf.mxu1 }
0x1076   : > { %v3092_v16 = vpack.c.bf16 %v6583_v1, %v6579_v14 }
0x1077   : > { %v5437_v18 = vpop.f32.mrf.mxu0  ;;  %v5444_v20 = vpop.f32.mrf.mxu1 }
0x1079   : > { %v6587_v21 = vpop.f32.mrf.mxu0 }
0x107a   : > { %v3091_v38 = vpack.c.bf16 %v6587_v21, %v6581_v17  ;;  %v5459_v22 = vpop.f32.mrf.mxu1 }
0x107b   : > { %v5438_v23 = vpop.f32.mrf.mxu0  ;;  %v3238_v28 = vadd.f32 %v5459_v22, %v4925_v24 }
0x107c   : > { %v3229_v25 = vpop.f32.mrf.mxu1 }
0x107d   : > { %v5451_v26 = vpop.f32.mrf.mxu0  ;;  %v3230_v32 = vadd.f32 %v4925_v24, %v3229_v25 }
0x107e   : > { %v5460_v27 = vpop.f32.mrf.mxu1  ;;  %v3164_v37 = vadd.f32 %v5451_v26, %v4915_v61 }
0x107f   : > { %v3241_v30 = vadd.f32 %v5460_v27, %v4925_v24  ;;  %v3155_v31 = vpop.f32.mrf.mxu0 }
0x1080   : > { %v3232_v29 = vpop.f32.mrf.mxu1  ;;  %v3156_v44 = vadd.f32 %v4915_v61, %v3155_v31 }
0x1081   : > { %v3321_v33 = vpack.c.bf16 %v3241_v30, %v3238_v28  ;;  %v3233_v34 = vadd.f32 %v4925_v24, %v3232_v29  ;;  %v5452_v47 = vpop.f32.mrf.mxu0 }
0x1082   : > { %v3167_v0 = vadd.f32 %v5452_v47, %v4915_v61 }
0x1083   : > { %v3320_v51 = vpack.c.bf16 %v3233_v34, %v3230_v32  ;;  %v3158_v45 = vpop.f32.mrf.mxu0  ;;  %v3375_v48 = vsel %vm986_vm2, %v3321_v33, 0 }
0x1084   : > { %5476 = vmatpush3.bf16.xpose.msra.mxu0 %v3375_v48  ;;  %v3159_v39 = vadd.f32 %v4915_v61, %v3158_v45  ;;  %v3319_v46 = vpack.c.bf16 %v3167_v0, %v3164_v37 }
0x1085   : > { %v5467_v35 = vpop.f32.mrf.mxu0  ;;  %v3328_v36 = vsel %vm986_vm2, %v3320_v51, 0  ;;  %5487 = vmatprep.subr.bf16.mxu0 %v5871_v2 }
0x1086   : > { %5470 = vmatpush3.bf16.xpose.msra.mxu1 %v3328_v36  ;;  %v3312_v50 = vadd.f32 %v5467_v35, %v4935_v42  ;;  %v3318_v53 = vpack.c.bf16 %v3159_v39, %v3156_v44  ;;  %v5661_v44 = vld [vmem:[%s6912_s6 + $0x10] sm:$0xff]  }
0x1087   : > { %v3303_v43 = vpop.f32.mrf.mxu0  ;;  %5481 = vmatprep.subr.bf16.mxu1 %v5871_v2 }
0x1088   : > { %v3304_v55 = vadd.f32 %v4935_v42, %v3303_v43 }
0x1089   : > { %v5468_v49 = vpop.f32.mrf.mxu0 }
0x108a   : > { %v3315_v52 = vadd.f32 %v5468_v49, %v4935_v42 }
0x108b   : > { %5478 = vmatmul.mubr.msk.bf16.vlgmr.msra.gmra.mxu0 %vm986_vm2, %v3319_v46  ;;  %v3306_v54 = vpop.f32.mrf.mxu0 }
0x108c   : > { %v3323_v57 = vpack.c.bf16 %v3315_v52, %v3312_v50  ;;  %v3307_v59 = vadd.f32 %v4935_v42, %v3306_v54  ;;  %5489 = vmatprep.mubr.msk.bf16.mxu0 %vm5872_vm1, %v5871_v2 }
0x108d   : > { %5472 = vmatmul.mubr.msk.bf16.vlgmr.msra.gmra.mxu1 %vm986_vm2, %v3318_v53 }
0x108e   : > { %v3322_v41 = vpack.c.bf16 %v3307_v59, %v3304_v55  ;;  %5488 = vmatpush3.bf16.msra.mxu0 %v3323_v57  ;;  %5483 = vmatprep.mubr.msk.bf16.mxu1 %vm5872_vm1, %v5871_v2 }
0x108f   : > { %5499 = vmatprep.subr.bf16.mxu0 %v5661_v44 }
0x1090   : > { %5482 = vmatpush3.bf16.msra.mxu1 %v3322_v41 }
0x114b   : > { %v3411_v60 = vpop.f32.mrf.mxu0 }
0x114c   : > { %v3420_v5 = vmul.f32 0.25, %v3411_v60 }
0x114d   : > { %v3364_v62 = vpop.f32.mrf.mxu1  ;;  %v5479_v3 = vpop.f32.mrf.mxu0 }
0x114e   : > { %v3418_v6 = vmul.f32 0.25, %v3364_v62  ;;  %v3424_v23 = vadd.f32 %v6516_v63, %v3420_v5 }
0x114f   : > { %v5473_v7 = vpop.f32.mrf.mxu1  ;;  %v3414_v8 = vpop.f32.mrf.mxu0 }
0x1150   : > { %v3422_v11 = vadd.f32 %v6521_v9, %v3418_v6  ;;  %v3421_v18 = vmul.f32 0.25, %v3414_v8  ;;  %v3432_v25 = vsel %vm986_vm2, %v3424_v23, -inf }
0x1151   : > { %v3367_v13 = vpop.f32.mrf.mxu1  ;;  %v5480_v58 = vpop.f32.mrf.mxu0 }
0x1152   : > { %v3419_v20 = vmul.f32 0.25, %v3367_v13  ;;  %v3426_v22 = vsel %vm986_vm2, %v3422_v11, -inf  ;;  %v3425_v27 = vadd.f32 %v6516_v63, %v3421_v18  ;;  %v5662_v13 = vld [vmem:[%s6912_s6 + $0x18] sm:$0xff]  }
0x1153   : > { %3427 = vmax.xlane.f32.xlu0 %v3426_v22  ;;  %v5474_v2 = vpop.f32.mrf.mxu1  ;;  %5493 = vmatprep.subr.bf16.mxu1 %v5662_v13 }
0x1154   : > { %v3423_v24 = vadd.f32 %v6521_v9, %v3419_v20  ;;  %v3435_v28 = vsel %vm986_vm2, %v3425_v27, -inf }
0x1156   : > { %v3429_v26 = vsel %vm986_vm2, %v3423_v24, -inf }
0x1157   : > { %3433 = vmax.xlane.f32.xlu0 %v3432_v25  ;;  %3430 = vmax.xlane.f32.xlu1 %v3429_v26 }
0x115b   : > { %3436 = vmax.xlane.f32.xlu1 %v3435_v28 }
0x11dc   : > { %v3428_v30 = vpop.xlane.xlu0 %3427 }
0x11dd   : > { %v3438_v31 = vsub.f32 %v3422_v11, %v3428_v30 }
0x11df   : > { %v3442_v29 = vmul.f32 1.442695, %v3438_v31 }
0x11e0   : > { %v3434_v32 = vpop.xlane.xlu0 %3433  ;;  %v3431_v33 = vpop.xlane.xlu1 %3430 }
0x11e1   : > { %5755 = vpow2.f32 %v3442_v29  ;;  %v3440_v34 = vsub.f32 %v3424_v23, %v3434_v32  ;;  %v3439_v47 = vsub.f32 %v3423_v24, %v3431_v33 }
0x11e3   : > { %v3446_v9 = vmul.f32 1.442695, %v3440_v34  ;;  %v3444_v51 = vmul.f32 1.442695, %v3439_v47  ;;  %v4961_v34 = vld [vmem:[%s6913_s7 + $0x1] ss:$0 sm:$0xff] }
0x11e4   : > { %v3437_v45 = vpop.xlane.xlu1 %3436 }
0x11e5   : > { %5757 = vpow2.f32 %v3446_v9  ;;  %v3441_v48 = vsub.f32 %v3425_v27, %v3437_v45 }
0x11e6   : > { %5759 = vpow2.f32 %v3444_v51 }
0x11e7   : > { %v3448_v63 = vmul.f32 1.442695, %v3441_v48 }
0x11e9   : > { %5761 = vpow2.f32 %v3448_v63 }
0x11ee   : > { %v5756_v61 = vpop.eup %5755 }
0x11ef   : > { %v3450_v0 = vsel %vm986_vm2, %v5756_v61, 0.0 }
0x11f0   : > { %3451 = vadd.xlane.f32.xlu0 %v3450_v0 }
0x11f2   : > { %v5758_v35 = vpop.eup %5757 }
0x11f3   : > { %v5760_v36 = vpop.eup %5759  ;;  %v3456_v37 = vsel %vm986_vm2, %v5758_v35, 0.0 }
0x11f4   : > { %3457 = vadd.xlane.f32.xlu0 %v3456_v37  ;;  %v3453_v39 = vsel %vm986_vm2, %v5760_v36, 0.0 }
0x11f5   : > { %3454 = vadd.xlane.f32.xlu1 %v3453_v39 }
0x11f6   : > { %v5762_v42 = vpop.eup %5761 }
0x11f7   : > { %v3459_v43 = vsel %vm986_vm2, %v5762_v42, 0.0 }
0x11f9   : > { %3460 = vadd.xlane.f32.xlu1 %v3459_v43 }
0x1279   : > { %v3452_v46 = vpop.xlane.xlu0 %3451 }
0x127a   : > { %5763 = vrcp.f32 %v3452_v46 }
0x127d   : > { %v3458_v49 = vpop.xlane.xlu0 %3457 }
0x127e   : > { %5765 = vrcp.f32 %v3458_v49  ;;  %v3455_v50 = vpop.xlane.xlu1 %3454 }
0x127f   : > { %5767 = vrcp.f32 %v3455_v50 }
0x1282   : > { %v3461_v52 = vpop.xlane.xlu1 %3460 }
0x1283   : > { %5769 = vrcp.f32 %v3461_v52 }
0x1287   : > { %v5764_v53 = vpop.eup %5763 }
0x1288   : > { %v3463_v54 = vmul.f32 %v5764_v53, %v5756_v61 }
0x128a   : > { %v5067_v55 = vpack.c.bf16 %v3463_v54, %v3463_v54 }
0x128b   : > { %v5766_v57 = vpop.eup %5765 }
0x128c   : > { %v5768_v59 = vpop.eup %5767  ;;  %4946 = vst.msk [vmem:[%s6146_s29 + $0x18] sm:$0xf] %vm1149_vm3, %v5067_v55  ;;  %v3467_v41 = vmul.f32 %v5766_v57, %v5758_v35 }
0x128d   : > { %v3465_v60 = vmul.f32 %v5768_v59, %v5760_v36 }
0x128e   : > { %v5069_v62 = vpack.c.bf16 %v3467_v41, %v3467_v41 }
0x128f   : > { %v3470_v3 = vpack.c.bf16 %v3465_v60, %v3463_v54  ;;  %v5068_v5 = vpack.c.bf16 %v3465_v60, %v3465_v60 }
0x1290   : > { %v5770_v6 = vpop.eup %5769  ;;  %4948 = vst.msk [vmem:[%s6146_s29 + $0x38] sm:$0xf] %vm1149_vm3, %v5069_v62 }
0x1291   : > { %4947 = vst.msk [vmem:[%s6146_s29 + $0x1c] sm:$0xf] %vm1149_vm3, %v5068_v5  ;;  %5484 = vmatmul.mubr.msk.bf16.vlgmr.msra.gmra.mxu1 %vm986_vm2, %v3470_v3  ;;  %v3469_v7 = vmul.f32 %v5770_v6, %v5762_v42  ;;  %v5663_v5 = vld [vmem:[%s6916_s10 + $0x48] sm:$0xff]   ;;  %v5664_v6 = vld [vmem:[%s6916_s10 + $0x40] sm:$0xff]  }
0x1292   : > { %5494 = vmatpush3.bf16.msra.mxu1 %v5662_v13 }
0x1293   : > { %v3471_v8 = vpack.c.bf16 %v3469_v7, %v3467_v41  ;;  %v5070_v11 = vpack.c.bf16 %v3469_v7, %v3469_v7  ;;  %5505 = vmatprep.subr.bf16.mxu1 %v5663_v5  ;;  %v5665_v7 = vld [vmem:[%s6916_s10 + $0x38] sm:$0xff]  }
0x1295   : > { %4949 = vst.msk [vmem:[%s6146_s29 + $0x3c] sm:$0xf] %vm1149_vm3, %v5070_v11  ;;  %5490 = vmatmul.mubr.msk.bf16.vlgmr.msra.gmra.mxu0 %vm986_vm2, %v3471_v8  ;;  %v5666_v8 = vld [vmem:[%s6916_s10 + $0x58] sm:$0xff]   ;;  %v5667_v11 = vld [vmem:[%s6916_s10 + $0x30] sm:$0xff]   ;;  %s5874_s29 = smov [#allocation2]  }
0x1296   : > { %5501 = vmatprep.mubr.msk.bf16.mxu0 %vm986_vm2, %v3091_v38  ;;  %5500 = vmatpush3.bf16.msra.mxu0 %v5661_v44  ;;  %s5813_s0 = sshll.u32 %s5874_s29, 4  ;;  %s5814_s0 = int_to_ptr.vmem [resolvable:$false] %s5813_s0 }
0x1297   : > { %5513 = vmatprep.subr.bf16.mxu0 %v5665_v7  ;;  %s5815_s2 = scalar_lea.vmem %s5814_s0, 2048  ;;  %p5816_p0 = scmp.lt.s32.totalorder %s6845_s24, %s5814_s0 }
0x1298   : > { %p5817_p1 = scmp.lt.s32.totalorder %s5815_s2, %s5809_s1 }
0x129a   : > { %p5818_p2 = por %p5817_p1, %p5816_p0 }
0x129c   : > { %p5819_p3 = pnand %p5818_p2, %p5812_p13 }
0x129d   : > { %5502 = vmatmul.mubr.msk.bf16.vlgmr.msra.gmra.mxu0 %vm986_vm2, %v3092_v16 }
0x129e   : > { %5514 = vmatpush3.bf16.msra.mxu0 %v5665_v7 }
0x129f   : > { %5515 = vmatprep.subr.bf16.mxu0 %v5667_v11 }
0x12a2   : > { %5516 = vmatpush3.bf16.msra.mxu0 %v5667_v11 }
0x1351   : > { %v3528_v58 = vpop.f32.mrf.mxu1 }
0x1353   : > { %v5485_v18 = vpop.f32.mrf.mxu1 }
0x1355   : > { %v3531_v20 = vpop.f32.mrf.mxu1  ;;  %v3572_v22 = vpop.f32.mrf.mxu0 }
0x1356   : > { %v3579_v23 = vpack.c.bf16 %v3531_v20, %v3528_v58 }
0x1357   : > { %v5486_v17 = vpop.f32.mrf.mxu1  ;;  %v5491_v21 = vpop.f32.mrf.mxu0 }
0x1358   : > { %5495 = vmatprep.mubr.msk.bf16.mxu1 %vm986_vm2, %v3579_v23 }
0x1359   : > { %v3575_v38 = vpop.f32.mrf.mxu0 }
0x135a   : > { %v3580_v2 = vpack.c.bf16 %v3575_v38, %v3572_v22 }
0x135b   : > { %v5492_v14 = vpop.f32.mrf.mxu0 }
0x135c   : > { %5496 = vmatmul.mubr.msk.bf16.vlgmr.msra.gmra.mxu1 %vm986_vm2, %v3580_v2 }
0x135d   : > { %v5503_v1 = vpop.f32.mrf.mxu0  ;;  %5506 = vmatpush3.bf16.msra.mxu1 %v5663_v5 }
0x135e   : > { %5507 = vmatprep.subr.bf16.mxu1 %v5664_v6 }
0x135f   : > { %v3691_v16 = vpop.f32.mrf.mxu0 }
0x1361   : > { %v5504_v26 = vpop.f32.mrf.mxu0  ;;  %5508 = vmatpush3.bf16.msra.mxu1 %v5664_v6 }
0x1362   : > { %5521 = vmatprep.subr.bf16.mxu1 %v5666_v8 }
0x1363   : > { %v3694_v33 = vpop.f32.mrf.mxu0 }
0x141c   : > { %v5497_v24 = vpop.f32.mrf.mxu1 }
0x141d   : > { %v3700_v25 = vadd.f32 %v5503_v1, %v5497_v24 }
0x141e   : > { %v3630_v27 = vpop.f32.mrf.mxu1 }
0x141f   : > { %v3692_v28 = vadd.f32 %v3691_v16, %v3630_v27  ;;  %v3708_v31 = vadd.f32 %v3700_v25, %v6426_v12  ;;  %v4964_v25 = vld [vmem:[%s6914_s8 + $0x1] ss:$0 sm:$0xff] }
0x1420   : > { %v5498_v30 = vpop.f32.mrf.mxu1 }
0x1421   : > { %v3706_v29 = vadd.f32 %v3692_v28, %v6424_v10  ;;  %v3703_v32 = vadd.f32 %v5504_v26, %v5498_v30  ;;  %v6655_v45 = vadd.f32 %v4961_v34, %v3708_v31 }
0x1422   : > { %v3633_v47 = vpop.f32.mrf.mxu1 }
0x1423   : > { %v6653_v9 = vadd.f32 %v4961_v34, %v3706_v29  ;;  %v3695_v51 = vadd.f32 %v3694_v33, %v3633_v47  ;;  %v3709_v48 = vadd.f32 %v3703_v32, %v6434_v15  ;;  %v3732_v0 = vsel %vm678_vm0, %v6655_v45, 0.0  ;;  %v4965_v32 = vld [vmem:[%s6915_s9 + $0x1] ss:$0 sm:$0xff] }
0x1425   : > { %v3707_v63 = vadd.f32 %v3695_v51, %v6432_v56  ;;  %v3726_v12 = vsel %vm678_vm0, %v6653_v9, 0.0  ;;  %v6663_v61 = vadd.f32 %v4961_v34, %v3709_v48 }
0x1426   : > { %3727 = vadd.xlane.f32.xlu0 %v3726_v12 }
0x1427   : > { %v6661_v10 = vadd.f32 %v4961_v34, %v3707_v63  ;;  %v3735_v15 = vsel %vm678_vm0, %v6663_v61, 0.0 }
0x1429   : > { %v3729_v35 = vsel %vm678_vm0, %v6661_v10, 0.0 }
0x142a   : > { %3733 = vadd.xlane.f32.xlu0 %v3732_v0  ;;  %3730 = vadd.xlane.f32.xlu1 %v3729_v35 }
0x142e   : > { %3736 = vadd.xlane.f32.xlu1 %v3735_v15 }
0x14af   : > { %v3728_v56 = vpop.xlane.xlu0 %3727 }
0x14b0   : > { %v3738_v36 = vmul.f32 0.03125, %v3728_v56 }
0x14b2   : > { %v3742_v37 = vsub.f32 %v6653_v9, %v3738_v36 }
0x14b3   : > { %v3734_v39 = vpop.xlane.xlu0 %3733  ;;  %v3731_v42 = vpop.xlane.xlu1 %3730 }
0x14b4   : > { %v3740_v43 = vmul.f32 0.03125, %v3734_v39  ;;  %v3739_v44 = vmul.f32 0.03125, %v3731_v42  ;;  %v3746_v46 = vmul.f32 %v3742_v37, %v3742_v37 }
0x14b6   : > { %v3744_v49 = vsub.f32 %v6655_v45, %v3740_v43  ;;  %v3743_v50 = vsub.f32 %v6661_v10, %v3739_v44  ;;  %v3750_v52 = vsel %vm678_vm0, %v3746_v46, 0.0  ;;  %v5668_v46 = vld [vmem:[%s6916_s10 + $0x50] sm:$0xff]  }
0x14b7   : > { %3751 = vadd.xlane.f32.xlu0 %v3750_v52  ;;  %v3737_v53 = vpop.xlane.xlu1 %3736 }
0x14b8   : > { %v3741_v54 = vmul.f32 0.03125, %v3737_v53  ;;  %v3748_v55 = vmul.f32 %v3744_v49, %v3744_v49  ;;  %v3747_v57 = vmul.f32 %v3743_v50, %v3743_v50 }
0x14ba   : > { %v3745_v59 = vsub.f32 %v6663_v61, %v3741_v54  ;;  %v3756_v41 = vsel %vm678_vm0, %v3748_v55, 0.0  ;;  %v3753_v60 = vsel %vm678_vm0, %v3747_v57, 0.0 }
0x14bb   : > { %3757 = vadd.xlane.f32.xlu0 %v3756_v41  ;;  %3754 = vadd.xlane.f32.xlu1 %v3753_v60 }
0x14bc   : > { %v3749_v62 = vmul.f32 %v3745_v59, %v3745_v59 }
0x14be   : > { %v3759_v3 = vsel %vm678_vm0, %v3749_v62, 0.0 }
0x14bf   : > { %3760 = vadd.xlane.f32.xlu1 %v3759_v3 }
0x1540   : > { %v3752_v13 = vpop.xlane.xlu0 %3751 }
0x1541   : > { %v3762_v58 = vmul.f32 0.03125, %v3752_v13  ;;  %v5669_v13 = vld [vmem:[%s6918_s12 + $0x98] sm:$0xff]  }
0x1542   : > { %5529 = vmatprep.subr.bf16.mxu0 %v5669_v13 }
0x1543   : > { %v3766_v18 = vadd.f32 1e-05, %v3762_v58  ;;  %v5670_v58 = vld [vmem:[%s6918_s12 + $0x90] sm:$0xff]  }
0x1544   : > { %v3758_v20 = vpop.xlane.xlu0 %3757  ;;  %v3755_v22 = vpop.xlane.xlu1 %3754 }
0x1545   : > { %5771 = vrsqrt.f32 %v3766_v18  ;;  %v3764_v23 = vmul.f32 0.03125, %v3758_v20  ;;  %v3763_v17 = vmul.f32 0.03125, %v3755_v22  ;;  %v5671_v18 = vld [vmem:[%s6918_s12 + $0x78] sm:$0xff]   ;;  %v5672_v20 = vld [vmem:[%s6918_s12 + $0x88] sm:$0xff]   ;;  %v5673_v22 = vld [vmem:[%s6918_s12 + $0x70] sm:$0xff]  }
0x1547   : > { %v3768_v21 = vadd.f32 1e-05, %v3764_v23  ;;  %v3767_v38 = vadd.f32 1e-05, %v3763_v17  ;;  %v5674_v23 = vld [vmem:[%s6918_s12 + $0x80] sm:$0xff]   ;;  %v5675_v17 = vld [vmem:[%s6918_s12 + $0x68] sm:$0xff]  }
0x1548   : > { %v3761_v2 = vpop.xlane.xlu1 %3760 }
0x1549   : > { %5773 = vrsqrt.f32 %v3768_v21  ;;  %v3765_v14 = vmul.f32 0.03125, %v3761_v2  ;;  %v5676_v21 = vld [vmem:[%s6918_s12 + $0xb8] sm:$0xff]  }
0x154a   : > { %5775 = vrsqrt.f32 %v3767_v38  ;;  %v5677_v38 = vld [vmem:[%s6918_s12 + $0x60] sm:$0xff]  }
0x154b   : > { %v3769_v1 = vadd.f32 1e-05, %v3765_v14 }
0x154d   : > { %5777 = vrsqrt.f32 %v3769_v1 }
0x1552   : > { %v5772_v16 = vpop.eup %5771 }
0x1553   : > { %v3774_v24 = vmul.f32 %v5772_v16, %v3742_v37 }
0x1555   : > { %v3784_v31 = vmul.f32 %v4964_v25, %v3774_v24 }
0x1556   : > { %v5774_v26 = vpop.eup %5773 }
0x1557   : > { %v5776_v27 = vpop.eup %5775  ;;  %v3776_v28 = vmul.f32 %v5774_v26, %v3744_v49  ;;  %v3794_v48 = vadd.f32 %v4965_v32, %v3784_v31  ;;  %v4991_v31 = vld [vmem:[%s6917_s11 + $0x1] ss:$0 sm:$0xff] }
0x1558   : > { %v3775_v30 = vmul.f32 %v5776_v27, %v3743_v50 }
0x1559   : > { %v3786_v29 = vmul.f32 %v4964_v25, %v3776_v28  ;;  %v3958_v39 = vrot.slane %v3794_v48, 1  ;;  %v3798_v49 = vrot.slane %v3794_v48, 7 }
0x155a   : > { %v5778_v33 = vpop.eup %5777  ;;  %v3785_v34 = vmul.f32 %v4964_v25, %v3775_v30 }
0x155b   : > { %v3777_v47 = vmul.f32 %v5778_v33, %v3745_v59  ;;  %v3796_v51 = vadd.f32 %v4965_v32, %v3786_v29 }
0x155c   : > { %v3795_v63 = vadd.f32 %v4965_v32, %v3785_v34 }
0x155d   : > { %v3787_v12 = vmul.f32 %v4964_v25, %v3777_v47  ;;  %v3960_v0 = vrot.slane %v3796_v51, 1  ;;  %v3800_v36 = vrot.slane %v3796_v51, 7 }
0x155e   : > { %v3817_v35 = vpack.c.bf16 %v3795_v63, %v3794_v48  ;;  %v3959_v15 = vrot.slane %v3795_v63, 1  ;;  %v3799_v56 = vrot.slane %v3795_v63, 7 }
0x155f   : > { %v3797_v37 = vadd.f32 %v4965_v32, %v3787_v12 }
0x1560   : > { %5509 = vmatprep.mubr.msk.bf16.mxu1 %vm678_vm0, %v3817_v35  ;;  %v3963_v42 = vsel %vm2109_vm5, %v3959_v15, %v3960_v0  ;;  %v3964_v52 = vsel %vm2109_vm5, %v3958_v39, %v3959_v15  ;;  %v3803_v53 = vsel %vm1949_vm6, %v3799_v56, %v3800_v36  ;;  %v3804_v62 = vsel %vm1949_vm6, %v3798_v49, %v3799_v56 }
0x1561   : > { %v3818_v43 = vpack.c.bf16 %v3797_v37, %v3796_v51  ;;  %v3967_v44 = vmul.f32 %v6316_v4, %v3963_v42  ;;  %v3801_v50 = vrot.slane %v3797_v37, 7  ;;  %v3961_v54 = vrot.slane %v3797_v37, 1 }
0x1562   : > { %v3808_v3 = vmul.f32 %v6331_v19, %v3803_v53 }
0x1563   : > { %5510 = vmatmul.mubr.msk.bf16.vlgmr.msra.gmra.mxu1 %vm678_vm0, %v3818_v43  ;;  %v3970_v55 = vpack.c.bf16 %v3967_v44, %v3964_v52  ;;  %v3805_v57 = vsel %vm1949_vm6, %v3801_v50, %v3798_v49  ;;  %v3802_v41 = vsel %vm1949_vm6, %v3800_v36, %v3801_v50  ;;  %v3965_v60 = vsel %vm2109_vm5, %v3961_v54, %v3958_v39 }
0x1564   : > { %5522 = vmatpush3.bf16.msra.mxu1 %v5666_v8  ;;  %v3806_v59 = vmul.f32 %v6331_v19, %v3805_v57  ;;  %v3969_v5 = vmul.f32 %v6316_v4, %v3965_v60  ;;  %v3811_v7 = vpack.c.bf16 %v3802_v41, %v3808_v3  ;;  %v3962_v8 = vsel %vm2109_vm5, %v3960_v0, %v3961_v54  ;;  %v5678_v41 = vld [vmem:[%s6918_s12 + $0xb0] sm:$0xff]  }
0x1565   : > { %5525 = vmatprep.mubr.msk.bf16.mxu1 %vm678_vm0, %v3970_v55  ;;  %5523 = vmatprep.subr.bf16.mxu1 %v5668_v46 }
0x1566   : > { %v3810_v6 = vpack.c.bf16 %v3804_v62, %v3806_v59  ;;  %v3971_v11 = vpack.c.bf16 %v3969_v5, %v3962_v8 }
0x1568   : > { %5517 = vmatprep.mubr.msk.bf16.mxu0 %vm678_vm0, %v3810_v6  ;;  %5524 = vmatpush3.bf16.msra.mxu1 %v5668_v46 }
0x1569   : > { %5518 = vmatmul.mubr.msk.bf16.vlgmr.msra.gmra.mxu0 %vm678_vm0, %v3811_v7  ;;  %5541 = vmatprep.subr.bf16.mxu1 %v5671_v18 }
0x156a   : > { %5530 = vmatpush3.bf16.msra.mxu0 %v5669_v13 }
0x156b   : > { %5526 = vmatmul.mubr.msk.bf16.vlgmr.msra.gmra.mxu1 %vm678_vm0, %v3971_v11  ;;  %5531 = vmatprep.subr.bf16.mxu0 %v5670_v58 }
0x156c   : > { %5542 = vmatpush3.bf16.msra.mxu1 %v5671_v18 }
0x156d   : > { %5543 = vmatprep.subr.bf16.mxu1 %v5673_v22 }
0x156e   : > { %5532 = vmatpush3.bf16.msra.mxu0 %v5670_v58 }
0x156f   : > { %5533 = vmatprep.subr.bf16.mxu0 %v5672_v20 }
0x1570   : > { %5544 = vmatpush3.bf16.msra.mxu1 %v5673_v22  ;;  %v5680_v22 = vld [vmem:[%s6918_s12 + $0xa0] sm:$0xff]  }
0x1571   : > { %5545 = vmatprep.subr.bf16.mxu1 %v5675_v17 }
0x1572   : > { %5534 = vmatpush3.bf16.msra.mxu0 %v5672_v20 }
0x1573   : > { %5535 = vmatprep.subr.bf16.mxu0 %v5674_v23 }
0x1574   : > { %5546 = vmatpush3.bf16.msra.mxu1 %v5675_v17 }
0x1575   : > { %5547 = vmatprep.subr.bf16.mxu1 %v5677_v38 }
0x1576   : > { %5536 = vmatpush3.bf16.msra.mxu0 %v5674_v23 }
0x1577   : > { %5553 = vmatprep.subr.bf16.mxu0 %v5676_v21 }
0x1578   : > { %5548 = vmatpush3.bf16.msra.mxu1 %v5677_v38 }
0x1623   : > { %v5511_v2 = vpop.f32.mrf.mxu1 }
0x1625   : > { %v3876_v14 = vpop.f32.mrf.mxu1 }
0x1627   : > { %v5512_v1 = vpop.f32.mrf.mxu1 }
0x1629   : > { %v3879_v16 = vpop.f32.mrf.mxu1  ;;  %v5519_v24 = vpop.f32.mrf.mxu0 }
0x162a   : > { %v3952_v25 = vadd.f32 %v5519_v24, %v5511_v2 }
0x162b   : > { %v3943_v26 = vpop.f32.mrf.mxu0  ;;  %v5527_v27 = vpop.f32.mrf.mxu1 }
0x162c   : > { %v3944_v28 = vadd.f32 %v3943_v26, %v3876_v14  ;;  %v4046_v30 = vadd.f32 %v5527_v27, %v3952_v25 }
0x162d   : > { %v5520_v29 = vpop.f32.mrf.mxu0  ;;  %v4029_v32 = vpop.f32.mrf.mxu1 }
0x162e   : > { %v3955_v33 = vadd.f32 %v5520_v29, %v5512_v1  ;;  %v4044_v34 = vadd.f32 %v4029_v32, %v3944_v28  ;;  %v4058_v48 = vadd.f32 %v4991_v31, %v4046_v30 }
0x162f   : > { %v3946_v47 = vpop.f32.mrf.mxu0  ;;  %v5528_v51 = vpop.f32.mrf.mxu1 }
0x1630   : > { %v4056_v63 = vadd.f32 %v4991_v31, %v4044_v34  ;;  %v3947_v12 = vadd.f32 %v3946_v47, %v3879_v16  ;;  %v4047_v0 = vadd.f32 %v5528_v51, %v3955_v33  ;;  %v4062_v37 = vmax.f32 %v4058_v48, 0.0 }
0x1631   : > { %v4032_v35 = vpop.f32.mrf.mxu1 }
0x1632   : > { %v4060_v15 = vmax.f32 %v4056_v63, 0.0  ;;  %v4059_v56 = vadd.f32 %v4991_v31, %v4047_v0  ;;  %v4045_v36 = vadd.f32 %v4032_v35, %v3947_v12  ;;  %v4066_v49 = vrot.slane %v4062_v37, 7  ;;  %v5035_v12 = vld [vmem:[%s6919_s13 + $0x1] ss:$0 sm:$0xff] }
0x1633   : > { %v4258_v52 = vrot.slane %v4062_v37, 1 }
0x1634   : > { %v4063_v39 = vmax.f32 %v4059_v56, 0.0  ;;  %v4057_v42 = vadd.f32 %v4991_v31, %v4045_v36  ;;  %v4064_v43 = vrot.slane %v4060_v15, 7  ;;  %v4256_v60 = vrot.slane %v4060_v15, 1 }
0x1636   : > { %v4067_v44 = vrot.slane %v4063_v39, 7  ;;  %v4061_v46 = vmax.f32 %v4057_v42, 0.0  ;;  %v4088_v57 = vpack.c.bf16 %v4063_v39, %v4062_v37  ;;  %v4259_v20 = vrot.slane %v4063_v39, 1 }
0x1638   : > { %v4071_v50 = vsel %vm1949_vm6, %v4067_v44, %v4064_v43  ;;  %v4065_v53 = vrot.slane %v4061_v46, 7  ;;  %v4257_v54 = vrot.slane %v4061_v46, 1  ;;  %v4087_v55 = vpack.c.bf16 %v4061_v46, %v4060_v15 }
0x1639   : > { %v4072_v59 = vmul.f32 %v6331_v19, %v4071_v50  ;;  %v4068_v11 = vsel %vm1949_vm6, %v4066_v49, %v4067_v44  ;;  %v4263_v23 = vsel %vm2109_vm5, %v4259_v20, %v4256_v60 }
0x163a   : > { %v4069_v62 = vsel %vm1949_vm6, %v4065_v53, %v4066_v49  ;;  %5537 = vmatprep.mubr.msk.bf16.mxu0 %vm2268_vm8, %v4087_v55  ;;  %v4070_v3 = vsel %vm1949_vm6, %v4064_v43, %v4065_v53  ;;  %v4261_v5 = vsel %vm2109_vm5, %v4257_v54, %v4258_v52  ;;  %v4262_v13 = vsel %vm2109_vm5, %v4256_v60, %v4257_v54 }
0x163b   : > { %v4074_v6 = vmul.f32 %v6331_v19, %v4069_v62  ;;  %5538 = vmatmul.mubr.msk.bf16.vlgmr.msra.gmra.mxu0 %vm2268_vm8, %v4088_v57  ;;  %v4076_v7 = vpack.c.bf16 %v4070_v3, %v4072_v59  ;;  %v4265_v8 = vmul.f32 %v6316_v4, %v4261_v5  ;;  %v5679_v19 = vld [vmem:[%s6918_s12 + $0xa8] sm:$0xff]   ;;  %v4267_v17 = vmul.f32 %v6316_v4, %v4263_v23 }
0x163c   : > { %5554 = vmatpush3.bf16.msra.mxu0 %v5676_v21  ;;  %v4260_v21 = vsel %vm2109_vm5, %v4258_v52, %v4259_v20 }
0x163d   : > { %5549 = vmatprep.mubr.msk.bf16.mxu1 %vm2268_vm8, %v4076_v7  ;;  %5555 = vmatprep.subr.bf16.mxu0 %v5678_v41  ;;  %v4077_v58 = vpack.c.bf16 %v4068_v11, %v4074_v6  ;;  %v4268_v18 = vpack.c.bf16 %v4265_v8, %v4262_v13  ;;  %v4269_v38 = vpack.c.bf16 %v4267_v17, %v4260_v21  ;;  %v5681_v11 = vld [vmem:[%s6922_s16 + $0x8] sm:$0xff]   ;;  %v5682_v13 = vld [vmem:[%s6922_s16] sm:$0xff]  }
0x163e   : > { %5565 = vmatprep.subr.bf16.mxu1 %v5681_v11 }
0x163f   : > { %5550 = vmatmul.mubr.msk.bf16.vlgmr.msra.gmra.mxu1 %vm2268_vm8, %v4077_v58  ;;  %5561 = vmatprep.mubr.msk.bf16.mxu0 %vm2268_vm8, %v4268_v18 }
0x1640   : > { %5556 = vmatpush3.bf16.msra.mxu0 %v5678_v41  ;;  %5566 = vmatpush3.bf16.msra.mxu1 %v5681_v11 }
0x1641   : > { %5557 = vmatprep.subr.bf16.mxu0 %v5679_v19  ;;  %5567 = vmatprep.subr.bf16.mxu1 %v5682_v13 }
0x1644   : > { %5558 = vmatpush3.bf16.msra.mxu0 %v5679_v19  ;;  %5568 = vmatpush3.bf16.msra.mxu1 %v5682_v13 }
0x1645   : > { %5559 = vmatprep.subr.bf16.mxu0 %v5680_v22 }
0x1648   : > { %5560 = vmatpush3.bf16.msra.mxu0 %v5680_v22 }
0x164b   : > { %5562 = vmatmul.mubr.msk.bf16.vlgmr.msra.gmra.mxu0 %vm2268_vm8, %v4269_v38 }
0x16fb   : > { %v5539_v2 = vpop.f32.mrf.mxu0 }
0x16fd   : > { %v4162_v14 = vpop.f32.mrf.mxu0 }
0x16ff   : > { %v5551_v1 = vpop.f32.mrf.mxu1  ;;  %v5540_v16 = vpop.f32.mrf.mxu0 }
0x1700   : > { %v4250_v27 = vadd.f32 %v5551_v1, %v5539_v2 }
0x1701   : > { %v4241_v24 = vpop.f32.mrf.mxu1  ;;  %v4165_v25 = vpop.f32.mrf.mxu0 }
0x1702   : > { %v4242_v30 = vadd.f32 %v4241_v24, %v4162_v14 }
0x1703   : > { %v5552_v26 = vpop.f32.mrf.mxu1 }
0x1704   : > { %v4253_v32 = vadd.f32 %v5552_v26, %v5540_v16 }
0x1705   : > { %v4244_v4 = vpop.f32.mrf.mxu1 }
0x1706   : > { %v4245_v34 = vadd.f32 %v4244_v4, %v4165_v25  ;;  %v5036_v25 = vld [vmem:[%s6920_s14] ss:$0 sm:$0xff] }
0x1707   : > { %v5037_v4 = vld [vmem:[%s6921_s15] ss:$0 sm:$0xff] }
0x170b   : > { %v5563_v28 = vpop.f32.mrf.mxu0 }
0x170c   : > { %v4360_v31 = vadd.f32 %v5563_v28, %v4250_v27 }
0x170d   : > { %v4343_v29 = vpop.f32.mrf.mxu0 }
0x170e   : > { %v4358_v40 = vadd.f32 %v4343_v29, %v4242_v30  ;;  %v4364_v47 = vadd.f32 %v4360_v31, %v6655_v45 }
0x170f   : > { %v5564_v33 = vpop.f32.mrf.mxu0 }
0x1710   : > { %v4362_v51 = vadd.f32 %v4358_v40, %v6653_v9  ;;  %v4361_v48 = vadd.f32 %v5564_v33, %v4253_v32  ;;  %v4376_v37 = vadd.f32 %v5035_v12, %v4364_v47 }
0x1711   : > { %v4346_v63 = vpop.f32.mrf.mxu0 }
0x1712   : > { %v4359_v0 = vadd.f32 %v4346_v63, %v4245_v34  ;;  %v4374_v35 = vadd.f32 %v5035_v12, %v4362_v51  ;;  %v4365_v15 = vadd.f32 %v4361_v48, %v6663_v61  ;;  %v4386_v9 = vsel %vm678_vm0, %v4376_v37, 0.0 }
0x1714   : > { %v4363_v56 = vadd.f32 %v4359_v0, %v6661_v10  ;;  %v4380_v36 = vsel %vm678_vm0, %v4374_v35, 0.0  ;;  %v4377_v42 = vadd.f32 %v5035_v12, %v4365_v15 }
0x1715   : > { %4381 = vadd.xlane.f32.xlu0 %v4380_v36 }
0x1716   : > { %v4375_v39 = vadd.f32 %v5035_v12, %v4363_v56  ;;  %v4389_v43 = vsel %vm678_vm0, %v4377_v42, 0.0 }
0x1718   : > { %v4383_v45 = vsel %vm678_vm0, %v4375_v39, 0.0 }
0x1719   : > { %4384 = vadd.xlane.f32.xlu1 %v4383_v45  ;;  %4387 = vadd.xlane.f32.xlu0 %v4386_v9 }
0x171d   : > { %4390 = vadd.xlane.f32.xlu1 %v4389_v43 }
0x179e   : > { %v4382_v44 = vpop.xlane.xlu0 %4381 }
0x179f   : > { %v4392_v46 = vmul.f32 0.03125, %v4382_v44 }
0x17a1   : > { %v4396_v61 = vsub.f32 %v4374_v35, %v4392_v46  ;;  %v5038_v35 = vld [vmem:[%s6923_s17] ss:$0 sm:$0xff] }
0x17a2   : > { %v4385_v49 = vpop.xlane.xlu1 %4384  ;;  %v4388_v10 = vpop.xlane.xlu0 %4387 }
0x17a3   : > { %v4393_v50 = vmul.f32 0.03125, %v4385_v49  ;;  %v4394_v52 = vmul.f32 0.03125, %v4388_v10  ;;  %v4400_v53 = vmul.f32 %v4396_v61, %v4396_v61 }
0x17a5   : > { %v4397_v54 = vsub.f32 %v4375_v39, %v4393_v50  ;;  %v4398_v55 = vsub.f32 %v4376_v37, %v4394_v52  ;;  %v4404_v57 = vsel %vm678_vm0, %v4400_v53, 0.0 }
0x17a6   : > { %v4391_v59 = vpop.xlane.xlu1 %4390  ;;  %4405 = vadd.xlane.f32.xlu0 %v4404_v57 }
0x17a7   : > { %v4395_v41 = vmul.f32 0.03125, %v4391_v59  ;;  %v4401_v60 = vmul.f32 %v4397_v54, %v4397_v54  ;;  %v4402_v62 = vmul.f32 %v4398_v55, %v4398_v55 }
0x17a9   : > { %v4399_v3 = vsub.f32 %v4377_v42, %v4395_v41  ;;  %v4407_v5 = vsel %vm678_vm0, %v4401_v60, 0.0  ;;  %v4410_v6 = vsel %vm678_vm0, %v4402_v62, 0.0 }
0x17aa   : > { %4408 = vadd.xlane.f32.xlu1 %v4407_v5  ;;  %4411 = vadd.xlane.f32.xlu0 %v4410_v6 }
0x17ab   : > { %v4403_v7 = vmul.f32 %v4399_v3, %v4399_v3 }
0x17ad   : > { %v4413_v8 = vsel %vm678_vm0, %v4403_v7, 0.0 }
0x17ae   : > { %4414 = vadd.xlane.f32.xlu1 %v4413_v8 }
0x182f   : > { %v4406_v58 = vpop.xlane.xlu0 %4405 }
0x1830   : > { %v4416_v18 = vmul.f32 0.03125, %v4406_v58 }
0x1832   : > { %v4420_v19 = vadd.f32 1e-05, %v4416_v18 }
0x1833   : > { %v4409_v20 = vpop.xlane.xlu1 %4408  ;;  %v4412_v22 = vpop.xlane.xlu0 %4411 }
0x1834   : > { %5779 = vrsqrt.f32 %v4420_v19  ;;  %v4417_v23 = vmul.f32 0.03125, %v4409_v20  ;;  %v4418_v17 = vmul.f32 0.03125, %v4412_v22 }
0x1836   : > { %v4421_v21 = vadd.f32 1e-05, %v4417_v23  ;;  %v4422_v38 = vadd.f32 1e-05, %v4418_v17 }
0x1837   : > { %v4415_v2 = vpop.xlane.xlu1 %4414 }
0x1838   : > { %5781 = vrsqrt.f32 %v4421_v21  ;;  %v4419_v14 = vmul.f32 0.03125, %v4415_v2 }
0x1839   : > { %5783 = vrsqrt.f32 %v4422_v38 }
0x183a   : > { %v4423_v1 = vadd.f32 1e-05, %v4419_v14 }
0x183c   : > { %5785 = vrsqrt.f32 %v4423_v1 }
0x1841   : > { %v5780_v16 = vpop.eup %5779 }
0x1842   : > { %v4428_v24 = vmul.f32 %v5780_v16, %v4396_v61 }
0x1844   : > { %v4438_v30 = vmul.f32 %v5036_v25, %v4428_v24 }
0x1845   : > { %v5782_v26 = vpop.eup %5781 }
0x1846   : > { %v5784_v27 = vpop.eup %5783  ;;  %v4429_v28 = vmul.f32 %v5782_v26, %v4397_v54  ;;  %v6821_v33 = vadd.f32 %v5037_v4, %v4438_v30 }
0x1847   : > { %v4430_v31 = vmul.f32 %v5784_v27, %v4398_v55 }
0x1848   : > { %v4439_v29 = vmul.f32 %v5036_v25, %v4429_v28 }
0x1849   : > { %v5786_v32 = vpop.eup %5785  ;;  %v4440_v47 = vmul.f32 %v5036_v25, %v4430_v31 }
0x184a   : > { %v4431_v40 = vmul.f32 %v5786_v32, %v4399_v3  ;;  %v6823_v34 = vadd.f32 %v5037_v4, %v4439_v29 }
0x184b   : > { %v6828_v63 = vadd.f32 %v5037_v4, %v4440_v47 }
0x184c   : > { %v4452_v51 = vpack.c.bf16 %v6823_v34, %v6821_v33  ;;  %v4441_v48 = vmul.f32 %v5036_v25, %v4431_v40 }
0x184e   : > { %5569 = vmatprep.mubr.msk.bf16.mxu1 %vm678_vm0, %v4452_v51  ;;  %v6830_v12 = vadd.f32 %v5037_v4, %v4441_v48 }
0x1850   : > { %v4453_v0 = vpack.c.bf16 %v6830_v12, %v6828_v63 }
0x1852   : > { %5570 = vmatmul.mubr.msk.bf16.vlgmr.msra.gmra.mxu1 %vm678_vm0, %v4453_v0 }
0x1912   : > { %v5571_v15 = vpop.f32.mrf.mxu1 }
0x1913   : > { %v4526_v56 = vadd.f32 %v5571_v15, %v5038_v35 }
0x1914   : > { %v4517_v36 = vpop.f32.mrf.mxu1 }
0x1915   : > { %v5045_v37 = vmul.f32 -1.442695, %v4526_v56  ;;  %v4518_v39 = vadd.f32 %v5038_v35, %v4517_v36 }
0x1916   : > { %v5572_v45 = vpop.f32.mrf.mxu1 }
0x1917   : > { %5787 = vpow2.f32 %v5045_v37  ;;  %v5043_v9 = vmul.f32 -1.442695, %v4518_v39  ;;  %v4529_v42 = vadd.f32 %v5572_v45, %v5038_v35 }
0x1918   : > { %v4520_v43 = vpop.f32.mrf.mxu1 }
0x1919   : > { %5789 = vpow2.f32 %v5043_v9  ;;  %v5046_v44 = vmul.f32 -1.442695, %v4529_v42  ;;  %v4521_v46 = vadd.f32 %v5038_v35, %v4520_v43 }
0x191b   : > { %v5044_v61 = vmul.f32 -1.442695, %v4521_v46  ;;  %5791 = vpow2.f32 %v5046_v44 }
0x191d   : > { %5793 = vpow2.f32 %v5044_v61 }
0x1924   : > { %v5788_v49 = vpop.eup %5787 }
0x1925   : > { %v4546_v10 = vadd.f32 1.0, %v5788_v49 }
0x1926   : > { %v5790_v50 = vpop.eup %5789 }
0x1927   : > { %5795 = vrcp.f32 %v4546_v10  ;;  %v4544_v52 = vadd.f32 1.0, %v5790_v50 }
0x1928   : > { %v5792_v53 = vpop.eup %5791 }
0x1929   : > { %5797 = vrcp.f32 %v4544_v52  ;;  %v4547_v57 = vadd.f32 1.0, %v5792_v53 }
0x192a   : > { %v5794_v54 = vpop.eup %5793 }
0x192b   : > { %v4545_v55 = vadd.f32 1.0, %v5794_v54 }
0x192d   : > { %5799 = vrcp.f32 %v4545_v55 }
0x192e   : > { %5801 = vrcp.f32 %v4547_v57 }
0x1934   : > { %v5796_v59 = vpop.eup %5795 }
0x1935   : > { %4564 = vrot.lane.b32.xlu1 %v5796_v59, %s6936_s21 }
0x1936   : > { %v5798_v41 = vpop.eup %5797 }
0x1937   : > { %5822 = shalt.err (!%p5819_p3)
}
0x1938   : > { %s5823_s22 = scalar_lea.hbm %s6843_s18, 1024  ;;  %s5827_s29 = scalar_lea.hbm %s6925_s19, 2048 }
0x1939   : > { %p5824_p4 = scmp.ne.s32.totalorder %s6843_s18, %s5823_s22  ;;  %p5828_p9 = scmp.lt.s32.totalorder %s6843_s18, %s6925_s19 }
0x193a   : > { %p5829_p10 = scmp.lt.s32.totalorder %s5827_s29, %s5823_s22 }
0x193b   : > { %p5825_p7 = pnand %p5824_p4, %p6015_p5 }
0x193c   : > { %p5830_p11 = por %p5829_p10, %p5828_p9 }
0x193d   : > { %p5826_p8 = pneg %p5825_p7 }
0x193f   : > { %p5831_p12 = pnand %p5830_p11, %p5826_p8 }
0x1941   : > { %5834 = shalt.err (!%p5831_p12)
}
0x1942   : > { %s5875_s1 = smov 64   ;;  %s5876_s0 = smov 4   ;;  %v5800_v60 = vpop.eup %5799 }
0x1943   : > { %5573 = dma.vmem_to_hbm [thread:$0]  (%p6015_p5), %s6845_s24, 1024, %s6843_s18, %s6850_s20, %s5875_s1, %s5875_s1, %s5876_s0   ;;  %v5802_v62 = vpop.eup %5801 }
0x1944   : > { %s6958_s2 = smov 32   ;;  %s6959_s4 = sshll.u32 %s6970_s27, 4 }
0x1945   : > { %4560 = vrot.lane.b32.xlu0 %v5798_v41, %s6958_s2  ;;  %4562 = vrot.lane.b32.xlu1 %v5800_v60, %s6958_s2  ;;  %s6960_s28 = sld [smem:[#allocation16_spill]] }
0x1949   : > { %4566 = vrot.lane.b32.xlu1 %v5802_v62, %s6958_s2 }
0x194b   : > { %s639_s26 = scalar_lea.vmem %s6960_s28, %s6959_s4 }
0x19a7   : > { %v4565_v3 = vpop.permute.xlu1 %4564 }
0x19a8   : > { %v4574_v7 = vsel %vm678_vm0, %v6828_v63, %v4565_v3 }
0x19a9   : > { %4578 = vst [vmem:[%s639_s26 + $0x10] sm:$0xff] %v4574_v7 }
0x19b7   : > { %v4561_v5 = vpop.permute.xlu0 %4560  ;;  %v4563_v8 = vpop.permute.xlu1 %4562 }
0x19b8   : > { %v4572_v6 = vsel %vm678_vm0, %v6821_v33, %v4561_v5  ;;  %v4573_v11 = vsel %vm678_vm0, %v6823_v34, %v4563_v8 }
0x19b9   : > { %4576 = vst [vmem:[%s639_s26] sm:$0xff] %v4572_v6  ;;  %4577 = vst [vmem:[%s639_s26 + $0x8] sm:$0xff] %v4573_v11 }
0x19bb   : > { %v4567_v13 = vpop.permute.xlu1 %4566 }
0x19bc   : > { %v4575_v58 = vsel %vm678_vm0, %v6830_v12, %v4567_v13 }
0x19bd   : > { %4579 = vst [vmem:[%s639_s26 + $0x18] sm:$0xff] %v4575_v58 }
0x19be PF: > { %s6961_s3 = sld [smem:[#allocation7_spill]] }
0x19bf   : > { %s6962_s27 = sld [smem:[#allocation5_spill]] }
0x19c4   : > { %p5579_p5 = scmp.ge.s32.totalorder %s6961_s3, 2 }
0x19c5   : > { %s4629_s18 = sand.u32 1, %s6962_s27  }
0x19c6   : > { %p5576_p13 = pnand %p5579_p5, %p6019_p6  ;;  %s4630_s20 = scalar_lea.sflag [#allocation3], %s4629_s18 }
0x19c8   : > { %p5577_p0 = pneg %p5576_p13 }
0x19ca   : > { %5852 = dma.done.wait (%p5577_p0), %s4630_s20, 1024  }
0x19cb   : > { %5854 = vsyncadd (%p5577_p0), %s4630_s20, 4294966272  ;;  %s6964_s21 = sld [smem:[#allocation8_spill]]  ;;  %s6967_s0 = smov %s5861_s30 }
0x19cc   : > { %s6965_s29 = sld [smem:[#allocation6_spill]] }
0x19cd   : > { %s6966_s20 = sld [smem:[#allocation9_spill]] }
0x19d1   : > { %p30_p1 = scmp.ge.s32.totalorder %s6964_s21, 4  }
0x19d2   : > { %s6968_s30 = smov %s6965_s29 }
0x19d3   :  { %32 = sbr.rel (!%p30_p1) target bundleno = 10 (0xa), region = 187 }
0x19d8   :  { %4635 = vsyncpa [#allocation3], 1 }
0x19d9   :  { %4637 = vsyncpa [#allocation3 + $0x1], 1 }

</bundles_post_ra>
